<compile_context>
chip_gen: v7x
topology: tpu7x:2x2x1
jax: 0.10.0
libtpu: 0.0.40
codegen_flags: <defaults>
</compile_context>

<pallas_src>
import jax
import jax.numpy as jnp
from jax.experimental import pallas as pl
from jax.experimental.pallas import tpu as pltpu

_TM_TARGET = 512                    # row tile target (multiple of 256 for v6e/v7x MXU)
_VMEM_LIMIT = 32 * 1024 * 1024      # explicit scoped-VMEM cap: safe on v5e/v6e/v7x (64 MiB phys min)

# For output phase parity p (0/1) of a stride-2, pad-1, k=4 ConvTranspose2d:
# list of (kernel_index, padded_input_offset) taps along that axis.
_PHASE_TAPS = {0: ((3, 0), (1, 1)), 1: ((2, 1), (0, 2))}


def _pick_tm(m, target=_TM_TARGET):
    """Largest power-of-two tile <= target that divides m (falls back to full m)."""
    if m <= target:
        return m
    t = target
    while t >= 8:
        if m % t == 0:
            return t
        t //= 2
    return m


# --------------------------------------------------------------------------
# Kernel 1: tiled matmul (bf16 MXU, f32 accumulate) + per-tile BN partial stats.
# --------------------------------------------------------------------------
def _mm_stats_kernel(a_ref, b_ref, o_ref, sum_ref, ssq_ref):
    y = jnp.dot(a_ref[...], b_ref[...], preferred_element_type=jnp.float32)
    o_ref[...] = y
    s = jnp.sum(y, axis=0, keepdims=True)
    ss = jnp.sum(y * y, axis=0, keepdims=True)
    # Replicate the (1, C) partial over the 8 sublane rows of this tile's stats
    # block (keeps the block (8,128)-aligned); the wrapper divides by 8 (exact).
    sum_ref[...] = jnp.broadcast_to(s, sum_ref.shape)
    ssq_ref[...] = jnp.broadcast_to(ss, ssq_ref.shape)


def _mm_tanh_kernel(a_ref, b_ref, o_ref):
    y = jnp.dot(a_ref[...], b_ref[...], preferred_element_type=jnp.float32)
    o_ref[...] = jnp.tanh(y).astype(o_ref.dtype)


def matmul_bn_stats(a, b):
    """a: (M, K) bf16, b: (K, C) bf16 -> (y (M, C) f32, colsum (C,), colssq (C,))."""
    m, k = a.shape
    c = b.shape[1]
    tm = _pick_tm(m)
    g = m // tm
    bytes_acc = a.size * a.dtype.itemsize + b.size * b.dtype.itemsize + m * c * 4
    y, ps, pss = pl.pallas_call(
        _mm_stats_kernel,
        out_shape=(
            jax.ShapeDtypeStruct((m, c), jnp.float32),
            jax.ShapeDtypeStruct((8 * g, c), jnp.float32),
            jax.ShapeDtypeStruct((8 * g, c), jnp.float32),
        ),
        grid_spec=pltpu.PrefetchScalarGridSpec(
            num_scalar_prefetch=0,
            grid=(g,),
            in_specs=[
                pl.BlockSpec((tm, k), lambda i: (i, 0)),
                pl.BlockSpec((k, c), lambda i: (0, 0)),
            ],
            out_specs=[
                pl.BlockSpec((tm, c), lambda i: (i, 0)),
                pl.BlockSpec((8, c), lambda i: (i, 0)),
                pl.BlockSpec((8, c), lambda i: (i, 0)),
            ],
        ),
        compiler_params=pltpu.CompilerParams(
            dimension_semantics=("parallel",), vmem_limit_bytes=_VMEM_LIMIT),
        cost_estimate=pl.CostEstimate(
            flops=2 * m * k * c, transcendentals=0, bytes_accessed=bytes_acc),
    )(a, b)
    colsum = ps.sum(axis=0) * 0.125   # undo the 8x sublane replication
    colssq = pss.sum(axis=0) * 0.125
    return y, colsum, colssq


def matmul_tanh(a, b):
    """Final layer: matmul with tanh fused into the epilogue, no BN statistics."""
    m, k = a.shape
    c = b.shape[1]
    tm = _pick_tm(m)
    g = m // tm
    bytes_acc = a.size * a.dtype.itemsize + b.size * b.dtype.itemsize + m * c * 4
    return pl.pallas_call(
        _mm_tanh_kernel,
        out_shape=jax.ShapeDtypeStruct((m, c), jnp.float32),
        grid_spec=pltpu.PrefetchScalarGridSpec(
            num_scalar_prefetch=0,
            grid=(g,),
            in_specs=[
                pl.BlockSpec((tm, k), lambda i: (i, 0)),
                pl.BlockSpec((k, c), lambda i: (0, 0)),
            ],
            out_specs=pl.BlockSpec((tm, c), lambda i: (i, 0)),
        ),
        compiler_params=pltpu.CompilerParams(
            dimension_semantics=("parallel",), vmem_limit_bytes=_VMEM_LIMIT),
        cost_estimate=pl.CostEstimate(
            flops=2 * m * k * c, transcendentals=m * c, bytes_accessed=bytes_acc),
    )(a, b)


# --------------------------------------------------------------------------
# Kernel 2: fused BatchNorm-affine + LeakyReLU(0.2), lane-dense, bf16 output.
# --------------------------------------------------------------------------
def _affine_leaky_kernel(x_ref, scale_ref, shift_ref, o_ref):
    y = x_ref[...] * scale_ref[...] + shift_ref[...]
    o_ref[...] = jnp.where(y >= 0.0, y, 0.2 * y).astype(o_ref.dtype)


def bn_leaky(y, scale, shift):
    """y: (M, C) f32 pre-activations; per-column scale/shift (C,) -> (M, C) bf16."""
    m, c = y.shape
    # Fold rows into the lane dim so the output block is >=128 lanes wide (dense vst).
    r = 1
    while c * r < 128 and m % (2 * r) == 0:
        r *= 2
    m2, c2 = m // r, c * r
    y2 = y.reshape(m2, c2)                                     # free, contiguous view
    s2 = jnp.tile(scale.astype(jnp.float32), r).reshape(1, c2)
    b2 = jnp.tile(shift.astype(jnp.float32), r).reshape(1, c2)
    tm = _pick_tm(m2)
    out = pl.pallas_call(
        _affine_leaky_kernel,
        out_shape=jax.ShapeDtypeStruct((m2, c2), jnp.bfloat16),
        grid_spec=pltpu.PrefetchScalarGridSpec(
            num_scalar_prefetch=0,
            grid=(m2 // tm,),
            in_specs=[
                pl.BlockSpec((tm, c2), lambda i: (i, 0)),
                pl.BlockSpec((1, c2), lambda i: (0, 0)),
                pl.BlockSpec((1, c2), lambda i: (0, 0)),
            ],
            out_specs=pl.BlockSpec((tm, c2), lambda i: (i, 0)),
        ),
        compiler_params=pltpu.CompilerParams(
            dimension_semantics=("parallel",), vmem_limit_bytes=_VMEM_LIMIT),
        cost_estimate=pl.CostEstimate(
            flops=3 * m * c, transcendentals=0,
            bytes_accessed=m * c * 4 + m * c * 2 + 2 * c2 * 4),
    )(y2, s2, b2)
    return out.reshape(m, c)


# --------------------------------------------------------------------------
# ConvTranspose2d(k=4, stride=2, pad=1) via sub-pixel (phase) decomposition.
# --------------------------------------------------------------------------
def _subpixel_weight(w):
    """PyTorch weight (Cin, Cout, 4, 4) -> B (9*Cin, 4*Cout) bf16 (phase column blocks)."""
    cin, cout = w.shape[0], w.shape[1]
    cols = []
    for py in (0, 1):
        for px in (0, 1):
            col = jnp.zeros((9, cin, cout), jnp.float32)
            for (ky, oy) in _PHASE_TAPS[py]:
                for (kx, ox) in _PHASE_TAPS[px]:
                    col = col.at[oy * 3 + ox].set(w[:, :, ky, kx])
            cols.append(col.reshape(9 * cin, cout))
    return jnp.concatenate(cols, axis=1).astype(jnp.bfloat16)


def conv_t_s2(x, w, *, with_stats):
    """x: (N, H, W, Cin) bf16 -> phase-blocked y (N*H*W, 4*Cout) plus BN partials."""
    n, h, wd, cin = x.shape
    cout = w.shape[1]
    xp = jnp.pad(x, ((0, 0), (1, 1), (1, 1), (0, 0)))
    # 9-tap gather (offsets {0,1,2}^2 of the padded input); ~7x smaller than the
    # old zero-dilated im2col and written once in bf16.
    taps = [xp[:, oy:oy + h, ox:ox + wd, :] for oy in range(3) for ox in range(3)]
    a = jnp.concatenate(taps, axis=-1).reshape(n * h * wd, 9 * cin)
    b = _subpixel_weight(w)
    if with_stats:
        y, cs, css = matmul_bn_stats(a, b)
        return y, cs, css, (n, h, wd, cout)
    y = matmul_tanh(a, b)
    return y, None, None, (n, h, wd, cout)


def _unphase(y, n, h, wd, cout):
    """(N*H*W, 4*Cout) phase-blocked -> (N, 2H, 2W, Cout)."""
    t = y.reshape(n, h, wd, 2, 2, cout)
    t = jnp.transpose(t, (0, 1, 3, 2, 4, 5))
    return t.reshape(n, 2 * h, 2 * wd, cout)


def _bn_scale_shift(colsum, colssq, count, gamma, beta, eps):
    mean = colsum / count
    var = jnp.maximum(colssq / count - mean * mean, 0.0)   # clamp: avoid cancellation negatives
    scale = gamma * jax.lax.rsqrt(var + eps)
    shift = beta - mean * scale
    return scale, shift


# --------------------------------------------------------------------------
# Full Generator forward (training-mode BatchNorm, matching the PyTorch module).
# --------------------------------------------------------------------------
def generator_forward(z_nchw, params):
    eps = 1e-5                                   # nn.BatchNorm2d default
    n, nz = z_nchw.shape[0], z_nchw.shape[1]

    # ---- layer 0: ConvTranspose2d(nz, 8*ngf, 4, 1, 0) on a 1x1 input == one matmul ----
    z2 = z_nchw.reshape(n, nz).astype(jnp.bfloat16)
    w0 = params["w0"]
    c0 = w0.shape[1]
    b0 = jnp.transpose(w0, (0, 2, 3, 1)).reshape(nz, 16 * c0).astype(jnp.bfloat16)
    y0, cs, css = matmul_bn_stats(z2, b0)                       # (n, 16*c0) f32
    colsum = cs.reshape(16, c0).sum(0)
    colssq = css.reshape(16, c0).sum(0)
    scale, shift = _bn_scale_shift(colsum, colssq, n * 16,
                                   params["g0"], params["b0"], eps)
    x = bn_leaky(y0.reshape(n * 16, c0), scale, shift).reshape(n, 4, 4, c0)  # bf16 NHWC

    # ---- layers 1..3: stride-2 ConvT + BatchNorm + LeakyReLU(0.2) ----
    for li in (1, 2, 3):
        w = params[f"w{li}"]
        cout = w.shape[1]
        y, cs, css, (nn, h, wd, _) = conv_t_s2(x, w, with_stats=True)
        colsum = cs.reshape(4, cout).sum(0)                      # fold the 4 phases
        colssq = css.reshape(4, cout).sum(0)
        scale, shift = _bn_scale_shift(colsum, colssq, nn * h * wd * 4,
                                       params[f"g{li}"], params[f"b{li}"], eps)
        ya = bn_leaky(y, jnp.tile(scale, 4), jnp.tile(shift, 4))  # (M, 4*cout) bf16
        x = _unphase(ya, nn, h, wd, cout)

    # ---- layer 4: stride-2 ConvT + Tanh (fused in the matmul epilogue, no BN) ----
    w4 = params["w4"]
    cout = w4.shape[1]
    y, _, _, (nn, h, wd, _) = conv_t_s2(x, w4, with_stats=False)
    out = _unphase(y, nn, h, wd, cout)                           # (N, 64, 64, nc) f32
    return jnp.transpose(out, (0, 3, 1, 2))                      # back to NCHW


# --------------------------------------------------------------------------
# Deterministic parameter init (same shapes as the PyTorch module).
# --------------------------------------------------------------------------
def init_params(key, nz, nc, ngf):
    dims = [(nz, ngf * 8), (ngf * 8, ngf * 4), (ngf * 4, ngf * 2), (ngf * 2, ngf), (ngf, nc)]
    params = {}
    for i, (cin, cout) in enumerate(dims):
        key, k1, k2, k3 = jax.random.split(key, 4)
        params[f"w{i}"] = 0.05 * jax.random.normal(k1, (cin, cout, 4, 4), jnp.float32)
        if i < len(dims) - 1:  # BN after every layer except the last
            params[f"g{i}"] = 1.0 + 0.1 * jax.random.normal(k2, (cout,), jnp.float32)
            params[f"b{i}"] = 0.1 * jax.random.normal(k3, (cout,), jnp.float32)
    return params


if __name__ == "__main__":
    nz, nc, ngf, batch = 16, 3, 8, 2

    key = jax.random.PRNGKey(0)
    kp, kz = jax.random.split(key)
    params = init_params(kp, nz, nc, ngf)
    z = jax.random.normal(kz, (batch, nz, 1, 1), jnp.float32)

    fwd = jax.jit(generator_forward)
    out = fwd(z, params)
    out = jax.block_until_ready(out)

    assert out.shape == (batch, nc, 64, 64), out.shape
    assert bool(jnp.all(jnp.isfinite(out)))
    assert bool(jnp.all(jnp.abs(out) <= 1.0))  # tanh output range
    print("KERNEL_OK")
</pallas_src>

<mosaic_0001>
module attributes {stable_mosaic.version = 11 : i64} {
  func.func @_mm_stats_kernel(%arg0: i32, %arg1: memref<2x16xbf16, #tpu.memory_space<vmem>>, %arg2: memref<16x1024xbf16, #tpu.memory_space<vmem>>, %arg3: memref<2x1024xf32, #tpu.memory_space<vmem>>, %arg4: memref<8x1024xf32, #tpu.memory_space<vmem>>, %arg5: memref<8x1024xf32, #tpu.memory_space<vmem>>) attributes {dimension_semantics = [#tpu.dimension_semantics<parallel>], iteration_bounds = array<i64: 1>, scalar_prefetch = 0 : i64, scratch_operands = 0 : i64, tpu.core_type = #tpu.core_type<tc>, window_params = [{transform_indices = @transform_0, window_bounds = array<i64: 2, 16>}, {pipeline_mode = #tpu.pipeline_mode<synchronous>, transform_indices = @transform_1, window_bounds = array<i64: 16, 1024>}, {transform_indices = @transform_2, window_bounds = array<i64: 2, 1024>}, {transform_indices = @transform_3, window_bounds = array<i64: 8, 1024>}, {transform_indices = @transform_4, window_bounds = array<i64: 8, 1024>}]} {
    %c0 = arith.constant 0 : index
    %c0_0 = arith.constant 0 : index
    %0 = vector.load %arg1[%c0, %c0_0] : memref<2x16xbf16, #tpu.memory_space<vmem>>, vector<2x16xbf16>
    %c0_1 = arith.constant 0 : index
    %c0_2 = arith.constant 0 : index
    %1 = vector.load %arg2[%c0_1, %c0_2] : memref<16x1024xbf16, #tpu.memory_space<vmem>>, vector<16x1024xbf16>
    %cst = arith.constant dense<0.000000e+00> : vector<2x1024xf32>
    %2 = tpu.matmul %0, %1, %cst {dimension_numbers = #tpu.dot_dimension_numbers<[1], [0], [0], [1], [0, 0, 1, 1], [], []>} : vector<2x16xbf16>, vector<16x1024xbf16>, vector<2x1024xf32> -> vector<2x1024xf32>
    %c0_3 = arith.constant 0 : index
    %c0_4 = arith.constant 0 : index
    %3 = vector.load %arg3[%c0_3, %c0_4] : memref<2x1024xf32, #tpu.memory_space<vmem>>, vector<2x1024xf32>
    tpu.vector_store %arg3[%c0_3, %c0_4], %2 {strides = array<i32>} : memref<2x1024xf32, #tpu.memory_space<vmem>>, vector<2x1024xf32>,
    %cst_5 = arith.constant dense<0.000000e+00> : vector<1024xf32>
    %4 = vector.multi_reduction <add>, %2, %cst_5 [0] : vector<2x1024xf32> to vector<1024xf32>
    %5 = vector.shape_cast %4 : vector<1024xf32> to vector<1x1024xf32>
    %6 = arith.mulf %2, %2 : vector<2x1024xf32>
    %cst_6 = arith.constant dense<0.000000e+00> : vector<1024xf32>
    %7 = vector.multi_reduction <add>, %6, %cst_6 [0] : vector<2x1024xf32> to vector<1024xf32>
    %8 = vector.shape_cast %7 : vector<1024xf32> to vector<1x1024xf32>
    %9 = vector.shape_cast %5 : vector<1x1024xf32> to vector<1x1024xf32>
    %10 = vector.broadcast %9 : vector<1x1024xf32> to vector<8x1024xf32>
    %c0_7 = arith.constant 0 : index
    %c0_8 = arith.constant 0 : index
    %11 = vector.load %arg4[%c0_7, %c0_8] : memref<8x1024xf32, #tpu.memory_space<vmem>>, vector<8x1024xf32>
    tpu.vector_store %arg4[%c0_7, %c0_8], %10 {strides = array<i32>} : memref<8x1024xf32, #tpu.memory_space<vmem>>, vector<8x1024xf32>,
    %12 = vector.shape_cast %8 : vector<1x1024xf32> to vector<1x1024xf32>
    %13 = vector.broadcast %12 : vector<1x1024xf32> to vector<8x1024xf32>
    %c0_9 = arith.constant 0 : index
    %c0_10 = arith.constant 0 : index
    %14 = vector.load %arg5[%c0_9, %c0_10] : memref<8x1024xf32, #tpu.memory_space<vmem>>, vector<8x1024xf32>
    tpu.vector_store %arg5[%c0_9, %c0_10], %13 {strides = array<i32>} : memref<8x1024xf32, #tpu.memory_space<vmem>>, vector<8x1024xf32>,
    return
  }
  func.func @transform_0(%arg0: i32) -> (i32, i32) {
    %c0_i32 = arith.constant 0 : i32
    %c0_i32_0 = arith.constant 0 : i32
    return %arg0, %c0_i32 : i32, i32
  }
  func.func @transform_1(%arg0: i32) -> (i32, i32) {
    %c0_i32 = arith.constant 0 : i32
    %c0_i32_0 = arith.constant 0 : i32
    %c0_i32_1 = arith.constant 0 : i32
    return %c0_i32, %c0_i32_0 : i32, i32
  }
  func.func @transform_2(%arg0: i32) -> (i32, i32) {
    %c0_i32 = arith.constant 0 : i32
    %c0_i32_0 = arith.constant 0 : i32
    return %arg0, %c0_i32 : i32, i32
  }
  func.func @transform_3(%arg0: i32) -> (i32, i32) {
    %c0_i32 = arith.constant 0 : i32
    %c0_i32_0 = arith.constant 0 : i32
    return %arg0, %c0_i32 : i32, i32
  }
  func.func @transform_4(%arg0: i32) -> (i32, i32) {
    %c0_i32 = arith.constant 0 : i32
    %c0_i32_0 = arith.constant 0 : i32
    return %arg0, %c0_i32 : i32, i32
  }
}

module attributes {stable_mosaic.version = 11 : i64} {
  func.func @_affine_leaky_kernel(%arg0: i32, %arg1: memref<16x128xf32, #tpu.memory_space<vmem>>, %arg2: memref<1x128xf32, #tpu.memory_space<vmem>>, %arg3: memref<1x128xf32, #tpu.memory_space<vmem>>, %arg4: memref<16x128xbf16, #tpu.memory_space<vmem>>) attributes {dimension_semantics = [#tpu.dimension_semantics<parallel>], iteration_bounds = array<i64: 1>, scalar_prefetch = 0 : i64, scratch_operands = 0 : i64, tpu.core_type = #tpu.core_type<tc>, window_params = [{transform_indices = @transform_0, window_bounds = array<i64: 16, 128>}, {pipeline_mode = #tpu.pipeline_mode<synchronous>, transform_indices = @transform_1, window_bounds = array<i64: 1, 128>}, {pipeline_mode = #tpu.pipeline_mode<synchronous>, transform_indices = @transform_2, window_bounds = array<i64: 1, 128>}, {transform_indices = @transform_3, window_bounds = array<i64: 16, 128>}]} {
    %c0 = arith.constant 0 : index
    %c0_0 = arith.constant 0 : index
    %0 = vector.load %arg1[%c0, %c0_0] : memref<16x128xf32, #tpu.memory_space<vmem>>, vector<16x128xf32>
    %c0_1 = arith.constant 0 : index
    %c0_2 = arith.constant 0 : index
    %1 = vector.load %arg2[%c0_1, %c0_2] : memref<1x128xf32, #tpu.memory_space<vmem>>, vector<1x128xf32>
    %2 = vector.broadcast %1 : vector<1x128xf32> to vector<16x128xf32>
    %3 = arith.mulf %0, %2 : vector<16x128xf32>
    %c0_3 = arith.constant 0 : index
    %c0_4 = arith.constant 0 : index
    %4 = vector.load %arg3[%c0_3, %c0_4] : memref<1x128xf32, #tpu.memory_space<vmem>>, vector<1x128xf32>
    %5 = vector.broadcast %4 : vector<1x128xf32> to vector<16x128xf32>
    %6 = arith.addf %3, %5 : vector<16x128xf32>
    %cst = arith.constant 0.000000e+00 : f32
    %7 = vector.broadcast %cst : f32 to vector<16x128xf32>
    %8 = arith.cmpf oge, %6, %7 : vector<16x128xf32>
    %cst_5 = arith.constant 2.000000e-01 : f32
    %9 = vector.broadcast %cst_5 : f32 to vector<16x128xf32>
    %10 = arith.mulf %9, %6 : vector<16x128xf32>
    %11 = arith.select %8, %6, %10 : vector<16x128xi1>, vector<16x128xf32>
    %12 = arith.truncf %11 : vector<16x128xf32> to vector<16x128xbf16>
    %c0_6 = arith.constant 0 : index
    %c0_7 = arith.constant 0 : index
    %13 = vector.load %arg4[%c0_6, %c0_7] : memref<16x128xbf16, #tpu.memory_space<vmem>>, vector<16x128xbf16>
    tpu.vector_store %arg4[%c0_6, %c0_7], %12 {strides = array<i32>} : memref<16x128xbf16, #tpu.memory_space<vmem>>, vector<16x128xbf16>,
    return
  }
  func.func @transform_0(%arg0: i32) -> (i32, i32) {
    %c0_i32 = arith.constant 0 : i32
    %c0_i32_0 = arith.constant 0 : i32
    return %arg0, %c0_i32 : i32, i32
  }
  func.func @transform_1(%arg0: i32) -> (i32, i32) {
    %c0_i32 = arith.constant 0 : i32
    %c0_i32_0 = arith.constant 0 : i32
    %c0_i32_1 = arith.constant 0 : i32
    return %c0_i32, %c0_i32_0 : i32, i32
  }
  func.func @transform_2(%arg0: i32) -> (i32, i32) {
    %c0_i32 = arith.constant 0 : i32
    %c0_i32_0 = arith.constant 0 : i32
    %c0_i32_1 = arith.constant 0 : i32
    return %c0_i32, %c0_i32_0 : i32, i32
  }
  func.func @transform_3(%arg0: i32) -> (i32, i32) {
    %c0_i32 = arith.constant 0 : i32
    %c0_i32_0 = arith.constant 0 : i32
    return %arg0, %c0_i32 : i32, i32
  }
}

module attributes {stable_mosaic.version = 11 : i64} {
  func.func @_mm_stats_kernel(%arg0: i32, %arg1: memref<32x576xbf16, #tpu.memory_space<vmem>>, %arg2: memref<576x128xbf16, #tpu.memory_space<vmem>>, %arg3: memref<32x128xf32, #tpu.memory_space<vmem>>, %arg4: memref<8x128xf32, #tpu.memory_space<vmem>>, %arg5: memref<8x128xf32, #tpu.memory_space<vmem>>) attributes {dimension_semantics = [#tpu.dimension_semantics<parallel>], iteration_bounds = array<i64: 1>, scalar_prefetch = 0 : i64, scratch_operands = 0 : i64, tpu.core_type = #tpu.core_type<tc>, window_params = [{transform_indices = @transform_0, window_bounds = array<i64: 32, 576>}, {pipeline_mode = #tpu.pipeline_mode<synchronous>, transform_indices = @transform_1, window_bounds = array<i64: 576, 128>}, {transform_indices = @transform_2, window_bounds = array<i64: 32, 128>}, {transform_indices = @transform_3, window_bounds = array<i64: 8, 128>}, {transform_indices = @transform_4, window_bounds = array<i64: 8, 128>}]} {
    %c0 = arith.constant 0 : index
    %c0_0 = arith.constant 0 : index
    %0 = vector.load %arg1[%c0, %c0_0] : memref<32x576xbf16, #tpu.memory_space<vmem>>, vector<32x576xbf16>
    %c0_1 = arith.constant 0 : index
    %c0_2 = arith.constant 0 : index
    %1 = vector.load %arg2[%c0_1, %c0_2] : memref<576x128xbf16, #tpu.memory_space<vmem>>, vector<576x128xbf16>
    %cst = arith.constant dense<0.000000e+00> : vector<32x128xf32>
    %2 = tpu.matmul %0, %1, %cst {dimension_numbers = #tpu.dot_dimension_numbers<[1], [0], [0], [1], [0, 0, 1, 1], [], []>} : vector<32x576xbf16>, vector<576x128xbf16>, vector<32x128xf32> -> vector<32x128xf32>
    %c0_3 = arith.constant 0 : index
    %c0_4 = arith.constant 0 : index
    %3 = vector.load %arg3[%c0_3, %c0_4] : memref<32x128xf32, #tpu.memory_space<vmem>>, vector<32x128xf32>
    tpu.vector_store %arg3[%c0_3, %c0_4], %2 {strides = array<i32>} : memref<32x128xf32, #tpu.memory_space<vmem>>, vector<32x128xf32>,
    %cst_5 = arith.constant dense<0.000000e+00> : vector<128xf32>
    %4 = vector.multi_reduction <add>, %2, %cst_5 [0] : vector<32x128xf32> to vector<128xf32>
    %5 = vector.shape_cast %4 : vector<128xf32> to vector<1x128xf32>
    %6 = arith.mulf %2, %2 : vector<32x128xf32>
    %cst_6 = arith.constant dense<0.000000e+00> : vector<128xf32>
    %7 = vector.multi_reduction <add>, %6, %cst_6 [0] : vector<32x128xf32> to vector<128xf32>
    %8 = vector.shape_cast %7 : vector<128xf32> to vector<1x128xf32>
    %9 = vector.shape_cast %5 : vector<1x128xf32> to vector<1x128xf32>
    %10 = vector.broadcast %9 : vector<1x128xf32> to vector<8x128xf32>
    %c0_7 = arith.constant 0 : index
    %c0_8 = arith.constant 0 : index
    %11 = vector.load %arg4[%c0_7, %c0_8] : memref<8x128xf32, #tpu.memory_space<vmem>>, vector<8x128xf32>
    tpu.vector_store %arg4[%c0_7, %c0_8], %10 {strides = array<i32>} : memref<8x128xf32, #tpu.memory_space<vmem>>, vector<8x128xf32>,
    %12 = vector.shape_cast %8 : vector<1x128xf32> to vector<1x128xf32>
    %13 = vector.broadcast %12 : vector<1x128xf32> to vector<8x128xf32>
    %c0_9 = arith.constant 0 : index
    %c0_10 = arith.constant 0 : index
    %14 = vector.load %arg5[%c0_9, %c0_10] : memref<8x128xf32, #tpu.memory_space<vmem>>, vector<8x128xf32>
    tpu.vector_store %arg5[%c0_9, %c0_10], %13 {strides = array<i32>} : memref<8x128xf32, #tpu.memory_space<vmem>>, vector<8x128xf32>,
    return
  }
  func.func @transform_0(%arg0: i32) -> (i32, i32) {
    %c0_i32 = arith.constant 0 : i32
    %c0_i32_0 = arith.constant 0 : i32
    return %arg0, %c0_i32 : i32, i32
  }
  func.func @transform_1(%arg0: i32) -> (i32, i32) {
    %c0_i32 = arith.constant 0 : i32
    %c0_i32_0 = arith.constant 0 : i32
    %c0_i32_1 = arith.constant 0 : i32
    return %c0_i32, %c0_i32_0 : i32, i32
  }
  func.func @transform_2(%arg0: i32) -> (i32, i32) {
    %c0_i32 = arith.constant 0 : i32
    %c0_i32_0 = arith.constant 0 : i32
    return %arg0, %c0_i32 : i32, i32
  }
  func.func @transform_3(%arg0: i32) -> (i32, i32) {
    %c0_i32 = arith.constant 0 : i32
    %c0_i32_0 = arith.constant 0 : i32
    return %arg0, %c0_i32 : i32, i32
  }
  func.func @transform_4(%arg0: i32) -> (i32, i32) {
    %c0_i32 = arith.constant 0 : i32
    %c0_i32_0 = arith.constant 0 : i32
    return %arg0, %c0_i32 : i32, i32
  }
}

module attributes {stable_mosaic.version = 11 : i64} {
  func.func @_affine_leaky_kernel(%arg0: i32, %arg1: memref<32x128xf32, #tpu.memory_space<vmem>>, %arg2: memref<1x128xf32, #tpu.memory_space<vmem>>, %arg3: memref<1x128xf32, #tpu.memory_space<vmem>>, %arg4: memref<32x128xbf16, #tpu.memory_space<vmem>>) attributes {dimension_semantics = [#tpu.dimension_semantics<parallel>], iteration_bounds = array<i64: 1>, scalar_prefetch = 0 : i64, scratch_operands = 0 : i64, tpu.core_type = #tpu.core_type<tc>, window_params = [{transform_indices = @transform_0, window_bounds = array<i64: 32, 128>}, {pipeline_mode = #tpu.pipeline_mode<synchronous>, transform_indices = @transform_1, window_bounds = array<i64: 1, 128>}, {pipeline_mode = #tpu.pipeline_mode<synchronous>, transform_indices = @transform_2, window_bounds = array<i64: 1, 128>}, {transform_indices = @transform_3, window_bounds = array<i64: 32, 128>}]} {
    %c0 = arith.constant 0 : index
    %c0_0 = arith.constant 0 : index
    %0 = vector.load %arg1[%c0, %c0_0] : memref<32x128xf32, #tpu.memory_space<vmem>>, vector<32x128xf32>
    %c0_1 = arith.constant 0 : index
    %c0_2 = arith.constant 0 : index
    %1 = vector.load %arg2[%c0_1, %c0_2] : memref<1x128xf32, #tpu.memory_space<vmem>>, vector<1x128xf32>
    %2 = vector.broadcast %1 : vector<1x128xf32> to vector<32x128xf32>
    %3 = arith.mulf %0, %2 : vector<32x128xf32>
    %c0_3 = arith.constant 0 : index
    %c0_4 = arith.constant 0 : index
    %4 = vector.load %arg3[%c0_3, %c0_4] : memref<1x128xf32, #tpu.memory_space<vmem>>, vector<1x128xf32>
    %5 = vector.broadcast %4 : vector<1x128xf32> to vector<32x128xf32>
    %6 = arith.addf %3, %5 : vector<32x128xf32>
    %cst = arith.constant 0.000000e+00 : f32
    %7 = vector.broadcast %cst : f32 to vector<32x128xf32>
    %8 = arith.cmpf oge, %6, %7 : vector<32x128xf32>
    %cst_5 = arith.constant 2.000000e-01 : f32
    %9 = vector.broadcast %cst_5 : f32 to vector<32x128xf32>
    %10 = arith.mulf %9, %6 : vector<32x128xf32>
    %11 = arith.select %8, %6, %10 : vector<32x128xi1>, vector<32x128xf32>
    %12 = arith.truncf %11 : vector<32x128xf32> to vector<32x128xbf16>
    %c0_6 = arith.constant 0 : index
    %c0_7 = arith.constant 0 : index
    %13 = vector.load %arg4[%c0_6, %c0_7] : memref<32x128xbf16, #tpu.memory_space<vmem>>, vector<32x128xbf16>
    tpu.vector_store %arg4[%c0_6, %c0_7], %12 {strides = array<i32>} : memref<32x128xbf16, #tpu.memory_space<vmem>>, vector<32x128xbf16>,
    return
  }
  func.func @transform_0(%arg0: i32) -> (i32, i32) {
    %c0_i32 = arith.constant 0 : i32
    %c0_i32_0 = arith.constant 0 : i32
    return %arg0, %c0_i32 : i32, i32
  }
  func.func @transform_1(%arg0: i32) -> (i32, i32) {
    %c0_i32 = arith.constant 0 : i32
    %c0_i32_0 = arith.constant 0 : i32
    %c0_i32_1 = arith.constant 0 : i32
    return %c0_i32, %c0_i32_0 : i32, i32
  }
  func.func @transform_2(%arg0: i32) -> (i32, i32) {
    %c0_i32 = arith.constant 0 : i32
    %c0_i32_0 = arith.constant 0 : i32
    %c0_i32_1 = arith.constant 0 : i32
    return %c0_i32, %c0_i32_0 : i32, i32
  }
  func.func @transform_3(%arg0: i32) -> (i32, i32) {
    %c0_i32 = arith.constant 0 : i32
    %c0_i32_0 = arith.constant 0 : i32
    return %arg0, %c0_i32 : i32, i32
  }
}

module attributes {stable_mosaic.version = 11 : i64} {
  func.func @_mm_stats_kernel(%arg0: i32, %arg1: memref<128x288xbf16, #tpu.memory_space<vmem>>, %arg2: memref<288x64xbf16, #tpu.memory_space<vmem>>, %arg3: memref<128x64xf32, #tpu.memory_space<vmem>>, %arg4: memref<8x64xf32, #tpu.memory_space<vmem>>, %arg5: memref<8x64xf32, #tpu.memory_space<vmem>>) attributes {dimension_semantics = [#tpu.dimension_semantics<parallel>], iteration_bounds = array<i64: 1>, scalar_prefetch = 0 : i64, scratch_operands = 0 : i64, tpu.core_type = #tpu.core_type<tc>, window_params = [{transform_indices = @transform_0, window_bounds = array<i64: 128, 288>}, {pipeline_mode = #tpu.pipeline_mode<synchronous>, transform_indices = @transform_1, window_bounds = array<i64: 288, 64>}, {transform_indices = @transform_2, window_bounds = array<i64: 128, 64>}, {transform_indices = @transform_3, window_bounds = array<i64: 8, 64>}, {transform_indices = @transform_4, window_bounds = array<i64: 8, 64>}]} {
    %c0 = arith.constant 0 : index
    %c0_0 = arith.constant 0 : index
    %0 = vector.load %arg1[%c0, %c0_0] : memref<128x288xbf16, #tpu.memory_space<vmem>>, vector<128x288xbf16>
    %c0_1 = arith.constant 0 : index
    %c0_2 = arith.constant 0 : index
    %1 = vector.load %arg2[%c0_1, %c0_2] : memref<288x64xbf16, #tpu.memory_space<vmem>>, vector<288x64xbf16>
    %cst = arith.constant dense<0.000000e+00> : vector<128x64xf32>
    %2 = tpu.matmul %0, %1, %cst {dimension_numbers = #tpu.dot_dimension_numbers<[1], [0], [0], [1], [0, 0, 1, 1], [], []>} : vector<128x288xbf16>, vector<288x64xbf16>, vector<128x64xf32> -> vector<128x64xf32>
    %c0_3 = arith.constant 0 : index
    %c0_4 = arith.constant 0 : index
    %3 = vector.load %arg3[%c0_3, %c0_4] : memref<128x64xf32, #tpu.memory_space<vmem>>, vector<128x64xf32>
    tpu.vector_store %arg3[%c0_3, %c0_4], %2 {strides = array<i32>} : memref<128x64xf32, #tpu.memory_space<vmem>>, vector<128x64xf32>,
    %cst_5 = arith.constant dense<0.000000e+00> : vector<64xf32>
    %4 = vector.multi_reduction <add>, %2, %cst_5 [0] : vector<128x64xf32> to vector<64xf32>
    %5 = vector.shape_cast %4 : vector<64xf32> to vector<1x64xf32>
    %6 = arith.mulf %2, %2 : vector<128x64xf32>
    %cst_6 = arith.constant dense<0.000000e+00> : vector<64xf32>
    %7 = vector.multi_reduction <add>, %6, %cst_6 [0] : vector<128x64xf32> to vector<64xf32>
    %8 = vector.shape_cast %7 : vector<64xf32> to vector<1x64xf32>
    %9 = vector.shape_cast %5 : vector<1x64xf32> to vector<1x64xf32>
    %10 = vector.broadcast %9 : vector<1x64xf32> to vector<8x64xf32>
    %c0_7 = arith.constant 0 : index
    %c0_8 = arith.constant 0 : index
    %11 = vector.load %arg4[%c0_7, %c0_8] : memref<8x64xf32, #tpu.memory_space<vmem>>, vector<8x64xf32>
    tpu.vector_store %arg4[%c0_7, %c0_8], %10 {strides = array<i32>} : memref<8x64xf32, #tpu.memory_space<vmem>>, vector<8x64xf32>,
    %12 = vector.shape_cast %8 : vector<1x64xf32> to vector<1x64xf32>
    %13 = vector.broadcast %12 : vector<1x64xf32> to vector<8x64xf32>
    %c0_9 = arith.constant 0 : index
    %c0_10 = arith.constant 0 : index
    %14 = vector.load %arg5[%c0_9, %c0_10] : memref<8x64xf32, #tpu.memory_space<vmem>>, vector<8x64xf32>
    tpu.vector_store %arg5[%c0_9, %c0_10], %13 {strides = array<i32>} : memref<8x64xf32, #tpu.memory_space<vmem>>, vector<8x64xf32>,
    return
  }
  func.func @transform_0(%arg0: i32) -> (i32, i32) {
    %c0_i32 = arith.constant 0 : i32
    %c0_i32_0 = arith.constant 0 : i32
    return %arg0, %c0_i32 : i32, i32
  }
  func.func @transform_1(%arg0: i32) -> (i32, i32) {
    %c0_i32 = arith.constant 0 : i32
    %c0_i32_0 = arith.constant 0 : i32
    %c0_i32_1 = arith.constant 0 : i32
    return %c0_i32, %c0_i32_0 : i32, i32
  }
  func.func @transform_2(%arg0: i32) -> (i32, i32) {
    %c0_i32 = arith.constant 0 : i32
    %c0_i32_0 = arith.constant 0 : i32
    return %arg0, %c0_i32 : i32, i32
  }
  func.func @transform_3(%arg0: i32) -> (i32, i32) {
    %c0_i32 = arith.constant 0 : i32
    %c0_i32_0 = arith.constant 0 : i32
    return %arg0, %c0_i32 : i32, i32
  }
  func.func @transform_4(%arg0: i32) -> (i32, i32) {
    %c0_i32 = arith.constant 0 : i32
    %c0_i32_0 = arith.constant 0 : i32
    return %arg0, %c0_i32 : i32, i32
  }
}

module attributes {stable_mosaic.version = 11 : i64} {
  func.func @_affine_leaky_kernel(%arg0: i32, %arg1: memref<64x128xf32, #tpu.memory_space<vmem>>, %arg2: memref<1x128xf32, #tpu.memory_space<vmem>>, %arg3: memref<1x128xf32, #tpu.memory_space<vmem>>, %arg4: memref<64x128xbf16, #tpu.memory_space<vmem>>) attributes {dimension_semantics = [#tpu.dimension_semantics<parallel>], iteration_bounds = array<i64: 1>, scalar_prefetch = 0 : i64, scratch_operands = 0 : i64, tpu.core_type = #tpu.core_type<tc>, window_params = [{transform_indices = @transform_0, window_bounds = array<i64: 64, 128>}, {pipeline_mode = #tpu.pipeline_mode<synchronous>, transform_indices = @transform_1, window_bounds = array<i64: 1, 128>}, {pipeline_mode = #tpu.pipeline_mode<synchronous>, transform_indices = @transform_2, window_bounds = array<i64: 1, 128>}, {transform_indices = @transform_3, window_bounds = array<i64: 64, 128>}]} {
    %c0 = arith.constant 0 : index
    %c0_0 = arith.constant 0 : index
    %0 = vector.load %arg1[%c0, %c0_0] : memref<64x128xf32, #tpu.memory_space<vmem>>, vector<64x128xf32>
    %c0_1 = arith.constant 0 : index
    %c0_2 = arith.constant 0 : index
    %1 = vector.load %arg2[%c0_1, %c0_2] : memref<1x128xf32, #tpu.memory_space<vmem>>, vector<1x128xf32>
    %2 = vector.broadcast %1 : vector<1x128xf32> to vector<64x128xf32>
    %3 = arith.mulf %0, %2 : vector<64x128xf32>
    %c0_3 = arith.constant 0 : index
    %c0_4 = arith.constant 0 : index
    %4 = vector.load %arg3[%c0_3, %c0_4] : memref<1x128xf32, #tpu.memory_space<vmem>>, vector<1x128xf32>
    %5 = vector.broadcast %4 : vector<1x128xf32> to vector<64x128xf32>
    %6 = arith.addf %3, %5 : vector<64x128xf32>
    %cst = arith.constant 0.000000e+00 : f32
    %7 = vector.broadcast %cst : f32 to vector<64x128xf32>
    %8 = arith.cmpf oge, %6, %7 : vector<64x128xf32>
    %cst_5 = arith.constant 2.000000e-01 : f32
    %9 = vector.broadcast %cst_5 : f32 to vector<64x128xf32>
    %10 = arith.mulf %9, %6 : vector<64x128xf32>
    %11 = arith.select %8, %6, %10 : vector<64x128xi1>, vector<64x128xf32>
    %12 = arith.truncf %11 : vector<64x128xf32> to vector<64x128xbf16>
    %c0_6 = arith.constant 0 : index
    %c0_7 = arith.constant 0 : index
    %13 = vector.load %arg4[%c0_6, %c0_7] : memref<64x128xbf16, #tpu.memory_space<vmem>>, vector<64x128xbf16>
    tpu.vector_store %arg4[%c0_6, %c0_7], %12 {strides = array<i32>} : memref<64x128xbf16, #tpu.memory_space<vmem>>, vector<64x128xbf16>,
    return
  }
  func.func @transform_0(%arg0: i32) -> (i32, i32) {
    %c0_i32 = arith.constant 0 : i32
    %c0_i32_0 = arith.constant 0 : i32
    return %arg0, %c0_i32 : i32, i32
  }
  func.func @transform_1(%arg0: i32) -> (i32, i32) {
    %c0_i32 = arith.constant 0 : i32
    %c0_i32_0 = arith.constant 0 : i32
    %c0_i32_1 = arith.constant 0 : i32
    return %c0_i32, %c0_i32_0 : i32, i32
  }
  func.func @transform_2(%arg0: i32) -> (i32, i32) {
    %c0_i32 = arith.constant 0 : i32
    %c0_i32_0 = arith.constant 0 : i32
    %c0_i32_1 = arith.constant 0 : i32
    return %c0_i32, %c0_i32_0 : i32, i32
  }
  func.func @transform_3(%arg0: i32) -> (i32, i32) {
    %c0_i32 = arith.constant 0 : i32
    %c0_i32_0 = arith.constant 0 : i32
    return %arg0, %c0_i32 : i32, i32
  }
}

module attributes {stable_mosaic.version = 11 : i64} {
  func.func @_mm_stats_kernel(%arg0: i32, %arg1: memref<512x144xbf16, #tpu.memory_space<vmem>>, %arg2: memref<144x32xbf16, #tpu.memory_space<vmem>>, %arg3: memref<512x32xf32, #tpu.memory_space<vmem>>, %arg4: memref<8x32xf32, #tpu.memory_space<vmem>>, %arg5: memref<8x32xf32, #tpu.memory_space<vmem>>) attributes {dimension_semantics = [#tpu.dimension_semantics<parallel>], iteration_bounds = array<i64: 1>, scalar_prefetch = 0 : i64, scratch_operands = 0 : i64, tpu.core_type = #tpu.core_type<tc>, window_params = [{transform_indices = @transform_0, window_bounds = array<i64: 512, 144>}, {pipeline_mode = #tpu.pipeline_mode<synchronous>, transform_indices = @transform_1, window_bounds = array<i64: 144, 32>}, {transform_indices = @transform_2, window_bounds = array<i64: 512, 32>}, {transform_indices = @transform_3, window_bounds = array<i64: 8, 32>}, {transform_indices = @transform_4, window_bounds = array<i64: 8, 32>}]} {
    %c0 = arith.constant 0 : index
    %c0_0 = arith.constant 0 : index
    %0 = vector.load %arg1[%c0, %c0_0] : memref<512x144xbf16, #tpu.memory_space<vmem>>, vector<512x144xbf16>
    %c0_1 = arith.constant 0 : index
    %c0_2 = arith.constant 0 : index
    %1 = vector.load %arg2[%c0_1, %c0_2] : memref<144x32xbf16, #tpu.memory_space<vmem>>, vector<144x32xbf16>
    %cst = arith.constant dense<0.000000e+00> : vector<512x32xf32>
    %2 = tpu.matmul %0, %1, %cst {dimension_numbers = #tpu.dot_dimension_numbers<[1], [0], [0], [1], [0, 0, 1, 1], [], []>} : vector<512x144xbf16>, vector<144x32xbf16>, vector<512x32xf32> -> vector<512x32xf32>
    %c0_3 = arith.constant 0 : index
    %c0_4 = arith.constant 0 : index
    %3 = vector.load %arg3[%c0_3, %c0_4] : memref<512x32xf32, #tpu.memory_space<vmem>>, vector<512x32xf32>
    tpu.vector_store %arg3[%c0_3, %c0_4], %2 {strides = array<i32>} : memref<512x32xf32, #tpu.memory_space<vmem>>, vector<512x32xf32>,
    %cst_5 = arith.constant dense<0.000000e+00> : vector<32xf32>
    %4 = vector.multi_reduction <add>, %2, %cst_5 [0] : vector<512x32xf32> to vector<32xf32>
    %5 = vector.shape_cast %4 : vector<32xf32> to vector<1x32xf32>
    %6 = arith.mulf %2, %2 : vector<512x32xf32>
    %cst_6 = arith.constant dense<0.000000e+00> : vector<32xf32>
    %7 = vector.multi_reduction <add>, %6, %cst_6 [0] : vector<512x32xf32> to vector<32xf32>
    %8 = vector.shape_cast %7 : vector<32xf32> to vector<1x32xf32>
    %9 = vector.shape_cast %5 : vector<1x32xf32> to vector<1x32xf32>
    %10 = vector.broadcast %9 : vector<1x32xf32> to vector<8x32xf32>
    %c0_7 = arith.constant 0 : index
    %c0_8 = arith.constant 0 : index
    %11 = vector.load %arg4[%c0_7, %c0_8] : memref<8x32xf32, #tpu.memory_space<vmem>>, vector<8x32xf32>
    tpu.vector_store %arg4[%c0_7, %c0_8], %10 {strides = array<i32>} : memref<8x32xf32, #tpu.memory_space<vmem>>, vector<8x32xf32>,
    %12 = vector.shape_cast %8 : vector<1x32xf32> to vector<1x32xf32>
    %13 = vector.broadcast %12 : vector<1x32xf32> to vector<8x32xf32>
    %c0_9 = arith.constant 0 : index
    %c0_10 = arith.constant 0 : index
    %14 = vector.load %arg5[%c0_9, %c0_10] : memref<8x32xf32, #tpu.memory_space<vmem>>, vector<8x32xf32>
    tpu.vector_store %arg5[%c0_9, %c0_10], %13 {strides = array<i32>} : memref<8x32xf32, #tpu.memory_space<vmem>>, vector<8x32xf32>,
    return
  }
  func.func @transform_0(%arg0: i32) -> (i32, i32) {
    %c0_i32 = arith.constant 0 : i32
    %c0_i32_0 = arith.constant 0 : i32
    return %arg0, %c0_i32 : i32, i32
  }
  func.func @transform_1(%arg0: i32) -> (i32, i32) {
    %c0_i32 = arith.constant 0 : i32
    %c0_i32_0 = arith.constant 0 : i32
    %c0_i32_1 = arith.constant 0 : i32
    return %c0_i32, %c0_i32_0 : i32, i32
  }
  func.func @transform_2(%arg0: i32) -> (i32, i32) {
    %c0_i32 = arith.constant 0 : i32
    %c0_i32_0 = arith.constant 0 : i32
    return %arg0, %c0_i32 : i32, i32
  }
  func.func @transform_3(%arg0: i32) -> (i32, i32) {
    %c0_i32 = arith.constant 0 : i32
    %c0_i32_0 = arith.constant 0 : i32
    return %arg0, %c0_i32 : i32, i32
  }
  func.func @transform_4(%arg0: i32) -> (i32, i32) {
    %c0_i32 = arith.constant 0 : i32
    %c0_i32_0 = arith.constant 0 : i32
    return %arg0, %c0_i32 : i32, i32
  }
}

module attributes {stable_mosaic.version = 11 : i64} {
  func.func @_affine_leaky_kernel(%arg0: i32, %arg1: memref<128x128xf32, #tpu.memory_space<vmem>>, %arg2: memref<1x128xf32, #tpu.memory_space<vmem>>, %arg3: memref<1x128xf32, #tpu.memory_space<vmem>>, %arg4: memref<128x128xbf16, #tpu.memory_space<vmem>>) attributes {dimension_semantics = [#tpu.dimension_semantics<parallel>], iteration_bounds = array<i64: 1>, scalar_prefetch = 0 : i64, scratch_operands = 0 : i64, tpu.core_type = #tpu.core_type<tc>, window_params = [{transform_indices = @transform_0, window_bounds = array<i64: 128, 128>}, {pipeline_mode = #tpu.pipeline_mode<synchronous>, transform_indices = @transform_1, window_bounds = array<i64: 1, 128>}, {pipeline_mode = #tpu.pipeline_mode<synchronous>, transform_indices = @transform_2, window_bounds = array<i64: 1, 128>}, {transform_indices = @transform_3, window_bounds = array<i64: 128, 128>}]} {
    %c0 = arith.constant 0 : index
    %c0_0 = arith.constant 0 : index
    %0 = vector.load %arg1[%c0, %c0_0] : memref<128x128xf32, #tpu.memory_space<vmem>>, vector<128x128xf32>
    %c0_1 = arith.constant 0 : index
    %c0_2 = arith.constant 0 : index
    %1 = vector.load %arg2[%c0_1, %c0_2] : memref<1x128xf32, #tpu.memory_space<vmem>>, vector<1x128xf32>
    %2 = vector.broadcast %1 : vector<1x128xf32> to vector<128x128xf32>
    %3 = arith.mulf %0, %2 : vector<128x128xf32>
    %c0_3 = arith.constant 0 : index
    %c0_4 = arith.constant 0 : index
    %4 = vector.load %arg3[%c0_3, %c0_4] : memref<1x128xf32, #tpu.memory_space<vmem>>, vector<1x128xf32>
    %5 = vector.broadcast %4 : vector<1x128xf32> to vector<128x128xf32>
    %6 = arith.addf %3, %5 : vector<128x128xf32>
    %cst = arith.constant 0.000000e+00 : f32
    %7 = vector.broadcast %cst : f32 to vector<128x128xf32>
    %8 = arith.cmpf oge, %6, %7 : vector<128x128xf32>
    %cst_5 = arith.constant 2.000000e-01 : f32
    %9 = vector.broadcast %cst_5 : f32 to vector<128x128xf32>
    %10 = arith.mulf %9, %6 : vector<128x128xf32>
    %11 = arith.select %8, %6, %10 : vector<128x128xi1>, vector<128x128xf32>
    %12 = arith.truncf %11 : vector<128x128xf32> to vector<128x128xbf16>
    %c0_6 = arith.constant 0 : index
    %c0_7 = arith.constant 0 : index
    %13 = vector.load %arg4[%c0_6, %c0_7] : memref<128x128xbf16, #tpu.memory_space<vmem>>, vector<128x128xbf16>
    tpu.vector_store %arg4[%c0_6, %c0_7], %12 {strides = array<i32>} : memref<128x128xbf16, #tpu.memory_space<vmem>>, vector<128x128xbf16>,
    return
  }
  func.func @transform_0(%arg0: i32) -> (i32, i32) {
    %c0_i32 = arith.constant 0 : i32
    %c0_i32_0 = arith.constant 0 : i32
    return %arg0, %c0_i32 : i32, i32
  }
  func.func @transform_1(%arg0: i32) -> (i32, i32) {
    %c0_i32 = arith.constant 0 : i32
    %c0_i32_0 = arith.constant 0 : i32
    %c0_i32_1 = arith.constant 0 : i32
    return %c0_i32, %c0_i32_0 : i32, i32
  }
  func.func @transform_2(%arg0: i32) -> (i32, i32) {
    %c0_i32 = arith.constant 0 : i32
    %c0_i32_0 = arith.constant 0 : i32
    %c0_i32_1 = arith.constant 0 : i32
    return %c0_i32, %c0_i32_0 : i32, i32
  }
  func.func @transform_3(%arg0: i32) -> (i32, i32) {
    %c0_i32 = arith.constant 0 : i32
    %c0_i32_0 = arith.constant 0 : i32
    return %arg0, %c0_i32 : i32, i32
  }
}

module attributes {stable_mosaic.version = 11 : i64} {
  func.func @_mm_tanh_kernel(%arg0: i32, %arg1: memref<512x72xbf16, #tpu.memory_space<vmem>>, %arg2: memref<72x12xbf16, #tpu.memory_space<vmem>>, %arg3: memref<512x12xf32, #tpu.memory_space<vmem>>) attributes {dimension_semantics = [#tpu.dimension_semantics<parallel>], iteration_bounds = array<i64: 4>, scalar_prefetch = 0 : i64, scratch_operands = 0 : i64, tpu.core_type = #tpu.core_type<tc>, window_params = [{transform_indices = @transform_0, window_bounds = array<i64: 512, 72>}, {pipeline_mode = #tpu.pipeline_mode<synchronous>, transform_indices = @transform_1, window_bounds = array<i64: 72, 12>}, {transform_indices = @transform_2, window_bounds = array<i64: 512, 12>}]} {
    %c0 = arith.constant 0 : index
    %c0_0 = arith.constant 0 : index
    %0 = vector.load %arg1[%c0, %c0_0] : memref<512x72xbf16, #tpu.memory_space<vmem>>, vector<512x72xbf16>
    %c0_1 = arith.constant 0 : index
    %c0_2 = arith.constant 0 : index
    %1 = vector.load %arg2[%c0_1, %c0_2] : memref<72x12xbf16, #tpu.memory_space<vmem>>, vector<72x12xbf16>
    %cst = arith.constant dense<0.000000e+00> : vector<512x12xf32>
    %2 = tpu.matmul %0, %1, %cst {dimension_numbers = #tpu.dot_dimension_numbers<[1], [0], [0], [1], [0, 0, 1, 1], [], []>} : vector<512x72xbf16>, vector<72x12xbf16>, vector<512x12xf32> -> vector<512x12xf32>
    %3 = math.tanh %2 : vector<512x12xf32>
    %c0_3 = arith.constant 0 : index
    %c0_4 = arith.constant 0 : index
    %4 = vector.load %arg3[%c0_3, %c0_4] : memref<512x12xf32, #tpu.memory_space<vmem>>, vector<512x12xf32>
    tpu.vector_store %arg3[%c0_3, %c0_4], %3 {strides = array<i32>} : memref<512x12xf32, #tpu.memory_space<vmem>>, vector<512x12xf32>,
    return
  }
  func.func @transform_0(%arg0: i32) -> (i32, i32) {
    %c0_i32 = arith.constant 0 : i32
    %c0_i32_0 = arith.constant 0 : i32
    return %arg0, %c0_i32 : i32, i32
  }
  func.func @transform_1(%arg0: i32) -> (i32, i32) {
    %c0_i32 = arith.constant 0 : i32
    %c0_i32_0 = arith.constant 0 : i32
    %c0_i32_1 = arith.constant 0 : i32
    return %c0_i32, %c0_i32_0 : i32, i32
  }
  func.func @transform_2(%arg0: i32) -> (i32, i32) {
    %c0_i32 = arith.constant 0 : i32
    %c0_i32_0 = arith.constant 0 : i32
    return %arg0, %c0_i32 : i32, i32
  }
}

</mosaic_0001>

<bundles_post_ra>
// kernel: tile.64
= control target key start
LH: loop header
LB: loop body
LE: loop exit
PB: predicated region body
PF: predicated region fallthrough
CT: control target
= control target key end

     0   :  { %s22_s0 = inlined_call_operand.vmem [shape: f32[64], index: 0, kind: input, shape index: {}]   ;;  %s23_s1 = inlined_call_operand.vmem [shape: f32[2,64], index: 1, kind: output, shape index: {}]  }
   0x1   :  { %v4_v0 = vld [vmem:[%s22_s0] ss:$0 sm:$0xff] }
   0x2   :  { %5 = vst [vmem:[%s23_s1] sm:$0x3] %v4_v0 }

// kernel: tile.65
= control target key start
LH: loop header
LB: loop body
LE: loop exit
PB: predicated region body
PF: predicated region fallthrough
CT: control target
= control target key end

     0   :  { %vm7_vm0 = vcmask 523264   ;;  %vm13_vm1 = vcmask 1048064   ;;  %s39_s0 = inlined_call_operand.vmem [shape: f32[2,64], index: 0, kind: input, shape index: {}]   ;;  %s40_s1 = inlined_call_operand.vmem [shape: f32[1,128], index: 1, kind: output, shape index: {}]  }
   0x1   :  { %v4_v0 = vld [vmem:[%s39_s0] sm:$0x3]  ;;  %s22_s0 = smov 64  }
   0x2   :  { %5 = vst [vmem:[#allocation1] sm:$0x3] %v4_v0 }
   0x9   :  { %v10_v1 = vld [vmem:[#allocation1 + $0x1] sm:$0x1]   ;;  %v6_v2 = vld [vmem:[#allocation1] sm:$0x1]  }
   0xa   :  { %11 = vrot.lane.b32.xlu0 %v10_v1, %s22_s0  ;;  %8 = vst.msk [vmem:[#allocation0] sm:$0x1] %vm7_vm0, %v6_v2  }
  0x7c   :  { %v12_v3 = vpop.permute.xlu0 %11  }
  0x7d   :  { %14 = vst.msk [vmem:[#allocation0] sm:$0x1] %vm13_vm1, %v12_v3  }
  0x84   :  { %v18_v4 = vld [vmem:[#allocation0] sm:$0x1] }
  0x85   :  { %20 = vst [vmem:[%s40_s1] sm:$0x1] %v18_v4 }

// kernel: generator_forward.10
= control target key start
LH: loop header
LB: loop body
LE: loop exit
PB: predicated region body
PF: predicated region fallthrough
CT: control target
= control target key end

     0   :  { %s100_s0 = inlined_call_operand.vmem [shape: f32[16,128], index: 0, kind: input, shape index: {}]   ;;  %s101_s1 = inlined_call_operand.vmem [shape: f32[1,128], index: 1, kind: input, shape index: {}]   ;;  %s102_s2 = inlined_call_operand.vmem [shape: f32[1,128], index: 2, kind: input, shape index: {}]   ;;  %s103_s3 = inlined_call_operand.vmem [shape: bf16[16,128], index: 3, kind: output, shape index: {}]  }
   0x1   :  { %v14_v0 = vld [vmem:[%s100_s0] sm:$0xff]  ;;  %v15_v1 = vld [vmem:[%s100_s0 + $0x8] sm:$0xff] }
   0x2   :  { %v54_v2 = vld [vmem:[%s101_s1] ss:$0 sm:$0xff] }
   0x3   :  { %v23_v3 = vmul.f32 %v54_v2, %v14_v0  ;;  %v24_v4 = vmul.f32 %v54_v2, %v15_v1  ;;  %v55_v5 = vld [vmem:[%s102_s2] ss:$0 sm:$0xff] }
   0x5   :  { %v32_v6 = vadd.f32 %v55_v5, %v23_v3  ;;  %v33_v7 = vadd.f32 %v55_v5, %v24_v4 }
   0x7   :  { %vm34_vm0 = vcmp.ge.f32.partialorder %v32_v6, 0.0  ;;  %vm35_vm1 = vcmp.ge.f32.partialorder %v33_v7, 0.0  ;;  %v36_v8 = vmul.f32 0.2, %v32_v6  ;;  %v37_v9 = vmul.f32 0.2, %v33_v7 }
   0x9   :  { %v38_v10 = vsel %vm34_vm0, %v32_v6, %v36_v8  ;;  %v39_v11 = vsel %vm35_vm1, %v33_v7, %v37_v9 }
   0xa   :  { %v63_v12 = vpack.c.bf16 %v39_v11, %v38_v10 }
   0xc   :  { %64 = vst [vmem:[%s103_s3] sm:$0xff] %v63_v12  }

// kernel: generator_forward.9
= control target key start
LH: loop header
LB: loop body
LE: loop exit
PB: predicated region body
PF: predicated region fallthrough
CT: control target
= control target key end

     0   :  { %v441_v3 = vmov 0   ;;  %vm64_vm0 = vcmask 130048   ;;  %v442_v18 = vmov 1983009808   ;;  %v245_v20 = vlaneseq  ;;  %s595_s1 = inlined_call_operand.vmem [shape: bf16[16,1024], index: 1, kind: input, shape index: {}]   ;;  %s596_s0 = inlined_call_operand.vmem [shape: bf16[2,16], index: 0, kind: input, shape index: {}]   ;;  %s597_s2 = inlined_call_operand.vmem [shape: f32[2,1024], index: 2, kind: output, shape index: {0}]   ;;  %s598_s3 = inlined_call_operand.vmem [shape: f32[8,1024], index: 3, kind: output, shape index: {1}]   ;;  %s599_s4 = inlined_call_operand.vmem [shape: f32[8,1024], index: 4, kind: output, shape index: {2}]  }
   0x1   :  { %v16_v0 = vld [vmem:[%s595_s1] sm:$0xff]  ;;  %v17_v2 = vld [vmem:[%s595_s1 + $0x8] sm:$0xff]  ;;  %100 = vmatprep.mubr.bf16.mxu0 %v441_v3  ;;  %141 = vmatprep.mubr.bf16.mxu1 %v441_v3  ;;  %v18_v7 = vld [vmem:[%s595_s1 + $0x10] sm:$0xff]  ;;  %v243_v19 = vunpack.c.l.s4 %v442_v18  ;;  %vm278_vm1 = vcmask 1041408  }
   0x2   :  { %v20_v1 = vld [vmem:[%s595_s1 + $0x20] sm:$0xff]  ;;  %v21_v5 = vld [vmem:[%s595_s1 + $0x28] sm:$0xff]  ;;  %v22_v10 = vld [vmem:[%s595_s1 + $0x30] sm:$0xff]  ;;  %v246_v22 = vshrl.u32 %v245_v20, 7 }
   0x3   :  { %v428_v4 = vcombine.high %v16_v0, %v20_v1  ;;  %v427_v6 = vcombine.low %v16_v0, %v20_v1  ;;  %v430_v8 = vcombine.high %v17_v2, %v21_v5  ;;  %v429_v9 = vcombine.low %v17_v2, %v21_v5  ;;  %v19_v11 = vld [vmem:[%s595_s1 + $0x18] sm:$0xff]  ;;  %v15_v15 = vld [vmem:[%s596_s0] sm:$0x1] }
   0x4   :  { %v23_v12 = vld [vmem:[%s595_s1 + $0x38] sm:$0xff]  ;;  %v432_v13 = vcombine.high %v18_v7, %v22_v10  ;;  %v431_v16 = vcombine.low %v18_v7, %v22_v10  ;;  %v244_v21 = vunpack.c.0.s8 %v243_v19 }
   0x5   :  { %68 = vmatprep.subr.bf16.mxu0 %v428_v4  ;;  %v434_v14 = vcombine.high %v19_v11, %v23_v12  ;;  %109 = vmatprep.subr.bf16.mxu1 %v430_v8  ;;  %v433_v17 = vcombine.low %v19_v11, %v23_v12 }
   0x6   :  { %69 = vmatpush1.bf16.msra.mxu0 %v427_v6  ;;  %110 = vmatpush1.bf16.msra.mxu1 %v429_v9  ;;  %v495_v24 = vsub.s32 %v244_v21, %v246_v22 }
   0x7   :  { %150 = vmatprep.subr.bf16.mxu0 %v432_v13  ;;  %191 = vmatprep.subr.bf16.mxu1 %v434_v14 }
   0x9   :  { %435 = vmatmul.mubr.msk.bf16.vlgmr.msra.gmra.mrb[0].mxu0 %vm64_vm0, %v15_v15  ;;  %436 = vmatmul.mubr.msk.bf16.vlgmr.msra.gmra.mrb[0].mxu1 %vm64_vm0, %v15_v15 }
   0xa   :  { %151 = vmatpush1.bf16.msra.mxu0 %v431_v16  ;;  %192 = vmatpush1.bf16.msra.mxu1 %v433_v17 }
   0xb   :  { %182 = vmatprep.mubr.bf16.mxu0 %v441_v3  ;;  %223 = vmatprep.mubr.bf16.mxu1 %v441_v3 }
  0x11   :  { %437 = vmatmul.mubr.msk.bf16.vlgmr.msra.gmra.mrb[4].mxu0 %vm64_vm0, %v15_v15  ;;  %438 = vmatmul.mubr.msk.bf16.vlgmr.msra.gmra.mrb[4].mxu1 %vm64_vm0, %v15_v15 }
  0xdc   :  { %v102_v23 = vpop.f32.mrb[0].mxu0  ;;  %v143_v27 = vpop.f32.mrb[0].mxu1 }
  0xdd   :  { %v279_v25 = vsel %vm278_vm1, %v102_v23, 0.0  ;;  %v335_v26 = vmul.f32 %v102_v23, %v102_v23  ;;  %v104_v28 = vpop.f32.mrb[1].mxu0  ;;  %v293_v30 = vsel %vm278_vm1, %v143_v27, 0.0  ;;  %v337_v31 = vmul.f32 %v143_v27, %v143_v27  ;;  %v145_v33 = vpop.f32.mrb[1].mxu1 }
  0xde   :  { %v280_v29 = vrot.slane %v279_v25, 4  ;;  %v240_v32 = vcombine.low %v102_v23, %v104_v28  ;;  %v106_v34 = vpop.f32.mrb[2].mxu0  ;;  %v294_v36 = vrot.slane %v293_v30, 4  ;;  %v286_v37 = vsel %vm278_vm1, %v104_v28, 0.0  ;;  %v147_v39 = vpop.f32.mrb[2].mxu1 }
  0xdf   :  { %v343_v35 = vsel %vm278_vm1, %v335_v26, 0.0  ;;  %v336_v38 = vmul.f32 %v104_v28, %v104_v28  ;;  %v107_v40 = vpop.f32.mrb[3].mxu0  ;;  %v357_v43 = vsel %vm278_vm1, %v337_v31, 0.0  ;;  %v148_v45 = vpop.f32.mrb[3].mxu1  ;;  %v287_v48 = vrot.slane %v286_v37, 4 }
  0xe0   :  { %v281_v41 = vadd.f32 %v280_v29, %v279_v25  ;;  %v344_v42 = vrot.slane %v343_v35, 4  ;;  %v248_v44 = vrot.slane %v240_v32, %v495_v24  ;;  %v295_v46 = vadd.f32 %v294_v36, %v293_v30 }
  0xe1   :  { %v358_v47 = vrot.slane %v357_v43, 4  ;;  %v350_v49 = vsel %vm278_vm1, %v336_v38, 0.0  ;;  %v241_v53 = vcombine.low %v143_v27, %v145_v33  ;;  %v288_v56 = vadd.f32 %v287_v48, %v286_v37 }
  0xe2   :  { %v282_v50 = vrot.slane %v281_v41, 2  ;;  %v345_v51 = vadd.f32 %v344_v42, %v343_v35  ;;  %v351_v52 = vrot.slane %v350_v49, 4  ;;  %v296_v54 = vrot.slane %v295_v46, 2 }
  0xe3   :  { %v359_v55 = vadd.f32 %v358_v47, %v357_v43  ;;  %v300_v57 = vsel %vm278_vm1, %v145_v33, 0.0  ;;  %v255_v61 = vrot.slane %v241_v53, %v495_v24  ;;  %v289_v1 = vrot.slane %v288_v56, 2 }
  0xe4   :  { %v283_v58 = vadd.f32 %v282_v50, %v281_v41  ;;  %v346_v59 = vrot.slane %v345_v51, 2  ;;  %v352_v60 = vadd.f32 %v351_v52, %v350_v49  ;;  %v506_v62 = vpop.f32.mrb[4].mxu0  ;;  %v297_v63 = vadd.f32 %v296_v54, %v295_v46  ;;  %v508_v3 = vpop.f32.mrb[4].mxu1 }
  0xe5   :  { %v360_v0 = vrot.slane %v359_v55, 2  ;;  %v301_v2 = vrot.slane %v300_v57, 4  ;;  %v510_v4 = vpop.f32.mrb[5].mxu0  ;;  %v256_v8 = vcombine.low %v248_v44, %v255_v61  ;;  %v512_v9 = vpop.f32.mrb[5].mxu1  ;;  %v290_v13 = vadd.f32 %v289_v1, %v288_v56 }
  0xe6   :  { %v284_v5 = vrot.slane %v283_v58, 1  ;;  %v347_v6 = vadd.f32 %v346_v59, %v345_v51  ;;  %v353_v7 = vrot.slane %v352_v60, 2  ;;  %v188_v10 = vpop.f32.mrb[6].mxu0  ;;  %v298_v11 = vrot.slane %v297_v63, 1  ;;  %v229_v15 = vpop.f32.mrb[6].mxu1 }
  0xe7   :  { %v361_v12 = vadd.f32 %v360_v0, %v359_v55  ;;  %v302_v14 = vadd.f32 %v301_v2, %v300_v57  ;;  %v189_v16 = vpop.f32.mrb[7].mxu0  ;;  %276 = vst [vmem:[%s597_s2] sm:$0xff] %v256_v8  ;;  %v338_v20 = vmul.f32 %v145_v33, %v145_v33  ;;  %v230_v21 = vpop.f32.mrb[7].mxu1  ;;  %v291_v25 = vrot.slane %v290_v13, 1 }
  0xe8   :  { %v285_v17 = vadd.f32 %v284_v5, %v283_v58  ;;  %v348_v18 = vrot.slane %v347_v6, 1  ;;  %v354_v19 = vadd.f32 %v353_v7, %v352_v60  ;;  %v299_v22 = vadd.f32 %v298_v11, %v297_v63 }
  0xe9   :  { %v362_v23 = vrot.slane %v361_v12, 1  ;;  %v303_v26 = vrot.slane %v302_v14, 2  ;;  %v364_v29 = vsel %vm278_vm1, %v338_v20, 0.0  ;;  %v307_v30 = vsel %vm278_vm1, %v506_v62, 0.0 }
  0xea   :  { %v349_v27 = vadd.f32 %v348_v18, %v347_v6  ;;  %399 = vst [vmem:[%s598_s3] sm:$0xff] %v285_v17  ;;  %v355_v28 = vrot.slane %v354_v19, 1  ;;  %401 = vst [vmem:[%s598_s3 + $0x10] sm:$0xff] %v299_v22  ;;  %v292_v32 = vadd.f32 %v291_v25, %v290_v13  ;;  %v365_v34 = vrot.slane %v364_v29, 4 }
  0xeb   :  { %v363_v31 = vadd.f32 %v362_v23, %v361_v12  ;;  %v304_v33 = vadd.f32 %v303_v26, %v302_v14  ;;  %v308_v36 = vrot.slane %v307_v30, 4  ;;  %v339_v37 = vmul.f32 %v506_v62, %v506_v62 }
  0xec   :  { %407 = vst [vmem:[%s599_s4] sm:$0xff] %v349_v27  ;;  %v356_v35 = vadd.f32 %v355_v28, %v354_v19  ;;  %v321_v38 = vsel %vm278_vm1, %v508_v3, 0.0  ;;  %400 = vst [vmem:[%s598_s3 + $0x8] sm:$0xff] %v292_v32  ;;  %v366_v40 = vadd.f32 %v365_v34, %v364_v29  ;;  %v341_v42 = vmul.f32 %v508_v3, %v508_v3 }
  0xed   :  { %409 = vst [vmem:[%s599_s4 + $0x10] sm:$0xff] %v363_v31  ;;  %v305_v39 = vrot.slane %v304_v33, 1  ;;  %v322_v41 = vrot.slane %v321_v38, 4  ;;  %v309_v43 = vadd.f32 %v308_v36, %v307_v30  ;;  %v371_v44 = vsel %vm278_vm1, %v339_v37, 0.0 }
  0xee   :  { %408 = vst [vmem:[%s599_s4 + $0x8] sm:$0xff] %v356_v35  ;;  %v257_v45 = vcombine.low %v506_v62, %v510_v4  ;;  %v314_v46 = vsel %vm278_vm1, %v510_v4, 0.0  ;;  %v367_v48 = vrot.slane %v366_v40, 2  ;;  %v372_v49 = vrot.slane %v371_v44, 4 }
  0xef   :  { %v306_v47 = vadd.f32 %v305_v39, %v304_v33  ;;  %v323_v50 = vadd.f32 %v322_v41, %v321_v38  ;;  %v310_v51 = vrot.slane %v309_v43, 2  ;;  %v385_v52 = vsel %vm278_vm1, %v341_v42, 0.0 }
  0xf0   :  { %v265_v53 = vrot.slane %v257_v45, %v495_v24  ;;  %v315_v54 = vrot.slane %v314_v46, 4  ;;  %v368_v55 = vadd.f32 %v367_v48, %v366_v40  ;;  %v373_v56 = vadd.f32 %v372_v49, %v371_v44 }
  0xf1   :  { %402 = vst [vmem:[%s598_s3 + $0x18] sm:$0xff] %v306_v47  ;;  %v324_v57 = vrot.slane %v323_v50, 2  ;;  %v386_v58 = vrot.slane %v385_v52, 4  ;;  %v311_v59 = vadd.f32 %v310_v51, %v309_v43  ;;  %v340_v61 = vmul.f32 %v510_v4, %v510_v4 }
  0xf2   :  { %v316_v60 = vadd.f32 %v315_v54, %v314_v46  ;;  %v258_v62 = vcombine.low %v508_v3, %v512_v9  ;;  %v369_v63 = vrot.slane %v368_v55, 1  ;;  %v374_v0 = vrot.slane %v373_v56, 2 }
  0xf3   :  { %v325_v1 = vadd.f32 %v324_v57, %v323_v50  ;;  %v387_v2 = vadd.f32 %v386_v58, %v385_v52  ;;  %v312_v5 = vrot.slane %v311_v59, 1  ;;  %v378_v7 = vsel %vm278_vm1, %v340_v61, 0.0 }
  0xf4   :  { %v317_v6 = vrot.slane %v316_v60, 2  ;;  %v272_v8 = vrot.slane %v258_v62, %v495_v24  ;;  %v370_v10 = vadd.f32 %v369_v63, %v368_v55  ;;  %v375_v11 = vadd.f32 %v374_v0, %v373_v56 }
  0xf5   :  { %v326_v12 = vrot.slane %v325_v1, 1  ;;  %v388_v13 = vrot.slane %v387_v2, 2  ;;  %v313_v14 = vadd.f32 %v312_v5, %v311_v59  ;;  %v379_v4 = vrot.slane %v378_v7, 4 }
  0xf6   :  { %v318_v15 = vadd.f32 %v317_v6, %v316_v60  ;;  %v273_v16 = vcombine.low %v265_v53, %v272_v8  ;;  %410 = vst [vmem:[%s599_s4 + $0x18] sm:$0xff] %v370_v10  ;;  %v376_v3 = vrot.slane %v375_v11, 1  ;;  %v328_v19 = vsel %vm278_vm1, %v512_v9, 0.0 }
  0xf7   :  { %v327_v17 = vadd.f32 %v326_v12, %v325_v1  ;;  %v389_v18 = vadd.f32 %v388_v13, %v387_v2  ;;  %403 = vst [vmem:[%s598_s3 + $0x20] sm:$0xff] %v313_v14  ;;  %v380_v20 = vadd.f32 %v379_v4, %v378_v7  ;;  %v329_v21 = vrot.slane %v328_v19, 4 }
  0xf8   :  { %v319_v24 = vrot.slane %v318_v15, 1  ;;  %277 = vst [vmem:[%s597_s2 + $0x8] sm:$0xff] %v273_v16  ;;  %v342_v22 = vmul.f32 %v512_v9, %v512_v9  ;;  %v377_v23 = vadd.f32 %v376_v3, %v375_v11 }
  0xf9   :  { %v390_v25 = vrot.slane %v389_v18, 1  ;;  %405 = vst [vmem:[%s598_s3 + $0x30] sm:$0xff] %v327_v17  ;;  %v381_v27 = vrot.slane %v380_v20, 2  ;;  %v330_v28 = vadd.f32 %v329_v21, %v328_v19 }
  0xfa   :  { %v320_v26 = vadd.f32 %v319_v24, %v318_v15  ;;  %v392_v29 = vsel %vm278_vm1, %v342_v22, 0.0  ;;  %411 = vst [vmem:[%s599_s4 + $0x20] sm:$0xff] %v377_v23 }
  0xfb   :  { %v391_v30 = vadd.f32 %v390_v25, %v389_v18  ;;  %v393_v31 = vrot.slane %v392_v29, 4  ;;  %v382_v32 = vadd.f32 %v381_v27, %v380_v20  ;;  %v331_v9 = vrot.slane %v330_v28, 2 }
  0xfc   :  { %404 = vst [vmem:[%s598_s3 + $0x28] sm:$0xff] %v320_v26 }
  0xfd   :  { %413 = vst [vmem:[%s599_s4 + $0x30] sm:$0xff] %v391_v30  ;;  %v394_v33 = vadd.f32 %v393_v31, %v392_v29  ;;  %v383_v34 = vrot.slane %v382_v32, 1  ;;  %v332_v35 = vadd.f32 %v331_v9, %v330_v28 }
  0xff   :  { %v395_v36 = vrot.slane %v394_v33, 2  ;;  %v384_v37 = vadd.f32 %v383_v34, %v382_v32  ;;  %v333_v38 = vrot.slane %v332_v35, 1 }
 0x101   :  { %v396_v39 = vadd.f32 %v395_v36, %v394_v33  ;;  %412 = vst [vmem:[%s599_s4 + $0x28] sm:$0xff] %v384_v37  ;;  %v334_v40 = vadd.f32 %v333_v38, %v332_v35 }
 0x103   :  { %v397_v41 = vrot.slane %v396_v39, 1  ;;  %406 = vst [vmem:[%s598_s3 + $0x38] sm:$0xff] %v334_v40 }
 0x105   :  { %v398_v42 = vadd.f32 %v397_v41, %v396_v39 }
 0x107   :  { %414 = vst [vmem:[%s599_s4 + $0x38] sm:$0xff] %v398_v42 }

// kernel: tile.73
= control target key start
LH: loop header
LB: loop body
LE: loop exit
PB: predicated region body
PF: predicated region fallthrough
CT: control target
= control target key end

     0   :  { %s22_s0 = inlined_call_operand.vmem [shape: f32[32], index: 0, kind: input, shape index: {}]   ;;  %s23_s1 = inlined_call_operand.vmem [shape: f32[4,32], index: 1, kind: output, shape index: {}]  }
   0x1   :  { %v4_v0 = vld [vmem:[%s22_s0] ss:$0 sm:$0xff] }
   0x2   :  { %5 = vst [vmem:[%s23_s1] sm:$0xf] %v4_v0 }

// kernel: tile.75
= control target key start
LH: loop header
LB: loop body
LE: loop exit
PB: predicated region body
PF: predicated region fallthrough
CT: control target
= control target key end

     0   :  { %vm7_vm0 = vcmask 261120   ;;  %s37_s8 = smov 32   ;;  %s38_s9 = smov 64   ;;  %vm13_vm1 = vcmask 1048320   ;;  %vm19_vm2 = vcmask 785920   ;;  %vm25_vm3 = vcmask 523520   ;;  %s55_s0 = inlined_call_operand.vmem [shape: f32[4,32], index: 0, kind: input, shape index: {}]   ;;  %s56_s1 = inlined_call_operand.vmem [shape: f32[1,128], index: 1, kind: output, shape index: {}]  }
   0x1   :  { %v4_v0 = vld [vmem:[%s55_s0] sm:$0xf]  ;;  %s36_s0 = smov 96  }
   0x2   :  { %5 = vst [vmem:[#allocation1] sm:$0xf] %v4_v0 }
   0x9   :  { %v10_v1 = vld [vmem:[#allocation1 + $0x3] sm:$0x1]   ;;  %v22_v2 = vld [vmem:[#allocation1 + $0x1] sm:$0x1]   ;;  %v6_v3 = vld [vmem:[#allocation1] sm:$0x1]  }
   0xa   :  { %11 = vrot.lane.b32.xlu0 %v10_v1, %s36_s0  ;;  %23 = vrot.lane.b32.xlu1 %v22_v2, %s37_s8  ;;  %v16_v4 = vld [vmem:[#allocation1 + $0x2] sm:$0x1]   ;;  %8 = vst.msk [vmem:[#allocation0] sm:$0x1] %vm7_vm0, %v6_v3  }
   0xe   :  { %17 = vrot.lane.b32.xlu0 %v16_v4, %s38_s9 }
  0x7c   :  { %v12_v5 = vpop.permute.xlu0 %11   ;;  %v24_v6 = vpop.permute.xlu1 %23  }
  0x7d   :  { %14 = vst.msk [vmem:[#allocation0] sm:$0x1] %vm13_vm1, %v12_v5  }
  0x80   :  { %v18_v7 = vpop.permute.xlu0 %17  }
  0x81   :  { %20 = vst.msk [vmem:[#allocation0] sm:$0x1] %vm19_vm2, %v18_v7  }
  0x82   :  { %26 = vst.msk [vmem:[#allocation0] sm:$0x1] %vm25_vm3, %v24_v6  }
  0x89   :  { %v30_v8 = vld [vmem:[#allocation0] sm:$0x1] }
  0x8a   :  { %32 = vst [vmem:[%s56_s1] sm:$0x1] %v30_v8 }

// kernel: generator_forward.11
= control target key start
LH: loop header
LB: loop body
LE: loop exit
PB: predicated region body
PF: predicated region fallthrough
CT: control target
= control target key end

     0   :  { %vm365_vm0 = vcmask 523264   ;;  %s912_s1 = inlined_call_operand.vmem [shape: bf16[576,128], index: 1, kind: input, shape index: {}]   ;;  %s913_s0 = inlined_call_operand.vmem [shape: bf16[32,576], index: 0, kind: input, shape index: {}]   ;;  %s914_s2 = inlined_call_operand.vmem [shape: f32[32,128], index: 2, kind: output, shape index: {0}]   ;;  %s915_s3 = inlined_call_operand.vmem [shape: f32[8,128], index: 3, kind: output, shape index: {1}]   ;;  %s916_s4 = inlined_call_operand.vmem [shape: f32[8,128], index: 4, kind: output, shape index: {2}]  }
   0x1   :  { %v681_v0 = vld [vmem:[%s912_s1 + $0x40] sm:$0xff]   ;;  %v685_v4 = vld [vmem:[%s912_s1 + $0x48] sm:$0xff]   ;;  %v689_v8 = vld [vmem:[%s912_s1 + $0x50] sm:$0xff]  }
   0x2   :  { %v682_v1 = vld [vmem:[%s912_s1 + $0xc0] sm:$0xff]   ;;  %607 = vmatprep.subr.bf16.mxu0 %v681_v0  ;;  %v686_v5 = vld [vmem:[%s912_s1 + $0xc8] sm:$0xff]   ;;  %v690_v9 = vld [vmem:[%s912_s1 + $0xd0] sm:$0xff]  }
   0x3   :  { %v683_v2 = vld [vmem:[%s912_s1] sm:$0xff]   ;;  %635 = vmatprep.subr.bf16.mxu1 %v682_v1  ;;  %v687_v6 = vld [vmem:[%s912_s1 + $0x8] sm:$0xff]   ;;  %v691_v10 = vld [vmem:[%s912_s1 + $0x10] sm:$0xff]  }
   0x4   :  { %v684_v3 = vld [vmem:[%s912_s1 + $0x80] sm:$0xff]   ;;  %608 = vmatpush3.bf16.msra.mxu0 %v683_v2  ;;  %v688_v7 = vld [vmem:[%s912_s1 + $0x88] sm:$0xff]   ;;  %v692_v11 = vld [vmem:[%s912_s1 + $0x90] sm:$0xff]  }
   0x5   :  { %636 = vmatpush3.bf16.msra.mxu1 %v684_v3  ;;  %609 = vmatprep.subr.bf16.mxu0 %v685_v4  ;;  %v693_v12 = vld [vmem:[%s912_s1 + $0x58] sm:$0xff]   ;;  %v697_v16 = vld [vmem:[%s912_s1 + $0x60] sm:$0xff]   ;;  %v701_v20 = vld [vmem:[%s912_s1 + $0x68] sm:$0xff]  }
   0x6   :  { %637 = vmatprep.subr.bf16.mxu1 %v686_v5  ;;  %v694_v13 = vld [vmem:[%s912_s1 + $0xd8] sm:$0xff]   ;;  %v698_v17 = vld [vmem:[%s912_s1 + $0xe0] sm:$0xff]   ;;  %v702_v21 = vld [vmem:[%s912_s1 + $0xe8] sm:$0xff]  }
   0x7   :  { %v695_v14 = vld [vmem:[%s912_s1 + $0x18] sm:$0xff]   ;;  %v699_v18 = vld [vmem:[%s912_s1 + $0x20] sm:$0xff]   ;;  %v703_v22 = vld [vmem:[%s912_s1 + $0x28] sm:$0xff]  }
   0x8   :  { %610 = vmatpush3.bf16.msra.mxu0 %v687_v6  ;;  %v696_v15 = vld [vmem:[%s912_s1 + $0x98] sm:$0xff]   ;;  %v700_v19 = vld [vmem:[%s912_s1 + $0xa0] sm:$0xff]   ;;  %v704_v23 = vld [vmem:[%s912_s1 + $0xa8] sm:$0xff]  }
   0x9   :  { %638 = vmatpush3.bf16.msra.mxu1 %v688_v7  ;;  %611 = vmatprep.subr.bf16.mxu0 %v689_v8  ;;  %v705_v24 = vld [vmem:[%s912_s1 + $0x70] sm:$0xff]   ;;  %v709_v28 = vld [vmem:[%s912_s1 + $0x78] sm:$0xff]   ;;  %v718_v35 = vld [vmem:[%s913_s0 + $0xc] ss:$20 sps:$4 sm:$0xff]  }
   0xa   :  { %639 = vmatprep.subr.bf16.mxu1 %v690_v9  ;;  %v706_v25 = vld [vmem:[%s912_s1 + $0xf0] sm:$0xff]   ;;  %v710_v29 = vld [vmem:[%s912_s1 + $0xf8] sm:$0xff]   ;;  %v719_v36 = vld [vmem:[%s912_s1 + $0x100] sm:$0xff]   ;;  %453 = vmatprep.mubr.bf16.mxu1 %v718_v35 }
   0xb   :  { %v707_v26 = vld [vmem:[%s912_s1 + $0x30] sm:$0xff]   ;;  %v711_v30 = vld [vmem:[%s912_s1 + $0x38] sm:$0xff]   ;;  %v720_v37 = vld [vmem:[%s912_s1 + $0x108] sm:$0xff]  }
   0xc   :  { %612 = vmatpush3.bf16.msra.mxu0 %v691_v10  ;;  %v708_v27 = vld [vmem:[%s912_s1 + $0xb0] sm:$0xff]   ;;  %v712_v31 = vld [vmem:[%s912_s1 + $0xb8] sm:$0xff]   ;;  %v721_v38 = vld [vmem:[%s913_s0 + $0x2c] ss:$20 sps:$4 sm:$0xff]  }
   0xd   :  { %640 = vmatpush3.bf16.msra.mxu1 %v692_v11  ;;  %613 = vmatprep.subr.bf16.mxu0 %v693_v12  ;;  %v713_v32 = vld [vmem:[%s913_s0] ss:$20 sps:$4 sm:$0xff]   ;;  %v715_v33 = vld [vmem:[%s913_s0 + $0x4] ss:$20 sps:$4 sm:$0xff]   ;;  %v716_v34 = vld [vmem:[%s913_s0 + $0x8] ss:$20 sps:$4 sm:$0xff]  }
   0xe   :  { %641 = vmatprep.subr.bf16.mxu1 %v694_v13  ;;  %404 = vmatprep.mubr.bf16.mxu0 %v715_v33  ;;  %v723_v39 = vld [vmem:[%s913_s0 + $0x34] ss:$20 sps:$4 sm:$0xff]   ;;  %v726_v42 = vld [vmem:[%s913_s0 + $0x30] ss:$20 sps:$4 sm:$0xff]   ;;  %v728_v44 = vld [vmem:[%s912_s1 + $0x118] sm:$0xff]  }
   0xf   :  { %v725_v40 = vld [vmem:[%s913_s0 + $0x28] ss:$20 sps:$4 sm:$0xff]   ;;  %v727_v41 = vld [vmem:[%s912_s1 + $0x110] sm:$0xff]   ;;  %v730_v45 = vld [vmem:[%s913_s0 + $0x38] ss:$20 sps:$4 sm:$0xff]  }
  0x10   :  { %614 = vmatpush3.bf16.msra.mxu0 %v695_v14  ;;  %v729_v43 = vld [vmem:[%s913_s0 + $0x10] ss:$20 sps:$4 sm:$0xff]  }
  0x11   :  { %642 = vmatpush3.bf16.msra.mxu1 %v696_v15  ;;  %615 = vmatprep.subr.bf16.mxu0 %v697_v16 }
  0x12   :  { %643 = vmatprep.subr.bf16.mxu1 %v698_v17 }
  0x14   :  { %616 = vmatpush3.bf16.msra.mxu0 %v699_v18 }
  0x15   :  { %644 = vmatpush3.bf16.msra.mxu1 %v700_v19  ;;  %617 = vmatprep.subr.bf16.mxu0 %v701_v20 }
  0x16   :  { %645 = vmatprep.subr.bf16.mxu1 %v702_v21 }
  0x18   :  { %618 = vmatpush3.bf16.msra.mxu0 %v703_v22 }
  0x19   :  { %646 = vmatpush3.bf16.msra.mxu1 %v704_v23  ;;  %619 = vmatprep.subr.bf16.mxu0 %v705_v24 }
  0x1a   :  { %647 = vmatprep.subr.bf16.mxu1 %v706_v25 }
  0x1c   :  { %620 = vmatpush3.bf16.msra.mxu0 %v707_v26 }
  0x1d   :  { %648 = vmatpush3.bf16.msra.mxu1 %v708_v27  ;;  %621 = vmatprep.subr.bf16.mxu0 %v709_v28 }
  0x1e   :  { %649 = vmatprep.subr.bf16.mxu1 %v710_v29 }
  0x20   :  { %622 = vmatpush3.bf16.msra.mxu0 %v711_v30 }
  0x21   :  { %650 = vmatpush3.bf16.msra.mxu1 %v712_v31  ;;  %669 = vmatprep.subr.bf16.mxu0 %v719_v36 }
  0x23   :  { %405 = vmatmul.mubr.bf16.vlgmr.msra.gmra.mrb[0].mxu0 %v713_v32 }
  0x24   :  { %454 = vmatmul.mubr.bf16.vlgmr.msra.gmra.mrb[0].mxu1 %v716_v34  ;;  %670 = vmatpush3.bf16.msra.mxu0 %v719_v36 }
  0x25   :  { %671 = vmatprep.subr.bf16.mxu0 %v720_v37  ;;  %412 = vmatprep.mubr.bf16.mxu0 %v721_v38 }
  0x26   :  { %461 = vmatprep.mubr.bf16.mxu1 %v723_v39 }
  0x28   :  { %672 = vmatpush3.bf16.msra.mxu0 %v720_v37 }
  0x29   :  { %673 = vmatprep.subr.bf16.mxu0 %v727_v41 }
  0x2b   :  { %413 = vmatmul.mubr.bf16.gmra.mrb[4].mxu0 %v725_v40 }
  0x2c   :  { %462 = vmatmul.mubr.bf16.gmra.mrb[4].mxu1 %v726_v42  ;;  %677 = vmatprep.mubr.msk.bf16.mxu0 %vm365_vm0, %v729_v43 }
  0x2d   :  { %674 = vmatpush3.bf16.msra.mxu0 %v727_v41 }
  0x2e   :  { %675 = vmatprep.subr.bf16.mxu0 %v728_v44 }
  0x31   :  { %676 = vmatpush3.bf16.msra.mxu0 %v728_v44 }
  0x34   :  { %678 = vmatmul.mubr.msk.bf16.vlgmr.msra.gmra.mrb[8].mxu0 %vm365_vm0, %v730_v45 }
  0xf6   :  { %v623_v46 = vpop.f32.mrb[0].mxu0 }
  0xf7   :  { %v651_v47 = vpop.f32.mrb[0].mxu1  ;;  %v624_v48 = vpop.f32.mrb[1].mxu0 }
  0xf8   :  { %v625_v49 = vadd.f32 %v624_v48, %v623_v46  ;;  %v652_v50 = vpop.f32.mrb[1].mxu1  ;;  %v626_v51 = vpop.f32.mrb[2].mxu0 }
  0xf9   :  { %v653_v52 = vadd.f32 %v652_v50, %v651_v47  ;;  %v654_v53 = vpop.f32.mrb[2].mxu1  ;;  %v627_v54 = vpop.f32.mrb[3].mxu0 }
  0xfa   :  { %v628_v55 = vadd.f32 %v627_v54, %v626_v51  ;;  %v655_v56 = vpop.f32.mrb[3].mxu1 }
  0xfb   :  { %v656_v57 = vadd.f32 %v655_v56, %v654_v53  ;;  %v456_v58 = vadd.f32 %v653_v52, %v625_v49 }
  0xfd   :  { %v459_v59 = vadd.f32 %v656_v57, %v628_v55 }
  0xfe   :  { %v629_v60 = vpop.f32.mrb[4].mxu0 }
  0xff   :  { %v657_v61 = vpop.f32.mrb[4].mxu1  ;;  %v630_v62 = vpop.f32.mrb[5].mxu0 }
 0x100   :  { %v631_v63 = vadd.f32 %v630_v62, %v629_v60  ;;  %v658_v0 = vpop.f32.mrb[5].mxu1  ;;  %v632_v1 = vpop.f32.mrb[6].mxu0 }
 0x101   :  { %v659_v2 = vadd.f32 %v658_v0, %v657_v61  ;;  %v660_v3 = vpop.f32.mrb[6].mxu1  ;;  %v633_v4 = vpop.f32.mrb[7].mxu0 }
 0x102   :  { %v634_v5 = vadd.f32 %v633_v4, %v632_v1  ;;  %v661_v6 = vpop.f32.mrb[7].mxu1 }
 0x103   :  { %v662_v7 = vadd.f32 %v661_v6, %v660_v3  ;;  %v464_v8 = vadd.f32 %v659_v2, %v631_v63 }
 0x105   :  { %v467_v9 = vadd.f32 %v662_v7, %v634_v5 }
 0x107   :  { %v679_v10 = vpop.f32.mrb[8].mxu0 }
 0x108   :  { %v513_v11 = vadd.f32 %v679_v10, %v464_v8  ;;  %v504_v12 = vpop.f32.mrb[9].mxu0 }
 0x109   :  { %v505_v13 = vadd.f32 %v504_v12, %v456_v58  ;;  %v680_v14 = vpop.f32.mrb[10].mxu0 }
 0x10a   :  { %521 = vst [vmem:[%s914_s2 + $0x10] sm:$0xff] %v513_v11  ;;  %v516_v15 = vadd.f32 %v680_v14, %v467_v9  ;;  %v507_v16 = vpop.f32.mrb[11].mxu0  ;;  %v534_v21 = vmul.f32 %v513_v11, %v513_v11 }
 0x10b   :  { %519 = vst [vmem:[%s914_s2] sm:$0xff] %v505_v13  ;;  %v508_v17 = vadd.f32 %v507_v16, %v459_v59  ;;  %v532_v18 = vmul.f32 %v505_v13, %v505_v13 }
 0x10c   :  { %522 = vst [vmem:[%s914_s2 + $0x18] sm:$0xff] %v516_v15  ;;  %v535_v24 = vmul.f32 %v516_v15, %v516_v15 }
 0x10d   :  { %520 = vst [vmem:[%s914_s2 + $0x8] sm:$0xff] %v508_v17  ;;  %v523_v19 = vadd.f32 %v508_v17, %v505_v13  ;;  %v533_v20 = vmul.f32 %v508_v17, %v508_v17 }
 0x10f   :  { %v524_v22 = vadd.f32 %v523_v19, %v513_v11  ;;  %v536_v23 = vadd.f32 %v533_v20, %v532_v18 }
 0x111   :  { %v525_v25 = vadd.f32 %v524_v22, %v516_v15  ;;  %v537_v26 = vadd.f32 %v536_v23, %v534_v21 }
 0x113   :  { %v526_v27 = vrot.slane %v525_v25, 4  ;;  %v538_v28 = vadd.f32 %v537_v26, %v535_v24 }
 0x115   :  { %v527_v29 = vadd.f32 %v526_v27, %v525_v25  ;;  %v539_v30 = vrot.slane %v538_v28, 4 }
 0x117   :  { %v528_v31 = vrot.slane %v527_v29, 2  ;;  %v540_v32 = vadd.f32 %v539_v30, %v538_v28 }
 0x119   :  { %v529_v33 = vadd.f32 %v528_v31, %v527_v29  ;;  %v541_v34 = vrot.slane %v540_v32, 2 }
 0x11b   :  { %v530_v35 = vrot.slane %v529_v33, 1  ;;  %v542_v36 = vadd.f32 %v541_v34, %v540_v32 }
 0x11d   :  { %v531_v37 = vadd.f32 %v530_v35, %v529_v33  ;;  %v543_v38 = vrot.slane %v542_v36, 1 }
 0x11f   :  { %v544_v39 = vadd.f32 %v543_v38, %v542_v36  ;;  %545 = vst [vmem:[%s915_s3] sm:$0xff] %v531_v37 }
 0x121   :  { %546 = vst [vmem:[%s916_s4] sm:$0xff] %v544_v39 }

// kernel: generator_forward.12
= control target key start
LH: loop header
LB: loop body
LE: loop exit
PB: predicated region body
PF: predicated region fallthrough
CT: control target
= control target key end

     0   :  { %s141_s0 = inlined_call_operand.vmem [shape: f32[32,128], index: 0, kind: input, shape index: {}]   ;;  %s142_s1 = inlined_call_operand.vmem [shape: f32[1,128], index: 1, kind: input, shape index: {}]   ;;  %s143_s2 = inlined_call_operand.vmem [shape: f32[1,128], index: 2, kind: input, shape index: {}]   ;;  %s144_s3 = inlined_call_operand.vmem [shape: bf16[32,128], index: 3, kind: output, shape index: {}]  }
   0x1   :  { %v14_v0 = vld [vmem:[%s141_s0] sm:$0xff]  ;;  %v15_v1 = vld [vmem:[%s141_s0 + $0x8] sm:$0xff]  ;;  %v16_v6 = vld [vmem:[%s141_s0 + $0x10] sm:$0xff] }
   0x2   :  { %v76_v2 = vld [vmem:[%s142_s1] ss:$0 sm:$0xff]  ;;  %v17_v7 = vld [vmem:[%s141_s0 + $0x18] sm:$0xff] }
   0x3   :  { %v25_v3 = vmul.f32 %v76_v2, %v14_v0  ;;  %v26_v4 = vmul.f32 %v76_v2, %v15_v1  ;;  %v77_v5 = vld [vmem:[%s143_s2] ss:$0 sm:$0xff]  ;;  %v27_v8 = vmul.f32 %v76_v2, %v16_v6  ;;  %v28_v9 = vmul.f32 %v76_v2, %v17_v7 }
   0x5   :  { %v36_v10 = vadd.f32 %v77_v5, %v25_v3  ;;  %v37_v11 = vadd.f32 %v77_v5, %v26_v4  ;;  %v38_v12 = vadd.f32 %v77_v5, %v27_v8  ;;  %v39_v13 = vadd.f32 %v77_v5, %v28_v9 }
   0x7   :  { %vm40_vm0 = vcmp.ge.f32.partialorder %v36_v10, 0.0  ;;  %vm41_vm1 = vcmp.ge.f32.partialorder %v37_v11, 0.0  ;;  %v44_v14 = vmul.f32 0.2, %v36_v10  ;;  %v45_v15 = vmul.f32 0.2, %v37_v11 }
   0x8   :  { %vm42_vm2 = vcmp.ge.f32.partialorder %v38_v12, 0.0  ;;  %vm43_vm3 = vcmp.ge.f32.partialorder %v39_v13, 0.0  ;;  %v46_v16 = vmul.f32 0.2, %v38_v12  ;;  %v47_v17 = vmul.f32 0.2, %v39_v13 }
   0x9   :  { %v48_v18 = vsel %vm40_vm0, %v36_v10, %v44_v14  ;;  %v49_v19 = vsel %vm41_vm1, %v37_v11, %v45_v15 }
   0xa   :  { %v89_v20 = vpack.c.bf16 %v49_v19, %v48_v18  ;;  %v50_v21 = vsel %vm42_vm2, %v38_v12, %v46_v16  ;;  %v51_v22 = vsel %vm43_vm3, %v39_v13, %v47_v17 }
   0xb   :  { %v94_v23 = vpack.c.bf16 %v51_v22, %v50_v21 }
   0xc   :  { %90 = vst [vmem:[%s144_s3] sm:$0xff] %v89_v20  }
   0xd   :  { %96 = vst [vmem:[%s144_s3 + $0x8] sm:$0xff] %v94_v23  }

// kernel: tile.83
= control target key start
LH: loop header
LB: loop body
LE: loop exit
PB: predicated region body
PF: predicated region fallthrough
CT: control target
= control target key end

     0   :  { %s22_s0 = inlined_call_operand.vmem [shape: f32[16], index: 0, kind: input, shape index: {}]   ;;  %s23_s1 = inlined_call_operand.vmem [shape: f32[4,16], index: 1, kind: output, shape index: {}]  }
   0x1   :  { %v4_v0 = vld [vmem:[%s22_s0] ss:$0 sm:$0xff] }
   0x2   :  { %5 = vst [vmem:[%s23_s1] sm:$0xf] %v4_v0 }

// kernel: tile.91
= control target key start
LH: loop header
LB: loop body
LE: loop exit
PB: predicated region body
PF: predicated region fallthrough
CT: control target
= control target key end

     0   :  { %vm7_vm0 = vcmask 130048   ;;  %s37_s8 = smov 16   ;;  %s38_s9 = smov 32   ;;  %vm13_vm1 = vcmask 523648   ;;  %vm19_vm2 = vcmask 392448   ;;  %vm25_vm3 = vcmask 261248   ;;  %s55_s0 = inlined_call_operand.vmem [shape: f32[4,16], index: 0, kind: input, shape index: {}]   ;;  %s56_s1 = inlined_call_operand.vmem [shape: f32[64], index: 1, kind: output, shape index: {}]  }
   0x1   :  { %v4_v0 = vld [vmem:[%s55_s0] sm:$0xf]  ;;  %s36_s0 = smov 48  }
   0x2   :  { %5 = vst [vmem:[#allocation1] sm:$0xf] %v4_v0 }
   0x9   :  { %v10_v1 = vld [vmem:[#allocation1 + $0x3] sm:$0x1]   ;;  %v22_v2 = vld [vmem:[#allocation1 + $0x1] sm:$0x1]   ;;  %v6_v3 = vld [vmem:[#allocation1] sm:$0x1]  }
   0xa   :  { %11 = vrot.lane.b32.xlu0 %v10_v1, %s36_s0  ;;  %23 = vrot.lane.b32.xlu1 %v22_v2, %s37_s8  ;;  %v16_v4 = vld [vmem:[#allocation1 + $0x2] sm:$0x1]   ;;  %8 = vst.msk [vmem:[#allocation0] sm:$0x1] %vm7_vm0, %v6_v3  }
   0xe   :  { %17 = vrot.lane.b32.xlu0 %v16_v4, %s38_s9 }
  0x7c   :  { %v12_v5 = vpop.permute.xlu0 %11   ;;  %v24_v6 = vpop.permute.xlu1 %23  }
  0x7d   :  { %14 = vst.msk [vmem:[#allocation0] sm:$0x1] %vm13_vm1, %v12_v5  }
  0x80   :  { %v18_v7 = vpop.permute.xlu0 %17  }
  0x81   :  { %20 = vst.msk [vmem:[#allocation0] sm:$0x1] %vm19_vm2, %v18_v7  }
  0x82   :  { %26 = vst.msk [vmem:[#allocation0] sm:$0x1] %vm25_vm3, %v24_v6  }
  0x89   :  { %v30_v8 = vld [vmem:[#allocation0] sm:$0x1] }
  0x8a   :  { %32 = vst [vmem:[%s56_s1] sm:$0x1] %v30_v8 }

// kernel: generator_forward.13
= control target key start
LH: loop header
LB: loop body
LE: loop exit
PB: predicated region body
PF: predicated region fallthrough
CT: control target
= control target key end

     0   :  { %vm311_vm0 = vcmask 261120   ;;  %vm530_vm1 = vcmask 523264   ;;  %s1136_s1 = inlined_call_operand.vmem [shape: bf16[288,64], index: 1, kind: input, shape index: {}]   ;;  %s1137_s0 = inlined_call_operand.vmem [shape: bf16[128,288], index: 0, kind: input, shape index: {}]   ;;  %s1138_s2 = inlined_call_operand.vmem [shape: f32[128,64], index: 2, kind: output, shape index: {0}]   ;;  %s1139_s3 = inlined_call_operand.vmem [shape: f32[8,64], index: 3, kind: output, shape index: {1}]   ;;  %s1140_s4 = inlined_call_operand.vmem [shape: f32[8,64], index: 4, kind: output, shape index: {2}]  }
   0x1   :  { %v811_v0 = vld [vmem:[%s1136_s1 + $0x40] sm:$0xff]   ;;  %v813_v2 = vld [vmem:[%s1136_s1 + $0x48] sm:$0xff]   ;;  %v815_v4 = vld [vmem:[%s1136_s1 + $0x50] sm:$0xff]  }
   0x2   :  { %v812_v1 = vld [vmem:[%s1136_s1] sm:$0xff]   ;;  %701 = vmatprep.subr.bf16.mxu0 %v811_v0  ;;  %795 = vmatprep.subr.bf16.mxu1 %v811_v0  ;;  %v814_v3 = vld [vmem:[%s1136_s1 + $0x8] sm:$0xff]   ;;  %v816_v5 = vld [vmem:[%s1136_s1 + $0x10] sm:$0xff]  }
   0x3   :  { %702 = vmatpush3.bf16.msra.mxu0 %v812_v1  ;;  %803 = vmatpush3.bf16.msra.mxu1 %v812_v1  ;;  %v817_v6 = vld [vmem:[%s1136_s1 + $0x58] sm:$0xff]   ;;  %v819_v8 = vld [vmem:[%s1136_s1 + $0x60] sm:$0xff]   ;;  %v821_v10 = vld [vmem:[%s1136_s1 + $0x68] sm:$0xff]  }
   0x4   :  { %703 = vmatprep.subr.bf16.mxu0 %v813_v2  ;;  %796 = vmatprep.subr.bf16.mxu1 %v813_v2  ;;  %v818_v7 = vld [vmem:[%s1136_s1 + $0x18] sm:$0xff]   ;;  %v820_v9 = vld [vmem:[%s1136_s1 + $0x20] sm:$0xff]   ;;  %v822_v13 = vld [vmem:[%s1136_s1 + $0x28] sm:$0xff]  }
   0x5   :  { %v829_v11 = vld [vmem:[%s1137_s0 + $0x4] ss:$12 sps:$4 sm:$0xff]   ;;  %v832_v12 = vld [vmem:[%s1137_s0 + $0x94] ss:$12 sps:$4 sm:$0xff]   ;;  %v825_v16 = vld [vmem:[%s1136_s1 + $0x78] sm:$0xff]  }
   0x6   :  { %v823_v14 = vld [vmem:[%s1136_s1 + $0x70] sm:$0xff]   ;;  %368 = vmatprep.mubr.bf16.mxu0 %v829_v11  ;;  %416 = vmatprep.mubr.bf16.mxu1 %v832_v12  ;;  %v826_v17 = vld [vmem:[%s1136_s1 + $0x38] sm:$0xff]   ;;  %v827_v18 = vld [vmem:[%s1137_s0] ss:$12 sps:$4 sm:$0xff]  }
   0x7   :  { %704 = vmatpush3.bf16.msra.mxu0 %v814_v3  ;;  %804 = vmatpush3.bf16.msra.mxu1 %v814_v3  ;;  %v824_v15 = vld [vmem:[%s1136_s1 + $0x30] sm:$0xff]   ;;  %v833_v19 = vld [vmem:[%s1136_s1 + $0x80] sm:$0xff]   ;;  %v834_v21 = vld [vmem:[%s1137_s0 + $0x1c] ss:$12 sps:$4 sm:$0xff]  }
   0x8   :  { %705 = vmatprep.subr.bf16.mxu0 %v815_v4  ;;  %797 = vmatprep.subr.bf16.mxu1 %v815_v4  ;;  %v830_v20 = vld [vmem:[%s1137_s0 + $0x90] ss:$12 sps:$4 sm:$0xff]   ;;  %v836_v22 = vld [vmem:[%s1137_s0 + $0xac] ss:$12 sps:$4 sm:$0xff]   ;;  %v839_v25 = vld [vmem:[%s1137_s0 + $0xa8] ss:$12 sps:$4 sm:$0xff]  }
   0x9   :  { %v840_v23 = vld [vmem:[%s1136_s1 + $0x88] sm:$0xff]   ;;  %v838_v24 = vld [vmem:[%s1137_s0 + $0x18] ss:$12 sps:$4 sm:$0xff]   ;;  %v841_v26 = vld [vmem:[%s1137_s0 + $0x34] ss:$12 sps:$4 sm:$0xff]  }
   0xa   :  { %v843_v27 = vld [vmem:[%s1137_s0 + $0x8] ss:$12 sps:$4 sm:$0xff]   ;;  %v844_v28 = vld [vmem:[%s1137_s0 + $0x30] ss:$12 sps:$4 sm:$0xff]   ;;  %v845_v29 = vld [vmem:[%s1137_s0 + $0x20] ss:$12 sps:$4 sm:$0xff]  }
   0xb   :  { %706 = vmatpush3.bf16.msra.mxu0 %v816_v5  ;;  %805 = vmatpush3.bf16.msra.mxu1 %v816_v5  ;;  %v846_v30 = vld [vmem:[%s1137_s0 + $0x4c] ss:$12 sps:$4 sm:$0xff]   ;;  %v849_v32 = vld [vmem:[%s1137_s0 + $0x48] ss:$12 sps:$4 sm:$0xff]   ;;  %v850_v33 = vld [vmem:[%s1137_s0 + $0x50] ss:$12 sps:$4 sm:$0xff]  }
   0xc   :  { %707 = vmatprep.subr.bf16.mxu0 %v817_v6  ;;  %798 = vmatprep.subr.bf16.mxu1 %v817_v6  ;;  %v848_v31 = vld [vmem:[%s1137_s0 + $0x38] ss:$12 sps:$4 sm:$0xff]   ;;  %v853_v35 = vld [vmem:[%s1137_s0 + $0x68] ss:$12 sps:$4 sm:$0xff]   ;;  %v854_v36 = vld [vmem:[%s1137_s0 + $0x60] ss:$12 sps:$4 sm:$0xff]  }
   0xd   :  { %v851_v34 = vld [vmem:[%s1137_s0 + $0x64] ss:$12 sps:$4 sm:$0xff]   ;;  %v855_v37 = vld [vmem:[%s1137_s0 + $0x80] ss:$12 sps:$4 sm:$0xff]   ;;  %v856_v38 = vld [vmem:[%s1137_s0 + $0x7c] ss:$12 sps:$4 sm:$0xff]  }
   0xe   :  { %v858_v39 = vld [vmem:[%s1137_s0 + $0x98] ss:$12 sps:$4 sm:$0xff]   ;;  %v860_v41 = vld [vmem:[%s1137_s0 + $0xb0] ss:$12 sps:$4 sm:$0xff]  }
   0xf   :  { %708 = vmatpush3.bf16.msra.mxu0 %v818_v7  ;;  %806 = vmatpush3.bf16.msra.mxu1 %v818_v7  ;;  %v859_v40 = vld [vmem:[%s1137_s0 + $0x78] ss:$12 sps:$4 sm:$0xff]  }
  0x10   :  { %709 = vmatprep.subr.bf16.mxu0 %v819_v8  ;;  %799 = vmatprep.subr.bf16.mxu1 %v819_v8 }
  0x13   :  { %710 = vmatpush3.bf16.msra.mxu0 %v820_v9  ;;  %807 = vmatpush3.bf16.msra.mxu1 %v820_v9 }
  0x14   :  { %711 = vmatprep.subr.bf16.mxu0 %v821_v10  ;;  %800 = vmatprep.subr.bf16.mxu1 %v821_v10 }
  0x17   :  { %712 = vmatpush3.bf16.msra.mxu0 %v822_v13  ;;  %808 = vmatpush3.bf16.msra.mxu1 %v822_v13 }
  0x18   :  { %713 = vmatprep.subr.bf16.mxu0 %v823_v14  ;;  %801 = vmatprep.subr.bf16.mxu1 %v823_v14 }
  0x1b   :  { %714 = vmatpush3.bf16.msra.mxu0 %v824_v15  ;;  %809 = vmatpush3.bf16.msra.mxu1 %v824_v15 }
  0x1c   :  { %715 = vmatprep.subr.bf16.mxu0 %v825_v16  ;;  %802 = vmatprep.subr.bf16.mxu1 %v825_v16 }
  0x1f   :  { %716 = vmatpush3.bf16.msra.mxu0 %v826_v17  ;;  %810 = vmatpush3.bf16.msra.mxu1 %v826_v17 }
  0x20   :  { %775 = vmatprep.subr.bf16.mxu1 %v833_v19 }
  0x22   :  { %369 = vmatmul.mubr.bf16.vlgmr.msra.gmra.mrb[0].mxu0 %v827_v18  ;;  %417 = vmatmul.mubr.bf16.vlgmr.msra.gmra.mrb[0].mxu1 %v830_v20 }
  0x23   :  { %776 = vmatpush3.bf16.msra.mxu1 %v833_v19  ;;  %376 = vmatprep.mubr.bf16.mxu0 %v834_v21 }
  0x24   :  { %424 = vmatprep.mubr.bf16.mxu1 %v836_v22  ;;  %777 = vmatprep.subr.bf16.mxu1 %v840_v23 }
  0x27   :  { %778 = vmatpush3.bf16.msra.mxu1 %v840_v23 }
  0x2a   :  { %377 = vmatmul.mubr.bf16.gmra.mrb[4].mxu0 %v838_v24  ;;  %425 = vmatmul.mubr.bf16.gmra.mrb[4].mxu1 %v839_v25 }
  0x2b   :  { %384 = vmatprep.mubr.bf16.mxu0 %v841_v26  ;;  %779 = vmatprep.mubr.msk.bf16.mxu1 %vm311_vm0, %v843_v27 }
  0x32   :  { %385 = vmatmul.mubr.bf16.gmra.mrb[8].mxu0 %v844_v28  ;;  %780 = vmatmul.mubr.msk.bf16.vlgmr.msra.gmra.mrb[8].mxu1 %vm311_vm0, %v845_v29 }
  0x33   :  { %392 = vmatprep.mubr.bf16.mxu0 %v846_v30  ;;  %783 = vmatprep.mubr.msk.bf16.mxu1 %vm311_vm0, %v848_v31 }
  0x3a   :  { %393 = vmatmul.mubr.bf16.gmra.mrb[12].mxu0 %v849_v32  ;;  %784 = vmatmul.mubr.msk.bf16.gmra.mrb[12].mxu1 %vm311_vm0, %v850_v33 }
  0x3b   :  { %400 = vmatprep.mubr.bf16.mxu0 %v851_v34  ;;  %787 = vmatprep.mubr.msk.bf16.mxu1 %vm311_vm0, %v853_v35 }
  0x42   :  { %401 = vmatmul.mubr.bf16.gmra.mrb[16].mxu0 %v854_v36  ;;  %788 = vmatmul.mubr.msk.bf16.gmra.mrb[16].mxu1 %vm311_vm0, %v855_v37 }
  0x43   :  { %408 = vmatprep.mubr.bf16.mxu0 %v856_v38  ;;  %791 = vmatprep.mubr.msk.bf16.mxu1 %vm311_vm0, %v858_v39 }
  0x4a   :  { %409 = vmatmul.mubr.bf16.gmra.mrb[20].mxu0 %v859_v40  ;;  %792 = vmatmul.mubr.msk.bf16.gmra.mrb[20].mxu1 %vm311_vm0, %v860_v41 }
  0xf5   :  { %v717_v42 = vpop.f32.mrb[0].mxu0  ;;  %v753_v43 = vpop.f32.mrb[0].mxu1 }
  0xf6   :  { %v718_v44 = vpop.f32.mrb[1].mxu0  ;;  %v754_v45 = vpop.f32.mrb[1].mxu1 }
  0xf7   :  { %v719_v46 = vadd.f32 %v718_v44, %v717_v42  ;;  %v720_v47 = vpop.f32.mrb[2].mxu0  ;;  %v1020_v48 = vadd.f32 %v754_v45, %v753_v43  ;;  %v756_v49 = vpop.f32.mrb[2].mxu1 }
  0xf8   :  { %v721_v50 = vpop.f32.mrb[3].mxu0  ;;  %v757_v51 = vpop.f32.mrb[3].mxu1 }
  0xf9   :  { %v722_v52 = vadd.f32 %v721_v50, %v720_v47  ;;  %v1022_v53 = vadd.f32 %v757_v51, %v756_v49 }
  0xfd   :  { %v723_v54 = vpop.f32.mrb[4].mxu0  ;;  %v759_v55 = vpop.f32.mrb[4].mxu1 }
  0xfe   :  { %v724_v56 = vpop.f32.mrb[5].mxu0  ;;  %v760_v57 = vpop.f32.mrb[5].mxu1 }
  0xff   :  { %v725_v58 = vadd.f32 %v724_v56, %v723_v54  ;;  %v726_v59 = vpop.f32.mrb[6].mxu0  ;;  %v1024_v60 = vadd.f32 %v760_v57, %v759_v55  ;;  %v762_v61 = vpop.f32.mrb[6].mxu1 }
 0x100   :  { %v727_v62 = vpop.f32.mrb[7].mxu0  ;;  %v763_v63 = vpop.f32.mrb[7].mxu1 }
 0x101   :  { %v728_v0 = vadd.f32 %v727_v62, %v726_v59  ;;  %v1026_v1 = vadd.f32 %v763_v63, %v762_v61 }
 0x105   :  { %v729_v2 = vpop.f32.mrb[8].mxu0  ;;  %v781_v3 = vpop.f32.mrb[8].mxu1 }
 0x106   :  { %v476_v4 = vadd.f32 %v781_v3, %v725_v58  ;;  %v730_v5 = vpop.f32.mrb[9].mxu0  ;;  %v467_v6 = vpop.f32.mrb[9].mxu1 }
 0x107   :  { %v731_v7 = vadd.f32 %v730_v5, %v729_v2  ;;  %v468_v8 = vadd.f32 %v719_v46, %v467_v6  ;;  %v732_v9 = vpop.f32.mrb[10].mxu0  ;;  %v782_v10 = vpop.f32.mrb[10].mxu1 }
 0x108   :  { %533 = vst.msk [vmem:[%s1138_s2 + $0x10] sm:$0xff] %vm530_vm1, %v476_v4  ;;  %v479_v11 = vadd.f32 %v782_v10, %v728_v0  ;;  %v733_v12 = vpop.f32.mrb[11].mxu0  ;;  %v470_v13 = vpop.f32.mrb[11].mxu1  ;;  %v586_v17 = vmul.f32 %v476_v4, %v476_v4  ;;  %v550_v23 = vsel %vm530_vm1, %v476_v4, 0.0 }
 0x109   :  { %531 = vst.msk [vmem:[%s1138_s2] sm:$0xff] %vm530_vm1, %v468_v8  ;;  %v584_v14 = vmul.f32 %v468_v8, %v468_v8  ;;  %v734_v15 = vadd.f32 %v733_v12, %v732_v9  ;;  %v471_v16 = vadd.f32 %v722_v52, %v470_v13  ;;  %v547_v18 = vsel %vm530_vm1, %v468_v8, 0.0 }
 0x10a   :  { %534 = vst.msk [vmem:[%s1138_s2 + $0x18] sm:$0xff] %vm530_vm1, %v479_v11  ;;  %v587_v21 = vmul.f32 %v479_v11, %v479_v11  ;;  %v603_v32 = vsel %vm530_vm1, %v586_v17, 0.0  ;;  %v552_v33 = vsel %vm530_vm1, %v479_v11, 0.0 }
 0x10b   :  { %532 = vst.msk [vmem:[%s1138_s2 + $0x8] sm:$0xff] %vm530_vm1, %v471_v16  ;;  %v548_v19 = vsel %vm530_vm1, %v471_v16, 0.0  ;;  %v585_v20 = vmul.f32 %v471_v16, %v471_v16  ;;  %v600_v24 = vsel %vm530_vm1, %v584_v14, 0.0 }
 0x10c   :  { %v549_v22 = vadd.f32 %v548_v19, %v547_v18  ;;  %v605_v38 = vsel %vm530_vm1, %v587_v21, 0.0 }
 0x10d   :  { %v601_v25 = vsel %vm530_vm1, %v585_v20, 0.0  ;;  %v735_v26 = vpop.f32.mrb[12].mxu0  ;;  %v785_v27 = vpop.f32.mrb[12].mxu1 }
 0x10e   :  { %v551_v28 = vadd.f32 %v550_v23, %v549_v22  ;;  %v602_v29 = vadd.f32 %v601_v25, %v600_v24  ;;  %v736_v30 = vpop.f32.mrb[13].mxu0  ;;  %v483_v31 = vpop.f32.mrb[13].mxu1 }
 0x10f   :  { %v737_v34 = vadd.f32 %v736_v30, %v735_v26  ;;  %v484_v35 = vadd.f32 %v731_v7, %v483_v31  ;;  %v738_v36 = vpop.f32.mrb[14].mxu0  ;;  %v786_v37 = vpop.f32.mrb[14].mxu1 }
 0x110   :  { %v604_v39 = vadd.f32 %v603_v32, %v602_v29  ;;  %v553_v40 = vadd.f32 %v552_v33, %v551_v28  ;;  %v739_v41 = vpop.f32.mrb[15].mxu0  ;;  %v486_v42 = vpop.f32.mrb[15].mxu1 }
 0x111   :  { %v492_v43 = vadd.f32 %v785_v27, %v737_v34  ;;  %535 = vst.msk [vmem:[%s1138_s2 + $0x20] sm:$0xff] %vm530_vm1, %v484_v35  ;;  %v554_v44 = vsel %vm530_vm1, %v484_v35, 0.0  ;;  %v588_v45 = vmul.f32 %v484_v35, %v484_v35  ;;  %v740_v46 = vadd.f32 %v739_v41, %v738_v36 }
 0x112   :  { %v555_v47 = vadd.f32 %v554_v44, %v553_v40  ;;  %v606_v49 = vadd.f32 %v605_v38, %v604_v39  ;;  %v487_v50 = vadd.f32 %v734_v15, %v486_v42 }
 0x113   :  { %537 = vst.msk [vmem:[%s1138_s2 + $0x30] sm:$0xff] %vm530_vm1, %v492_v43  ;;  %v607_v51 = vsel %vm530_vm1, %v588_v45, 0.0  ;;  %v495_v52 = vadd.f32 %v786_v37, %v740_v46  ;;  %v590_v54 = vmul.f32 %v492_v43, %v492_v43  ;;  %v558_v62 = vsel %vm530_vm1, %v492_v43, 0.0 }
 0x114   :  { %v608_v55 = vadd.f32 %v607_v51, %v606_v49  ;;  %536 = vst.msk [vmem:[%s1138_s2 + $0x28] sm:$0xff] %vm530_vm1, %v487_v50  ;;  %v556_v56 = vsel %vm530_vm1, %v487_v50, 0.0  ;;  %v589_v57 = vmul.f32 %v487_v50, %v487_v50 }
 0x115   :  { %538 = vst.msk [vmem:[%s1138_s2 + $0x38] sm:$0xff] %vm530_vm1, %v495_v52  ;;  %v557_v58 = vadd.f32 %v556_v56, %v555_v47  ;;  %v741_v59 = vpop.f32.mrb[16].mxu0  ;;  %v789_v61 = vpop.f32.mrb[16].mxu1  ;;  %v591_v63 = vmul.f32 %v495_v52, %v495_v52  ;;  %v611_v9 = vsel %vm530_vm1, %v590_v54, 0.0  ;;  %v560_v10 = vsel %vm530_vm1, %v495_v52, 0.0 }
 0x116   :  { %v609_v0 = vsel %vm530_vm1, %v589_v57, 0.0  ;;  %v742_v2 = vpop.f32.mrb[17].mxu0  ;;  %v499_v3 = vpop.f32.mrb[17].mxu1 }
 0x117   :  { %v559_v4 = vadd.f32 %v558_v62, %v557_v58  ;;  %v610_v5 = vadd.f32 %v609_v0, %v608_v55  ;;  %v743_v6 = vadd.f32 %v742_v2, %v741_v59  ;;  %v744_v7 = vpop.f32.mrb[18].mxu0  ;;  %v790_v8 = vpop.f32.mrb[18].mxu1  ;;  %v613_v17 = vsel %vm530_vm1, %v591_v63, 0.0 }
 0x118   :  { %v745_v11 = vpop.f32.mrb[19].mxu0  ;;  %v502_v12 = vpop.f32.mrb[19].mxu1 }
 0x119   :  { %v612_v13 = vadd.f32 %v611_v9, %v610_v5  ;;  %v746_v14 = vadd.f32 %v745_v11, %v744_v7  ;;  %v500_v15 = vadd.f32 %v743_v6, %v499_v3  ;;  %v561_v16 = vadd.f32 %v560_v10, %v559_v4 }
 0x11b   :  { %539 = vst.msk [vmem:[%s1138_s2 + $0x40] sm:$0xff] %vm530_vm1, %v500_v15  ;;  %v562_v18 = vsel %vm530_vm1, %v500_v15, 0.0  ;;  %v592_v19 = vmul.f32 %v500_v15, %v500_v15  ;;  %v614_v20 = vadd.f32 %v613_v17, %v612_v13  ;;  %v503_v21 = vadd.f32 %v746_v14, %v502_v12 }
 0x11c   :  { %v563_v22 = vadd.f32 %v562_v18, %v561_v16 }
 0x11d   :  { %v615_v23 = vsel %vm530_vm1, %v592_v19, 0.0  ;;  %540 = vst.msk [vmem:[%s1138_s2 + $0x48] sm:$0xff] %vm530_vm1, %v503_v21  ;;  %v564_v24 = vsel %vm530_vm1, %v503_v21, 0.0  ;;  %v593_v25 = vmul.f32 %v503_v21, %v503_v21  ;;  %v747_v26 = vpop.f32.mrb[20].mxu0  ;;  %v793_v27 = vpop.f32.mrb[20].mxu1 }
 0x11e   :  { %v616_v28 = vadd.f32 %v615_v23, %v614_v20  ;;  %v565_v29 = vadd.f32 %v564_v24, %v563_v22  ;;  %v524_v30 = vadd.f32 %v793_v27, %v1024_v60  ;;  %v748_v31 = vpop.f32.mrb[21].mxu0  ;;  %v515_v32 = vpop.f32.mrb[21].mxu1 }
 0x11f   :  { %v617_v33 = vsel %vm530_vm1, %v593_v25, 0.0  ;;  %v749_v34 = vadd.f32 %v748_v31, %v747_v26  ;;  %v516_v35 = vadd.f32 %v1020_v48, %v515_v32  ;;  %v750_v36 = vpop.f32.mrb[22].mxu0  ;;  %v794_v37 = vpop.f32.mrb[22].mxu1 }
 0x120   :  { %v618_v38 = vadd.f32 %v617_v33, %v616_v28  ;;  %545 = vst.msk [vmem:[%s1138_s2 + $0x70] sm:$0xff] %vm530_vm1, %v524_v30  ;;  %v527_v39 = vadd.f32 %v794_v37, %v1026_v1  ;;  %v751_v40 = vpop.f32.mrb[23].mxu0  ;;  %v518_v41 = vpop.f32.mrb[23].mxu1  ;;  %v598_v58 = vmul.f32 %v524_v30, %v524_v30  ;;  %v574_v0 = vsel %vm530_vm1, %v524_v30, 0.0 }
 0x121   :  { %v508_v60 = vadd.f32 %v789_v61, %v749_v34  ;;  %543 = vst.msk [vmem:[%s1138_s2 + $0x60] sm:$0xff] %vm530_vm1, %v516_v35  ;;  %v752_v42 = vadd.f32 %v751_v40, %v750_v36  ;;  %v519_v48 = vadd.f32 %v1022_v53, %v518_v41  ;;  %v596_v47 = vmul.f32 %v516_v35, %v516_v35 }
 0x122   :  { %546 = vst.msk [vmem:[%s1138_s2 + $0x78] sm:$0xff] %vm530_vm1, %v527_v39  ;;  %v570_v52 = vsel %vm530_vm1, %v516_v35, 0.0  ;;  %v599_v2 = vmul.f32 %v527_v39, %v527_v39  ;;  %v627_v6 = vsel %vm530_vm1, %v598_v58, 0.0  ;;  %v576_v7 = vsel %vm530_vm1, %v527_v39, 0.0 }
 0x123   :  { %541 = vst.msk [vmem:[%s1138_s2 + $0x50] sm:$0xff] %vm530_vm1, %v508_v60  ;;  %v566_v1 = vsel %vm530_vm1, %v508_v60, 0.0  ;;  %v594_v43 = vmul.f32 %v508_v60, %v508_v60  ;;  %v511_v44 = vadd.f32 %v790_v8, %v752_v42  ;;  %544 = vst.msk [vmem:[%s1138_s2 + $0x68] sm:$0xff] %vm530_vm1, %v519_v48  ;;  %v597_v55 = vmul.f32 %v519_v48, %v519_v48 }
 0x124   :  { %v567_v45 = vadd.f32 %v566_v1, %v565_v29  ;;  %v623_v59 = vsel %vm530_vm1, %v596_v47, 0.0  ;;  %v572_v61 = vsel %vm530_vm1, %v519_v48, 0.0  ;;  %v629_v10 = vsel %vm530_vm1, %v599_v2, 0.0 }
 0x125   :  { %v619_v46 = vsel %vm530_vm1, %v594_v43, 0.0  ;;  %542 = vst.msk [vmem:[%s1138_s2 + $0x58] sm:$0xff] %vm530_vm1, %v511_v44  ;;  %v568_v53 = vsel %vm530_vm1, %v511_v44, 0.0  ;;  %v595_v49 = vmul.f32 %v511_v44, %v511_v44  ;;  %v625_v3 = vsel %vm530_vm1, %v597_v55, 0.0 }
 0x126   :  { %v620_v50 = vadd.f32 %v619_v46, %v618_v38  ;;  %v569_v51 = vadd.f32 %v568_v53, %v567_v45 }
 0x127   :  { %v621_v54 = vsel %vm530_vm1, %v595_v49, 0.0 }
 0x128   :  { %v622_v56 = vadd.f32 %v621_v54, %v620_v50  ;;  %v571_v57 = vadd.f32 %v570_v52, %v569_v51 }
 0x12a   :  { %v573_v62 = vadd.f32 %v572_v61, %v571_v57  ;;  %v624_v63 = vadd.f32 %v623_v59, %v622_v56 }
 0x12c   :  { %v575_v4 = vadd.f32 %v574_v0, %v573_v62  ;;  %v626_v5 = vadd.f32 %v625_v3, %v624_v63 }
 0x12e   :  { %v577_v8 = vadd.f32 %v576_v7, %v575_v4  ;;  %v628_v9 = vadd.f32 %v627_v6, %v626_v5 }
 0x130   :  { %v578_v11 = vrot.slane %v577_v8, 4  ;;  %v630_v12 = vadd.f32 %v629_v10, %v628_v9 }
 0x132   :  { %v579_v13 = vadd.f32 %v578_v11, %v577_v8  ;;  %v631_v14 = vrot.slane %v630_v12, 4 }
 0x134   :  { %v580_v15 = vrot.slane %v579_v13, 2  ;;  %v632_v16 = vadd.f32 %v631_v14, %v630_v12 }
 0x136   :  { %v581_v17 = vadd.f32 %v580_v15, %v579_v13  ;;  %v633_v18 = vrot.slane %v632_v16, 2 }
 0x138   :  { %v582_v19 = vrot.slane %v581_v17, 1  ;;  %v634_v20 = vadd.f32 %v633_v18, %v632_v16 }
 0x13a   :  { %v583_v21 = vadd.f32 %v582_v19, %v581_v17  ;;  %v635_v22 = vrot.slane %v634_v20, 1 }
 0x13c   :  { %v636_v23 = vadd.f32 %v635_v22, %v634_v20  ;;  %637 = vst.msk [vmem:[%s1139_s3] sm:$0xff] %vm530_vm1, %v583_v21 }
 0x13e   :  { %638 = vst.msk [vmem:[%s1140_s4] sm:$0xff] %vm530_vm1, %v636_v23 }

// kernel: generator_forward.14
= control target key start
LH: loop header
LB: loop body
LE: loop exit
PB: predicated region body
PF: predicated region fallthrough
CT: control target
= control target key end

     0   :  { %s223_s0 = inlined_call_operand.vmem [shape: f32[64,128], index: 0, kind: input, shape index: {}]   ;;  %s224_s1 = inlined_call_operand.vmem [shape: f32[1,128], index: 1, kind: input, shape index: {}]   ;;  %s225_s2 = inlined_call_operand.vmem [shape: f32[1,128], index: 2, kind: input, shape index: {}]   ;;  %s226_s3 = inlined_call_operand.vmem [shape: bf16[64,128], index: 3, kind: output, shape index: {}]  }
   0x1   :  { %v14_v0 = vld [vmem:[%s223_s0] sm:$0xff]  ;;  %v15_v1 = vld [vmem:[%s223_s0 + $0x8] sm:$0xff]  ;;  %v16_v6 = vld [vmem:[%s223_s0 + $0x10] sm:$0xff] }
   0x2   :  { %v120_v2 = vld [vmem:[%s224_s1] ss:$0 sm:$0xff]  ;;  %v17_v7 = vld [vmem:[%s223_s0 + $0x18] sm:$0xff]  ;;  %v19_v11 = vld [vmem:[%s223_s0 + $0x28] sm:$0xff] }
   0x3   :  { %v29_v3 = vmul.f32 %v120_v2, %v14_v0  ;;  %v30_v4 = vmul.f32 %v120_v2, %v15_v1  ;;  %v121_v5 = vld [vmem:[%s225_s2] ss:$0 sm:$0xff]  ;;  %v31_v8 = vmul.f32 %v120_v2, %v16_v6  ;;  %v32_v9 = vmul.f32 %v120_v2, %v17_v7  ;;  %v20_v12 = vld [vmem:[%s223_s0 + $0x30] sm:$0xff]  ;;  %v21_v17 = vld [vmem:[%s223_s0 + $0x38] sm:$0xff] }
   0x4   :  { %v18_v10 = vld [vmem:[%s223_s0 + $0x20] sm:$0xff]  ;;  %v34_v16 = vmul.f32 %v120_v2, %v19_v11  ;;  %v35_v20 = vmul.f32 %v120_v2, %v20_v12  ;;  %v36_v21 = vmul.f32 %v120_v2, %v21_v17 }
   0x5   :  { %v44_v13 = vadd.f32 %v121_v5, %v29_v3  ;;  %v45_v14 = vadd.f32 %v121_v5, %v30_v4  ;;  %v33_v15 = vmul.f32 %v120_v2, %v18_v10  ;;  %v46_v18 = vadd.f32 %v121_v5, %v31_v8 }
   0x6   :  { %v47_v19 = vadd.f32 %v121_v5, %v32_v9  ;;  %v49_v29 = vadd.f32 %v121_v5, %v34_v16  ;;  %v50_v33 = vadd.f32 %v121_v5, %v35_v20  ;;  %v51_v37 = vadd.f32 %v121_v5, %v36_v21 }
   0x7   :  { %vm52_vm0 = vcmp.ge.f32.partialorder %v44_v13, 0.0  ;;  %vm53_vm1 = vcmp.ge.f32.partialorder %v45_v14, 0.0  ;;  %v60_v22 = vmul.f32 0.2, %v44_v13  ;;  %v61_v23 = vmul.f32 0.2, %v45_v14 }
   0x8   :  { %vm54_vm2 = vcmp.ge.f32.partialorder %v46_v18, 0.0  ;;  %vm55_vm3 = vcmp.ge.f32.partialorder %v47_v19, 0.0  ;;  %v62_v24 = vmul.f32 0.2, %v46_v18  ;;  %v63_v25 = vmul.f32 0.2, %v47_v19 }
   0x9   :  { %v68_v26 = vsel %vm52_vm0, %v44_v13, %v60_v22  ;;  %v69_v27 = vsel %vm53_vm1, %v45_v14, %v61_v23  ;;  %v48_v28 = vadd.f32 %v121_v5, %v33_v15  ;;  %vm57_vm5 = vcmp.ge.f32.partialorder %v49_v29, 0.0 }
   0xa   :  { %v141_v30 = vpack.c.bf16 %v69_v27, %v68_v26  ;;  %v70_v31 = vsel %vm54_vm2, %v46_v18, %v62_v24  ;;  %v71_v32 = vsel %vm55_vm3, %v47_v19, %v63_v25  ;;  %v65_v36 = vmul.f32 0.2, %v49_v29 }
   0xb   :  { %v146_v34 = vpack.c.bf16 %v71_v32, %v70_v31  ;;  %vm56_vm4 = vcmp.ge.f32.partialorder %v48_v28, 0.0  ;;  %v64_v35 = vmul.f32 0.2, %v48_v28  ;;  %vm58_vm6 = vcmp.ge.f32.partialorder %v50_v33, 0.0 }
   0xc   :  { %142 = vst [vmem:[%s226_s3] sm:$0xff] %v141_v30   ;;  %v66_v38 = vmul.f32 0.2, %v50_v33  ;;  %v73_v40 = vsel %vm57_vm5, %v49_v29, %v65_v36  ;;  %vm59_vm7 = vcmp.ge.f32.partialorder %v51_v37, 0.0  ;;  %v67_v41 = vmul.f32 0.2, %v51_v37 }
   0xd   :  { %158 = vst [vmem:[%s226_s3 + $0x8] sm:$0xff] %v146_v34   ;;  %v72_v39 = vsel %vm56_vm4, %v48_v28, %v64_v35 }
   0xe   :  { %v74_v42 = vsel %vm58_vm6, %v50_v33, %v66_v38  ;;  %v151_v43 = vpack.c.bf16 %v73_v40, %v72_v39  ;;  %v75_v44 = vsel %vm59_vm7, %v51_v37, %v67_v41 }
   0xf   :  { %v156_v45 = vpack.c.bf16 %v75_v44, %v74_v42 }
  0x10   :  { %159 = vst [vmem:[%s226_s3 + $0x10] sm:$0xff] %v151_v43  }
  0x11   :  { %160 = vst [vmem:[%s226_s3 + $0x18] sm:$0xff] %v156_v45  }

// kernel: tile.101
= control target key start
LH: loop header
LB: loop body
LE: loop exit
PB: predicated region body
PF: predicated region fallthrough
CT: control target
= control target key end

     0   :  { %s22_s0 = inlined_call_operand.vmem [shape: f32[8], index: 0, kind: input, shape index: {}]   ;;  %s23_s1 = inlined_call_operand.vmem [shape: f32[4,8], index: 1, kind: output, shape index: {}]  }
   0x1   :  { %v4_v0 = vld [vmem:[%s22_s0] ss:$0 sm:$0xff] }
   0x2   :  { %5 = vst [vmem:[%s23_s1] sm:$0xf] %v4_v0 }

// kernel: tile.109
= control target key start
LH: loop header
LB: loop body
LE: loop exit
PB: predicated region body
PF: predicated region fallthrough
CT: control target
= control target key end

     0   :  { %vm7_vm0 = vcmask 64512   ;;  %s37_s8 = smov 8   ;;  %s38_s9 = smov 16   ;;  %vm13_vm1 = vcmask 261312   ;;  %vm19_vm2 = vcmask 195712   ;;  %vm25_vm3 = vcmask 130112   ;;  %s55_s0 = inlined_call_operand.vmem [shape: f32[4,8], index: 0, kind: input, shape index: {}]   ;;  %s56_s1 = inlined_call_operand.vmem [shape: f32[32], index: 1, kind: output, shape index: {}]  }
   0x1   :  { %v4_v0 = vld [vmem:[%s55_s0] sm:$0xf]  ;;  %s36_s0 = smov 24  }
   0x2   :  { %5 = vst [vmem:[#allocation1] sm:$0xf] %v4_v0 }
   0x9   :  { %v10_v1 = vld [vmem:[#allocation1 + $0x3] sm:$0x1]   ;;  %v22_v2 = vld [vmem:[#allocation1 + $0x1] sm:$0x1]   ;;  %v6_v3 = vld [vmem:[#allocation1] sm:$0x1]  }
   0xa   :  { %11 = vrot.lane.b32.xlu0 %v10_v1, %s36_s0  ;;  %23 = vrot.lane.b32.xlu1 %v22_v2, %s37_s8  ;;  %v16_v4 = vld [vmem:[#allocation1 + $0x2] sm:$0x1]   ;;  %8 = vst.msk [vmem:[#allocation0] sm:$0x1] %vm7_vm0, %v6_v3  }
   0xe   :  { %17 = vrot.lane.b32.xlu0 %v16_v4, %s38_s9 }
  0x7c   :  { %v12_v5 = vpop.permute.xlu0 %11   ;;  %v24_v6 = vpop.permute.xlu1 %23  }
  0x7d   :  { %14 = vst.msk [vmem:[#allocation0] sm:$0x1] %vm13_vm1, %v12_v5  }
  0x80   :  { %v18_v7 = vpop.permute.xlu0 %17  }
  0x81   :  { %20 = vst.msk [vmem:[#allocation0] sm:$0x1] %vm19_vm2, %v18_v7  }
  0x82   :  { %26 = vst.msk [vmem:[#allocation0] sm:$0x1] %vm25_vm3, %v24_v6  }
  0x89   :  { %v30_v8 = vld [vmem:[#allocation0] sm:$0x1] }
  0x8a   :  { %32 = vst [vmem:[%s56_s1] sm:$0x1] %v30_v8 }

// kernel: generator_forward.15
= control target key start
LH: loop header
LB: loop body
LE: loop exit
PB: predicated region body
PF: predicated region fallthrough
CT: control target
= control target key end

     0   :  { %v1463_v0 = vmov 0   ;;  %vm439_vm0 = vcmask 130048   ;;  %vm825_vm1 = vcmask 261120   ;;  %s2324_s1 = inlined_call_operand.vmem [shape: bf16[144,32], index: 1, kind: input, shape index: {}]   ;;  %s2325_s0 = inlined_call_operand.vmem [shape: bf16[512,144], index: 0, kind: input, shape index: {}]   ;;  %s2326_s2 = inlined_call_operand.vmem [shape: f32[512,32], index: 2, kind: output, shape index: {0}]   ;;  %s2327_s3 = inlined_call_operand.vmem [shape: f32[8,32], index: 3, kind: output, shape index: {1}]   ;;  %s2328_s4 = inlined_call_operand.vmem [shape: f32[8,32], index: 4, kind: output, shape index: {2}]  }
   0x1   :  { %536 = vmatprep.subr.bf16.mxu0 %v1463_v0  ;;  %v1358_v1 = vld [vmem:[%s2324_s1] sm:$0xff]   ;;  %1339 = vmatprep.subr.bf16.mxu1 %v1463_v0  ;;  %v1359_v2 = vld [vmem:[%s2324_s1 + $0x8] sm:$0xff]   ;;  %v1360_v3 = vld [vmem:[%s2324_s1 + $0x10] sm:$0xff]  }
   0x2   :  { %537 = vmatpush1.bf16.msra.mxu0 %v1358_v1  ;;  %1348 = vmatpush1.bf16.msra.mxu1 %v1358_v1  ;;  %v1361_v4 = vld [vmem:[%s2324_s1 + $0x18] sm:$0xff]   ;;  %v1369_v5 = vld [vmem:[%s2325_s0 + $0x4] ss:$8 sps:$4 sm:$0xff]   ;;  %v1364_v9 = vld [vmem:[%s2324_s1 + $0x30] sm:$0xff]  }
   0x3   :  { %538 = vmatprep.subr.bf16.mxu0 %v1463_v0  ;;  %1340 = vmatprep.subr.bf16.mxu1 %v1463_v0  ;;  %v1362_v6 = vld [vmem:[%s2324_s1 + $0x20] sm:$0xff]   ;;  %v1363_v7 = vld [vmem:[%s2324_s1 + $0x28] sm:$0xff]   ;;  %v1365_v10 = vld [vmem:[%s2324_s1 + $0x38] sm:$0xff]  }
   0x4   :  { %1307 = vmatprep.mubr.msk.bf16.mxu0 %vm439_vm0, %v1369_v5  ;;  %v1393_v8 = vld [vmem:[%s2325_s0 + $0x104] ss:$8 sps:$4 sm:$0xff]   ;;  %v1367_v12 = vld [vmem:[%s2325_s0] ss:$8 sps:$4 sm:$0xff]   ;;  %v1370_v13 = vld [vmem:[%s2325_s0 + $0x14] ss:$8 sps:$4 sm:$0xff]  }
   0x5   :  { %1323 = vmatprep.mubr.msk.bf16.mxu1 %vm439_vm0, %v1393_v8  ;;  %v1366_v11 = vld [vmem:[%s2324_s1 + $0x40] sm:$0xff]   ;;  %v1397_v15 = vld [vmem:[%s2325_s0 + $0x114] ss:$8 sps:$4 sm:$0xff]   ;;  %v1372_v16 = vld [vmem:[%s2325_s0 + $0x10] ss:$8 sps:$4 sm:$0xff]  }
   0x6   :  { %539 = vmatpush1.bf16.msra.mxu0 %v1359_v2  ;;  %1349 = vmatpush1.bf16.msra.mxu1 %v1359_v2  ;;  %v1391_v14 = vld [vmem:[%s2325_s0 + $0x100] ss:$8 sps:$4 sm:$0xff]   ;;  %v1373_v17 = vld [vmem:[%s2325_s0 + $0x24] ss:$8 sps:$4 sm:$0xff]   ;;  %v1399_v18 = vld [vmem:[%s2325_s0 + $0x110] ss:$8 sps:$4 sm:$0xff]  }
   0x7   :  { %540 = vmatprep.subr.bf16.mxu0 %v1463_v0  ;;  %1341 = vmatprep.subr.bf16.mxu1 %v1463_v0  ;;  %v1403_v19 = vld [vmem:[%s2325_s0 + $0x124] ss:$8 sps:$4 sm:$0xff]   ;;  %v1375_v20 = vld [vmem:[%s2325_s0 + $0x20] ss:$8 sps:$4 sm:$0xff]   ;;  %v1376_v21 = vld [vmem:[%s2325_s0 + $0x34] ss:$8 sps:$4 sm:$0xff]  }
   0x8   :  { %v1405_v22 = vld [vmem:[%s2325_s0 + $0x120] ss:$8 sps:$4 sm:$0xff]   ;;  %v1409_v23 = vld [vmem:[%s2325_s0 + $0x134] ss:$8 sps:$4 sm:$0xff]   ;;  %v1378_v24 = vld [vmem:[%s2325_s0 + $0x30] ss:$8 sps:$4 sm:$0xff]  }
   0x9   :  { %v1411_v25 = vld [vmem:[%s2325_s0 + $0x130] ss:$8 sps:$4 sm:$0xff]   ;;  %v1379_v26 = vld [vmem:[%s2325_s0 + $0x44] ss:$8 sps:$4 sm:$0xff]   ;;  %v1381_v28 = vld [vmem:[%s2325_s0 + $0x40] ss:$8 sps:$4 sm:$0xff]  }
   0xa   :  { %541 = vmatpush1.bf16.msra.mxu0 %v1360_v3  ;;  %1350 = vmatpush1.bf16.msra.mxu1 %v1360_v3  ;;  %v1415_v27 = vld [vmem:[%s2325_s0 + $0x144] ss:$8 sps:$4 sm:$0xff]   ;;  %v1417_v29 = vld [vmem:[%s2325_s0 + $0x140] ss:$8 sps:$4 sm:$0xff]   ;;  %v1382_v30 = vld [vmem:[%s2325_s0 + $0x54] ss:$8 sps:$4 sm:$0xff]  }
   0xb   :  { %542 = vmatprep.subr.bf16.mxu0 %v1463_v0  ;;  %1342 = vmatprep.subr.bf16.mxu1 %v1463_v0  ;;  %v1421_v31 = vld [vmem:[%s2325_s0 + $0x154] ss:$8 sps:$4 sm:$0xff]   ;;  %v1384_v32 = vld [vmem:[%s2325_s0 + $0x50] ss:$8 sps:$4 sm:$0xff]   ;;  %v1385_v34 = vld [vmem:[%s2325_s0 + $0x64] ss:$8 sps:$4 sm:$0xff]  }
   0xc   :  { %v1423_v33 = vld [vmem:[%s2325_s0 + $0x150] ss:$8 sps:$4 sm:$0xff]   ;;  %v1427_v35 = vld [vmem:[%s2325_s0 + $0x164] ss:$8 sps:$4 sm:$0xff]   ;;  %v1387_v36 = vld [vmem:[%s2325_s0 + $0x60] ss:$8 sps:$4 sm:$0xff]  }
   0xd   :  { %v1429_v37 = vld [vmem:[%s2325_s0 + $0x160] ss:$8 sps:$4 sm:$0xff]   ;;  %v1388_v38 = vld [vmem:[%s2325_s0 + $0x74] ss:$8 sps:$4 sm:$0xff]   ;;  %v1390_v40 = vld [vmem:[%s2325_s0 + $0x70] ss:$8 sps:$4 sm:$0xff]  }
   0xe   :  { %543 = vmatpush1.bf16.msra.mxu0 %v1361_v4  ;;  %1351 = vmatpush1.bf16.msra.mxu1 %v1361_v4  ;;  %v1433_v39 = vld [vmem:[%s2325_s0 + $0x174] ss:$8 sps:$4 sm:$0xff]   ;;  %v1435_v41 = vld [vmem:[%s2325_s0 + $0x170] ss:$8 sps:$4 sm:$0xff]   ;;  %v1394_v42 = vld [vmem:[%s2325_s0 + $0x84] ss:$8 sps:$4 sm:$0xff]  }
   0xf   :  { %544 = vmatprep.subr.bf16.mxu0 %v1463_v0  ;;  %1343 = vmatprep.subr.bf16.mxu1 %v1463_v0  ;;  %v1439_v43 = vld [vmem:[%s2325_s0 + $0x184] ss:$8 sps:$4 sm:$0xff]   ;;  %v1396_v44 = vld [vmem:[%s2325_s0 + $0x80] ss:$8 sps:$4 sm:$0xff]   ;;  %v1400_v46 = vld [vmem:[%s2325_s0 + $0x94] ss:$8 sps:$4 sm:$0xff]  }
  0x10   :  { %v1441_v45 = vld [vmem:[%s2325_s0 + $0x180] ss:$8 sps:$4 sm:$0xff]   ;;  %v1442_v47 = vld [vmem:[%s2325_s0 + $0x194] ss:$8 sps:$4 sm:$0xff]   ;;  %v1402_v48 = vld [vmem:[%s2325_s0 + $0x90] ss:$8 sps:$4 sm:$0xff]  }
  0x11   :  { %v1444_v49 = vld [vmem:[%s2325_s0 + $0x190] ss:$8 sps:$4 sm:$0xff]   ;;  %v1406_v50 = vld [vmem:[%s2325_s0 + $0xa4] ss:$8 sps:$4 sm:$0xff]   ;;  %v1408_v52 = vld [vmem:[%s2325_s0 + $0xa0] ss:$8 sps:$4 sm:$0xff]  }
  0x12   :  { %545 = vmatpush1.bf16.msra.mxu0 %v1362_v6  ;;  %1352 = vmatpush1.bf16.msra.mxu1 %v1362_v6  ;;  %v1445_v51 = vld [vmem:[%s2325_s0 + $0x1a4] ss:$8 sps:$4 sm:$0xff]   ;;  %v1447_v53 = vld [vmem:[%s2325_s0 + $0x1a0] ss:$8 sps:$4 sm:$0xff]   ;;  %v1412_v54 = vld [vmem:[%s2325_s0 + $0xb4] ss:$8 sps:$4 sm:$0xff]  }
  0x13   :  { %546 = vmatprep.subr.bf16.mxu0 %v1463_v0  ;;  %1344 = vmatprep.subr.bf16.mxu1 %v1463_v0  ;;  %v1448_v55 = vld [vmem:[%s2325_s0 + $0x1b4] ss:$8 sps:$4 sm:$0xff]   ;;  %v1414_v56 = vld [vmem:[%s2325_s0 + $0xb0] ss:$8 sps:$4 sm:$0xff]   ;;  %v1418_v58 = vld [vmem:[%s2325_s0 + $0xc4] ss:$8 sps:$4 sm:$0xff]  }
  0x14   :  { %v1450_v57 = vld [vmem:[%s2325_s0 + $0x1b0] ss:$8 sps:$4 sm:$0xff]   ;;  %v1451_v59 = vld [vmem:[%s2325_s0 + $0x1c4] ss:$8 sps:$4 sm:$0xff]   ;;  %v1420_v60 = vld [vmem:[%s2325_s0 + $0xc0] ss:$8 sps:$4 sm:$0xff]  }
  0x15   :  { %v1453_v61 = vld [vmem:[%s2325_s0 + $0x1c0] ss:$8 sps:$4 sm:$0xff]   ;;  %v1424_v62 = vld [vmem:[%s2325_s0 + $0xd4] ss:$8 sps:$4 sm:$0xff]   ;;  %v1456_v1 = vld [vmem:[%s2325_s0 + $0x1d0] ss:$8 sps:$4 sm:$0xff]  }
  0x16   :  { %547 = vmatpush1.bf16.msra.mxu0 %v1363_v7  ;;  %1353 = vmatpush1.bf16.msra.mxu1 %v1363_v7  ;;  %v1454_v63 = vld [vmem:[%s2325_s0 + $0x1d4] ss:$8 sps:$4 sm:$0xff]   ;;  %v1430_v2 = vld [vmem:[%s2325_s0 + $0xe4] ss:$8 sps:$4 sm:$0xff]   ;;  %v1432_v4 = vld [vmem:[%s2325_s0 + $0xe0] ss:$8 sps:$4 sm:$0xff]  }
  0x17   :  { %548 = vmatprep.subr.bf16.mxu0 %v1463_v0  ;;  %1345 = vmatprep.subr.bf16.mxu1 %v1463_v0  ;;  %v1457_v3 = vld [vmem:[%s2325_s0 + $0x1e4] ss:$8 sps:$4 sm:$0xff]   ;;  %v1459_v5 = vld [vmem:[%s2325_s0 + $0x1e0] ss:$8 sps:$4 sm:$0xff]   ;;  %v1436_v6 = vld [vmem:[%s2325_s0 + $0xf4] ss:$8 sps:$4 sm:$0xff]  }
  0x18   :  { %v1460_v7 = vld [vmem:[%s2325_s0 + $0x1f4] ss:$8 sps:$4 sm:$0xff]   ;;  %v1438_v8 = vld [vmem:[%s2325_s0 + $0xf0] ss:$8 sps:$4 sm:$0xff]  }
  0x1a   :  { %549 = vmatpush1.bf16.msra.mxu0 %v1364_v9  ;;  %1354 = vmatpush1.bf16.msra.mxu1 %v1364_v9  ;;  %v1462_v9 = vld [vmem:[%s2325_s0 + $0x1f0] ss:$8 sps:$4 sm:$0xff]  }
  0x1b   :  { %550 = vmatprep.subr.bf16.mxu0 %v1463_v0  ;;  %1346 = vmatprep.subr.bf16.mxu1 %v1463_v0 }
  0x1e   :  { %551 = vmatpush1.bf16.msra.mxu0 %v1365_v10  ;;  %1355 = vmatpush1.bf16.msra.mxu1 %v1365_v10 }
  0x1f   :  { %552 = vmatprep.subr.bf16.mxu0 %v1463_v0  ;;  %1347 = vmatprep.subr.bf16.mxu1 %v1463_v0  ;;  %v1426_v0 = vld [vmem:[%s2325_s0 + $0xd0] ss:$8 sps:$4 sm:$0xff]  }
  0x22   :  { %553 = vmatpush1.bf16.msra.mxu0 %v1366_v11  ;;  %1356 = vmatpush1.bf16.msra.mxu1 %v1366_v11 }
  0x25   :  { %569 = vmatmul.mubr.bf16.vlgmr.msra.gmra.mrb[0].mxu0 %v1367_v12  ;;  %697 = vmatmul.mubr.bf16.vlgmr.msra.gmra.mrb[0].mxu1 %v1391_v14 }
  0x26   :  { %1308 = vmatprep.mubr.msk.bf16.mxu0 %vm439_vm0, %v1370_v13  ;;  %1324 = vmatprep.mubr.msk.bf16.mxu1 %vm439_vm0, %v1397_v15 }
  0x2d   :  { %577 = vmatmul.mubr.bf16.gmra.mrb[4].mxu0 %v1372_v16  ;;  %705 = vmatmul.mubr.bf16.gmra.mrb[4].mxu1 %v1399_v18 }
  0x2e   :  { %1309 = vmatprep.mubr.msk.bf16.mxu0 %vm439_vm0, %v1373_v17  ;;  %1325 = vmatprep.mubr.msk.bf16.mxu1 %vm439_vm0, %v1403_v19 }
  0x35   :  { %585 = vmatmul.mubr.bf16.gmra.mrb[8].mxu0 %v1375_v20  ;;  %713 = vmatmul.mubr.bf16.gmra.mrb[8].mxu1 %v1405_v22 }
  0x36   :  { %1310 = vmatprep.mubr.msk.bf16.mxu0 %vm439_vm0, %v1376_v21  ;;  %1326 = vmatprep.mubr.msk.bf16.mxu1 %vm439_vm0, %v1409_v23 }
  0x3d   :  { %593 = vmatmul.mubr.bf16.gmra.mrb[12].mxu0 %v1378_v24  ;;  %721 = vmatmul.mubr.bf16.gmra.mrb[12].mxu1 %v1411_v25 }
  0x3e   :  { %1311 = vmatprep.mubr.msk.bf16.mxu0 %vm439_vm0, %v1379_v26  ;;  %1327 = vmatprep.mubr.msk.bf16.mxu1 %vm439_vm0, %v1415_v27 }
  0x45   :  { %601 = vmatmul.mubr.bf16.gmra.mrb[16].mxu0 %v1381_v28  ;;  %729 = vmatmul.mubr.bf16.gmra.mrb[16].mxu1 %v1417_v29 }
  0x46   :  { %1312 = vmatprep.mubr.msk.bf16.mxu0 %vm439_vm0, %v1382_v30  ;;  %1328 = vmatprep.mubr.msk.bf16.mxu1 %vm439_vm0, %v1421_v31 }
  0x4d   :  { %609 = vmatmul.mubr.bf16.gmra.mrb[20].mxu0 %v1384_v32  ;;  %737 = vmatmul.mubr.bf16.gmra.mrb[20].mxu1 %v1423_v33 }
  0x4e   :  { %1313 = vmatprep.mubr.msk.bf16.mxu0 %vm439_vm0, %v1385_v34  ;;  %1329 = vmatprep.mubr.msk.bf16.mxu1 %vm439_vm0, %v1427_v35 }
  0x55   :  { %617 = vmatmul.mubr.bf16.gmra.mrb[24].mxu0 %v1387_v36  ;;  %745 = vmatmul.mubr.bf16.gmra.mrb[24].mxu1 %v1429_v37 }
  0x56   :  { %1314 = vmatprep.mubr.msk.bf16.mxu0 %vm439_vm0, %v1388_v38  ;;  %1330 = vmatprep.mubr.msk.bf16.mxu1 %vm439_vm0, %v1433_v39 }
  0x5d   :  { %625 = vmatmul.mubr.bf16.gmra.mrb[28].mxu0 %v1390_v40  ;;  %753 = vmatmul.mubr.bf16.gmra.mrb[28].mxu1 %v1435_v41 }
  0x5e   :  { %1315 = vmatprep.mubr.msk.bf16.mxu0 %vm439_vm0, %v1394_v42  ;;  %1331 = vmatprep.mubr.msk.bf16.mxu1 %vm439_vm0, %v1439_v43 }
  0x65   :  { %633 = vmatmul.mubr.bf16.gmra.mrb[32].mxu0 %v1396_v44  ;;  %761 = vmatmul.mubr.bf16.gmra.mrb[32].mxu1 %v1441_v45 }
  0x66   :  { %1316 = vmatprep.mubr.msk.bf16.mxu0 %vm439_vm0, %v1400_v46  ;;  %1332 = vmatprep.mubr.msk.bf16.mxu1 %vm439_vm0, %v1442_v47 }
  0x6d   :  { %641 = vmatmul.mubr.bf16.gmra.mrb[36].mxu0 %v1402_v48  ;;  %769 = vmatmul.mubr.bf16.gmra.mrb[36].mxu1 %v1444_v49 }
  0x6e   :  { %1317 = vmatprep.mubr.msk.bf16.mxu0 %vm439_vm0, %v1406_v50  ;;  %1333 = vmatprep.mubr.msk.bf16.mxu1 %vm439_vm0, %v1445_v51 }
  0x75   :  { %649 = vmatmul.mubr.bf16.gmra.mrb[40].mxu0 %v1408_v52  ;;  %777 = vmatmul.mubr.bf16.gmra.mrb[40].mxu1 %v1447_v53 }
  0x76   :  { %1318 = vmatprep.mubr.msk.bf16.mxu0 %vm439_vm0, %v1412_v54  ;;  %1334 = vmatprep.mubr.msk.bf16.mxu1 %vm439_vm0, %v1448_v55 }
  0x7d   :  { %657 = vmatmul.mubr.bf16.gmra.mrb[44].mxu0 %v1414_v56  ;;  %785 = vmatmul.mubr.bf16.gmra.mrb[44].mxu1 %v1450_v57 }
  0x7e   :  { %1319 = vmatprep.mubr.msk.bf16.mxu0 %vm439_vm0, %v1418_v58  ;;  %1335 = vmatprep.mubr.msk.bf16.mxu1 %vm439_vm0, %v1451_v59 }
  0x85   :  { %665 = vmatmul.mubr.bf16.gmra.mrb[48].mxu0 %v1420_v60  ;;  %793 = vmatmul.mubr.bf16.gmra.mrb[48].mxu1 %v1453_v61 }
  0x86   :  { %1320 = vmatprep.mubr.msk.bf16.mxu0 %vm439_vm0, %v1424_v62  ;;  %1336 = vmatprep.mubr.msk.bf16.mxu1 %vm439_vm0, %v1454_v63 }
  0x8d   :  { %673 = vmatmul.mubr.bf16.gmra.mrb[52].mxu0 %v1426_v0  ;;  %801 = vmatmul.mubr.bf16.gmra.mrb[52].mxu1 %v1456_v1 }
  0x8e   :  { %1321 = vmatprep.mubr.msk.bf16.mxu0 %vm439_vm0, %v1430_v2  ;;  %1337 = vmatprep.mubr.msk.bf16.mxu1 %vm439_vm0, %v1457_v3 }
  0x95   :  { %681 = vmatmul.mubr.bf16.gmra.mrb[56].mxu0 %v1432_v4  ;;  %809 = vmatmul.mubr.bf16.gmra.mrb[56].mxu1 %v1459_v5 }
  0x96   :  { %1322 = vmatprep.mubr.msk.bf16.mxu0 %vm439_vm0, %v1436_v6  ;;  %1338 = vmatprep.mubr.msk.bf16.mxu1 %vm439_vm0, %v1460_v7 }
  0x9d   :  { %689 = vmatmul.mubr.bf16.gmra.mrb[60].mxu0 %v1438_v8  ;;  %817 = vmatmul.mubr.bf16.gmra.mrb[60].mxu1 %v1462_v9 }
  0xf8   :  { %v570_v10 = vpop.f32.mrb[0].mxu0  ;;  %v1740_v11 = vpop.f32.mrb[0].mxu1 }
  0xf9   :  { %826 = vst.msk [vmem:[%s2326_s2] sm:$0xff] %vm825_vm1, %v570_v10  ;;  %v1023_v12 = vmul.f32 %v570_v10, %v570_v10  ;;  %v572_v13 = vpop.f32.mrb[1].mxu0  ;;  %858 = vst.msk [vmem:[%s2326_s2 + $0x100] sm:$0xff] %vm825_vm1, %v1740_v11  ;;  %v700_v14 = vpop.f32.mrb[1].mxu1  ;;  %v890_v17 = vsel %vm825_vm1, %v570_v10, 0.0 }
  0xfa   :  { %v573_v15 = vpop.f32.mrb[2].mxu0  ;;  %v1751_v16 = vpop.f32.mrb[2].mxu1 }
  0xfb   :  { %827 = vst.msk [vmem:[%s2326_s2 + $0x8] sm:$0xff] %vm825_vm1, %v573_v15  ;;  %v891_v18 = vsel %vm825_vm1, %v573_v15, 0.0  ;;  %v1024_v19 = vmul.f32 %v573_v15, %v573_v15  ;;  %v575_v20 = vpop.f32.mrb[3].mxu0  ;;  %859 = vst.msk [vmem:[%s2326_s2 + $0x108] sm:$0xff] %vm825_vm1, %v1751_v16  ;;  %v703_v21 = vpop.f32.mrb[3].mxu1  ;;  %v1087_v23 = vsel %vm825_vm1, %v1023_v12, 0.0 }
  0xfc   :  { %v892_v22 = vadd.f32 %v891_v18, %v890_v17 }
  0xfd   :  { %v1088_v24 = vsel %vm825_vm1, %v1024_v19, 0.0 }
  0xfe   :  { %v1089_v25 = vadd.f32 %v1088_v24, %v1087_v23 }
 0x100   :  { %v578_v26 = vpop.f32.mrb[4].mxu0  ;;  %v1766_v27 = vpop.f32.mrb[4].mxu1 }
 0x101   :  { %828 = vst.msk [vmem:[%s2326_s2 + $0x10] sm:$0xff] %vm825_vm1, %v578_v26  ;;  %v893_v28 = vsel %vm825_vm1, %v578_v26, 0.0  ;;  %v1025_v29 = vmul.f32 %v578_v26, %v578_v26  ;;  %v580_v30 = vpop.f32.mrb[5].mxu0  ;;  %860 = vst.msk [vmem:[%s2326_s2 + $0x110] sm:$0xff] %vm825_vm1, %v1766_v27  ;;  %v708_v31 = vpop.f32.mrb[5].mxu1 }
 0x102   :  { %v894_v32 = vadd.f32 %v893_v28, %v892_v22  ;;  %v581_v33 = vpop.f32.mrb[6].mxu0  ;;  %v1778_v34 = vpop.f32.mrb[6].mxu1 }
 0x103   :  { %v1090_v35 = vsel %vm825_vm1, %v1025_v29, 0.0  ;;  %829 = vst.msk [vmem:[%s2326_s2 + $0x18] sm:$0xff] %vm825_vm1, %v581_v33  ;;  %v895_v36 = vsel %vm825_vm1, %v581_v33, 0.0  ;;  %v1026_v37 = vmul.f32 %v581_v33, %v581_v33  ;;  %v583_v38 = vpop.f32.mrb[7].mxu0  ;;  %861 = vst.msk [vmem:[%s2326_s2 + $0x118] sm:$0xff] %vm825_vm1, %v1778_v34  ;;  %v711_v39 = vpop.f32.mrb[7].mxu1 }
 0x104   :  { %v1091_v40 = vadd.f32 %v1090_v35, %v1089_v25  ;;  %v896_v41 = vadd.f32 %v895_v36, %v894_v32 }
 0x105   :  { %v1092_v42 = vsel %vm825_vm1, %v1026_v37, 0.0 }
 0x106   :  { %v1093_v43 = vadd.f32 %v1092_v42, %v1091_v40 }
 0x108   :  { %v586_v44 = vpop.f32.mrb[8].mxu0  ;;  %v1792_v45 = vpop.f32.mrb[8].mxu1 }
 0x109   :  { %830 = vst.msk [vmem:[%s2326_s2 + $0x20] sm:$0xff] %vm825_vm1, %v586_v44  ;;  %v897_v46 = vsel %vm825_vm1, %v586_v44, 0.0  ;;  %v1027_v47 = vmul.f32 %v586_v44, %v586_v44  ;;  %v588_v48 = vpop.f32.mrb[9].mxu0  ;;  %862 = vst.msk [vmem:[%s2326_s2 + $0x120] sm:$0xff] %vm825_vm1, %v1792_v45  ;;  %v716_v49 = vpop.f32.mrb[9].mxu1 }
 0x10a   :  { %v898_v50 = vadd.f32 %v897_v46, %v896_v41  ;;  %v589_v51 = vpop.f32.mrb[10].mxu0  ;;  %v1804_v52 = vpop.f32.mrb[10].mxu1 }
 0x10b   :  { %v1094_v53 = vsel %vm825_vm1, %v1027_v47, 0.0  ;;  %831 = vst.msk [vmem:[%s2326_s2 + $0x28] sm:$0xff] %vm825_vm1, %v589_v51  ;;  %v899_v54 = vsel %vm825_vm1, %v589_v51, 0.0  ;;  %v1028_v55 = vmul.f32 %v589_v51, %v589_v51  ;;  %v591_v56 = vpop.f32.mrb[11].mxu0  ;;  %863 = vst.msk [vmem:[%s2326_s2 + $0x128] sm:$0xff] %vm825_vm1, %v1804_v52  ;;  %v719_v57 = vpop.f32.mrb[11].mxu1 }
 0x10c   :  { %v1095_v58 = vadd.f32 %v1094_v53, %v1093_v43  ;;  %v900_v59 = vadd.f32 %v899_v54, %v898_v50 }
 0x10d   :  { %v1096_v60 = vsel %vm825_vm1, %v1028_v55, 0.0 }
 0x10e   :  { %v1097_v61 = vadd.f32 %v1096_v60, %v1095_v58 }
 0x110   :  { %v594_v62 = vpop.f32.mrb[12].mxu0  ;;  %v1818_v63 = vpop.f32.mrb[12].mxu1 }
 0x111   :  { %832 = vst.msk [vmem:[%s2326_s2 + $0x30] sm:$0xff] %vm825_vm1, %v594_v62  ;;  %v901_v0 = vsel %vm825_vm1, %v594_v62, 0.0  ;;  %v1029_v1 = vmul.f32 %v594_v62, %v594_v62  ;;  %v596_v2 = vpop.f32.mrb[13].mxu0  ;;  %864 = vst.msk [vmem:[%s2326_s2 + $0x130] sm:$0xff] %vm825_vm1, %v1818_v63  ;;  %v724_v3 = vpop.f32.mrb[13].mxu1 }
 0x112   :  { %v902_v4 = vadd.f32 %v901_v0, %v900_v59  ;;  %v597_v5 = vpop.f32.mrb[14].mxu0  ;;  %v1830_v6 = vpop.f32.mrb[14].mxu1 }
 0x113   :  { %v1098_v7 = vsel %vm825_vm1, %v1029_v1, 0.0  ;;  %833 = vst.msk [vmem:[%s2326_s2 + $0x38] sm:$0xff] %vm825_vm1, %v597_v5  ;;  %v903_v8 = vsel %vm825_vm1, %v597_v5, 0.0  ;;  %v1030_v9 = vmul.f32 %v597_v5, %v597_v5  ;;  %v599_v10 = vpop.f32.mrb[15].mxu0  ;;  %865 = vst.msk [vmem:[%s2326_s2 + $0x138] sm:$0xff] %vm825_vm1, %v1830_v6  ;;  %v727_v12 = vpop.f32.mrb[15].mxu1 }
 0x114   :  { %v1099_v13 = vadd.f32 %v1098_v7, %v1097_v61  ;;  %v904_v14 = vadd.f32 %v903_v8, %v902_v4 }
 0x115   :  { %v1100_v15 = vsel %vm825_vm1, %v1030_v9, 0.0 }
 0x116   :  { %v1101_v17 = vadd.f32 %v1100_v15, %v1099_v13 }
 0x118   :  { %v602_v18 = vpop.f32.mrb[16].mxu0  ;;  %v1844_v19 = vpop.f32.mrb[16].mxu1 }
 0x119   :  { %834 = vst.msk [vmem:[%s2326_s2 + $0x40] sm:$0xff] %vm825_vm1, %v602_v18  ;;  %v905_v20 = vsel %vm825_vm1, %v602_v18, 0.0  ;;  %v1031_v21 = vmul.f32 %v602_v18, %v602_v18  ;;  %v604_v22 = vpop.f32.mrb[17].mxu0  ;;  %866 = vst.msk [vmem:[%s2326_s2 + $0x140] sm:$0xff] %vm825_vm1, %v1844_v19  ;;  %v732_v23 = vpop.f32.mrb[17].mxu1 }
 0x11a   :  { %v906_v24 = vadd.f32 %v905_v20, %v904_v14  ;;  %v605_v25 = vpop.f32.mrb[18].mxu0  ;;  %v1856_v26 = vpop.f32.mrb[18].mxu1 }
 0x11b   :  { %v1102_v28 = vsel %vm825_vm1, %v1031_v21, 0.0  ;;  %835 = vst.msk [vmem:[%s2326_s2 + $0x48] sm:$0xff] %vm825_vm1, %v605_v25  ;;  %v907_v29 = vsel %vm825_vm1, %v605_v25, 0.0  ;;  %v1032_v30 = vmul.f32 %v605_v25, %v605_v25  ;;  %v607_v31 = vpop.f32.mrb[19].mxu0  ;;  %867 = vst.msk [vmem:[%s2326_s2 + $0x148] sm:$0xff] %vm825_vm1, %v1856_v26  ;;  %v735_v32 = vpop.f32.mrb[19].mxu1 }
 0x11c   :  { %v1103_v33 = vadd.f32 %v1102_v28, %v1101_v17  ;;  %v908_v35 = vadd.f32 %v907_v29, %v906_v24 }
 0x11d   :  { %v1104_v36 = vsel %vm825_vm1, %v1032_v30, 0.0 }
 0x11e   :  { %v1105_v37 = vadd.f32 %v1104_v36, %v1103_v33 }
 0x120   :  { %v610_v38 = vpop.f32.mrb[20].mxu0  ;;  %v1870_v39 = vpop.f32.mrb[20].mxu1 }
 0x121   :  { %836 = vst.msk [vmem:[%s2326_s2 + $0x50] sm:$0xff] %vm825_vm1, %v610_v38  ;;  %v909_v40 = vsel %vm825_vm1, %v610_v38, 0.0  ;;  %v1033_v41 = vmul.f32 %v610_v38, %v610_v38  ;;  %v612_v42 = vpop.f32.mrb[21].mxu0  ;;  %868 = vst.msk [vmem:[%s2326_s2 + $0x150] sm:$0xff] %vm825_vm1, %v1870_v39  ;;  %v740_v43 = vpop.f32.mrb[21].mxu1 }
 0x122   :  { %v910_v44 = vadd.f32 %v909_v40, %v908_v35  ;;  %v613_v46 = vpop.f32.mrb[22].mxu0  ;;  %v1882_v47 = vpop.f32.mrb[22].mxu1 }
 0x123   :  { %v1106_v48 = vsel %vm825_vm1, %v1033_v41, 0.0  ;;  %837 = vst.msk [vmem:[%s2326_s2 + $0x58] sm:$0xff] %vm825_vm1, %v613_v46  ;;  %v911_v49 = vsel %vm825_vm1, %v613_v46, 0.0  ;;  %v1034_v50 = vmul.f32 %v613_v46, %v613_v46  ;;  %v615_v51 = vpop.f32.mrb[23].mxu0  ;;  %869 = vst.msk [vmem:[%s2326_s2 + $0x158] sm:$0xff] %vm825_vm1, %v1882_v47  ;;  %v743_v53 = vpop.f32.mrb[23].mxu1 }
 0x124   :  { %v1107_v54 = vadd.f32 %v1106_v48, %v1105_v37  ;;  %v912_v55 = vadd.f32 %v911_v49, %v910_v44 }
 0x125   :  { %v1108_v56 = vsel %vm825_vm1, %v1034_v50, 0.0 }
 0x126   :  { %v1109_v57 = vadd.f32 %v1108_v56, %v1107_v54 }
 0x128   :  { %v618_v58 = vpop.f32.mrb[24].mxu0  ;;  %v1896_v59 = vpop.f32.mrb[24].mxu1 }
 0x129   :  { %838 = vst.msk [vmem:[%s2326_s2 + $0x60] sm:$0xff] %vm825_vm1, %v618_v58  ;;  %v913_v60 = vsel %vm825_vm1, %v618_v58, 0.0  ;;  %v1035_v61 = vmul.f32 %v618_v58, %v618_v58  ;;  %v620_v62 = vpop.f32.mrb[25].mxu0  ;;  %870 = vst.msk [vmem:[%s2326_s2 + $0x160] sm:$0xff] %vm825_vm1, %v1896_v59  ;;  %v748_v0 = vpop.f32.mrb[25].mxu1 }
 0x12a   :  { %v914_v1 = vadd.f32 %v913_v60, %v912_v55  ;;  %v621_v2 = vpop.f32.mrb[26].mxu0  ;;  %v1908_v3 = vpop.f32.mrb[26].mxu1 }
 0x12b   :  { %v1110_v4 = vsel %vm825_vm1, %v1035_v61, 0.0  ;;  %839 = vst.msk [vmem:[%s2326_s2 + $0x68] sm:$0xff] %vm825_vm1, %v621_v2  ;;  %v915_v5 = vsel %vm825_vm1, %v621_v2, 0.0  ;;  %v1036_v7 = vmul.f32 %v621_v2, %v621_v2  ;;  %v623_v8 = vpop.f32.mrb[27].mxu0  ;;  %871 = vst.msk [vmem:[%s2326_s2 + $0x168] sm:$0xff] %vm825_vm1, %v1908_v3  ;;  %v751_v9 = vpop.f32.mrb[27].mxu1 }
 0x12c   :  { %v1111_v10 = vadd.f32 %v1110_v4, %v1109_v57  ;;  %v916_v12 = vadd.f32 %v915_v5, %v914_v1 }
 0x12d   :  { %v1112_v13 = vsel %vm825_vm1, %v1036_v7, 0.0 }
 0x12e   :  { %v1113_v14 = vadd.f32 %v1112_v13, %v1111_v10 }
 0x130   :  { %v626_v15 = vpop.f32.mrb[28].mxu0  ;;  %v1922_v17 = vpop.f32.mrb[28].mxu1 }
 0x131   :  { %840 = vst.msk [vmem:[%s2326_s2 + $0x70] sm:$0xff] %vm825_vm1, %v626_v15  ;;  %v917_v18 = vsel %vm825_vm1, %v626_v15, 0.0  ;;  %v1037_v20 = vmul.f32 %v626_v15, %v626_v15  ;;  %v628_v21 = vpop.f32.mrb[29].mxu0  ;;  %872 = vst.msk [vmem:[%s2326_s2 + $0x170] sm:$0xff] %vm825_vm1, %v1922_v17  ;;  %v756_v22 = vpop.f32.mrb[29].mxu1 }
 0x132   :  { %v918_v23 = vadd.f32 %v917_v18, %v916_v12  ;;  %v629_v24 = vpop.f32.mrb[30].mxu0  ;;  %v1934_v25 = vpop.f32.mrb[30].mxu1 }
 0x133   :  { %v1114_v28 = vsel %vm825_vm1, %v1037_v20, 0.0  ;;  %841 = vst.msk [vmem:[%s2326_s2 + $0x78] sm:$0xff] %vm825_vm1, %v629_v24  ;;  %v919_v29 = vsel %vm825_vm1, %v629_v24, 0.0  ;;  %v1038_v30 = vmul.f32 %v629_v24, %v629_v24  ;;  %v631_v31 = vpop.f32.mrb[31].mxu0  ;;  %873 = vst.msk [vmem:[%s2326_s2 + $0x178] sm:$0xff] %vm825_vm1, %v1934_v25  ;;  %v759_v32 = vpop.f32.mrb[31].mxu1 }
 0x134   :  { %v1115_v33 = vadd.f32 %v1114_v28, %v1113_v14  ;;  %v920_v35 = vadd.f32 %v919_v29, %v918_v23 }
 0x135   :  { %v1116_v36 = vsel %vm825_vm1, %v1038_v30, 0.0 }
 0x136   :  { %v1117_v37 = vadd.f32 %v1116_v36, %v1115_v33 }
 0x138   :  { %v634_v38 = vpop.f32.mrb[32].mxu0  ;;  %v1948_v40 = vpop.f32.mrb[32].mxu1 }
 0x139   :  { %842 = vst.msk [vmem:[%s2326_s2 + $0x80] sm:$0xff] %vm825_vm1, %v634_v38  ;;  %v921_v41 = vsel %vm825_vm1, %v634_v38, 0.0  ;;  %v1039_v42 = vmul.f32 %v634_v38, %v634_v38  ;;  %v636_v43 = vpop.f32.mrb[33].mxu0  ;;  %874 = vst.msk [vmem:[%s2326_s2 + $0x180] sm:$0xff] %vm825_vm1, %v1948_v40  ;;  %v764_v44 = vpop.f32.mrb[33].mxu1 }
 0x13a   :  { %v922_v46 = vadd.f32 %v921_v41, %v920_v35  ;;  %v637_v48 = vpop.f32.mrb[34].mxu0  ;;  %v1960_v49 = vpop.f32.mrb[34].mxu1 }
 0x13b   :  { %v1118_v50 = vsel %vm825_vm1, %v1039_v42, 0.0  ;;  %843 = vst.msk [vmem:[%s2326_s2 + $0x88] sm:$0xff] %vm825_vm1, %v637_v48  ;;  %v923_v51 = vsel %vm825_vm1, %v637_v48, 0.0  ;;  %v1040_v53 = vmul.f32 %v637_v48, %v637_v48  ;;  %v639_v54 = vpop.f32.mrb[35].mxu0  ;;  %875 = vst.msk [vmem:[%s2326_s2 + $0x188] sm:$0xff] %vm825_vm1, %v1960_v49  ;;  %v767_v55 = vpop.f32.mrb[35].mxu1 }
 0x13c   :  { %v1119_v56 = vadd.f32 %v1118_v50, %v1117_v37  ;;  %v924_v57 = vadd.f32 %v923_v51, %v922_v46 }
 0x13d   :  { %v1120_v58 = vsel %vm825_vm1, %v1040_v53, 0.0 }
 0x13e   :  { %v1121_v60 = vadd.f32 %v1120_v58, %v1119_v56 }
 0x140   :  { %v642_v61 = vpop.f32.mrb[36].mxu0  ;;  %v1974_v62 = vpop.f32.mrb[36].mxu1 }
 0x141   :  { %844 = vst.msk [vmem:[%s2326_s2 + $0x90] sm:$0xff] %vm825_vm1, %v642_v61  ;;  %v925_v0 = vsel %vm825_vm1, %v642_v61, 0.0  ;;  %v1041_v1 = vmul.f32 %v642_v61, %v642_v61  ;;  %v644_v2 = vpop.f32.mrb[37].mxu0  ;;  %876 = vst.msk [vmem:[%s2326_s2 + $0x190] sm:$0xff] %vm825_vm1, %v1974_v62  ;;  %v772_v4 = vpop.f32.mrb[37].mxu1 }
 0x142   :  { %v926_v5 = vadd.f32 %v925_v0, %v924_v57  ;;  %v645_v7 = vpop.f32.mrb[38].mxu0  ;;  %v1986_v8 = vpop.f32.mrb[38].mxu1 }
 0x143   :  { %v1122_v9 = vsel %vm825_vm1, %v1041_v1, 0.0  ;;  %845 = vst.msk [vmem:[%s2326_s2 + $0x98] sm:$0xff] %vm825_vm1, %v645_v7  ;;  %v927_v10 = vsel %vm825_vm1, %v645_v7, 0.0  ;;  %v1042_v12 = vmul.f32 %v645_v7, %v645_v7  ;;  %v647_v13 = vpop.f32.mrb[39].mxu0  ;;  %877 = vst.msk [vmem:[%s2326_s2 + $0x198] sm:$0xff] %vm825_vm1, %v1986_v8  ;;  %v775_v14 = vpop.f32.mrb[39].mxu1 }
 0x144   :  { %v1123_v15 = vadd.f32 %v1122_v9, %v1121_v60  ;;  %v928_v18 = vadd.f32 %v927_v10, %v926_v5 }
 0x145   :  { %v1124_v20 = vsel %vm825_vm1, %v1042_v12, 0.0 }
 0x146   :  { %v1125_v21 = vadd.f32 %v1124_v20, %v1123_v15 }
 0x148   :  { %v650_v22 = vpop.f32.mrb[40].mxu0  ;;  %v2000_v23 = vpop.f32.mrb[40].mxu1 }
 0x149   :  { %846 = vst.msk [vmem:[%s2326_s2 + $0xa0] sm:$0xff] %vm825_vm1, %v650_v22  ;;  %v929_v24 = vsel %vm825_vm1, %v650_v22, 0.0  ;;  %v1043_v28 = vmul.f32 %v650_v22, %v650_v22  ;;  %v652_v29 = vpop.f32.mrb[41].mxu0  ;;  %878 = vst.msk [vmem:[%s2326_s2 + $0x1a0] sm:$0xff] %vm825_vm1, %v2000_v23  ;;  %v780_v30 = vpop.f32.mrb[41].mxu1 }
 0x14a   :  { %v930_v31 = vadd.f32 %v929_v24, %v928_v18  ;;  %v653_v32 = vpop.f32.mrb[42].mxu0  ;;  %v2012_v33 = vpop.f32.mrb[42].mxu1 }
 0x14b   :  { %v1126_v35 = vsel %vm825_vm1, %v1043_v28, 0.0  ;;  %847 = vst.msk [vmem:[%s2326_s2 + $0xa8] sm:$0xff] %vm825_vm1, %v653_v32  ;;  %v931_v36 = vsel %vm825_vm1, %v653_v32, 0.0  ;;  %v1044_v37 = vmul.f32 %v653_v32, %v653_v32  ;;  %v655_v38 = vpop.f32.mrb[43].mxu0  ;;  %879 = vst.msk [vmem:[%s2326_s2 + $0x1a8] sm:$0xff] %vm825_vm1, %v2012_v33  ;;  %v783_v41 = vpop.f32.mrb[43].mxu1 }
 0x14c   :  { %v1127_v42 = vadd.f32 %v1126_v35, %v1125_v21  ;;  %v932_v43 = vadd.f32 %v931_v36, %v930_v31 }
 0x14d   :  { %v1128_v44 = vsel %vm825_vm1, %v1044_v37, 0.0 }
 0x14e   :  { %v1129_v46 = vadd.f32 %v1128_v44, %v1127_v42 }
 0x150   :  { %v658_v48 = vpop.f32.mrb[44].mxu0  ;;  %v2026_v50 = vpop.f32.mrb[44].mxu1 }
 0x151   :  { %848 = vst.msk [vmem:[%s2326_s2 + $0xb0] sm:$0xff] %vm825_vm1, %v658_v48  ;;  %v933_v51 = vsel %vm825_vm1, %v658_v48, 0.0  ;;  %v1045_v53 = vmul.f32 %v658_v48, %v658_v48  ;;  %v660_v54 = vpop.f32.mrb[45].mxu0  ;;  %880 = vst.msk [vmem:[%s2326_s2 + $0x1b0] sm:$0xff] %vm825_vm1, %v2026_v50  ;;  %v788_v55 = vpop.f32.mrb[45].mxu1 }
 0x152   :  { %v934_v56 = vadd.f32 %v933_v51, %v932_v43  ;;  %v661_v57 = vpop.f32.mrb[46].mxu0  ;;  %v2038_v58 = vpop.f32.mrb[46].mxu1 }
 0x153   :  { %v1130_v60 = vsel %vm825_vm1, %v1045_v53, 0.0  ;;  %849 = vst.msk [vmem:[%s2326_s2 + $0xb8] sm:$0xff] %vm825_vm1, %v661_v57  ;;  %v935_v61 = vsel %vm825_vm1, %v661_v57, 0.0  ;;  %v1046_v0 = vmul.f32 %v661_v57, %v661_v57  ;;  %v663_v1 = vpop.f32.mrb[47].mxu0  ;;  %881 = vst.msk [vmem:[%s2326_s2 + $0x1b8] sm:$0xff] %vm825_vm1, %v2038_v58  ;;  %v791_v2 = vpop.f32.mrb[47].mxu1 }
 0x154   :  { %v1131_v4 = vadd.f32 %v1130_v60, %v1129_v46  ;;  %v936_v5 = vadd.f32 %v935_v61, %v934_v56 }
 0x155   :  { %v1132_v7 = vsel %vm825_vm1, %v1046_v0, 0.0 }
 0x156   :  { %v1133_v9 = vadd.f32 %v1132_v7, %v1131_v4 }
 0x158   :  { %v666_v10 = vpop.f32.mrb[48].mxu0  ;;  %v2052_v12 = vpop.f32.mrb[48].mxu1 }
 0x159   :  { %850 = vst.msk [vmem:[%s2326_s2 + $0xc0] sm:$0xff] %vm825_vm1, %v666_v10  ;;  %v937_v13 = vsel %vm825_vm1, %v666_v10, 0.0  ;;  %v1047_v14 = vmul.f32 %v666_v10, %v666_v10  ;;  %v668_v15 = vpop.f32.mrb[49].mxu0  ;;  %882 = vst.msk [vmem:[%s2326_s2 + $0x1c0] sm:$0xff] %vm825_vm1, %v2052_v12  ;;  %v796_v18 = vpop.f32.mrb[49].mxu1 }
 0x15a   :  { %v938_v20 = vadd.f32 %v937_v13, %v936_v5  ;;  %v669_v21 = vpop.f32.mrb[50].mxu0  ;;  %v2064_v22 = vpop.f32.mrb[50].mxu1 }
 0x15b   :  { %v1134_v24 = vsel %vm825_vm1, %v1047_v14, 0.0  ;;  %851 = vst.msk [vmem:[%s2326_s2 + $0xc8] sm:$0xff] %vm825_vm1, %v669_v21  ;;  %v939_v28 = vsel %vm825_vm1, %v669_v21, 0.0  ;;  %v1048_v29 = vmul.f32 %v669_v21, %v669_v21  ;;  %v671_v30 = vpop.f32.mrb[51].mxu0  ;;  %883 = vst.msk [vmem:[%s2326_s2 + $0x1c8] sm:$0xff] %vm825_vm1, %v2064_v22  ;;  %v799_v31 = vpop.f32.mrb[51].mxu1 }
 0x15c   :  { %v1135_v32 = vadd.f32 %v1134_v24, %v1133_v9  ;;  %v940_v35 = vadd.f32 %v939_v28, %v938_v20 }
 0x15d   :  { %v1136_v36 = vsel %vm825_vm1, %v1048_v29, 0.0 }
 0x15e   :  { %v1137_v37 = vadd.f32 %v1136_v36, %v1135_v32 }
 0x160   :  { %v674_v38 = vpop.f32.mrb[52].mxu0  ;;  %v2078_v41 = vpop.f32.mrb[52].mxu1 }
 0x161   :  { %852 = vst.msk [vmem:[%s2326_s2 + $0xd0] sm:$0xff] %vm825_vm1, %v674_v38  ;;  %v941_v42 = vsel %vm825_vm1, %v674_v38, 0.0  ;;  %v1049_v43 = vmul.f32 %v674_v38, %v674_v38  ;;  %v676_v44 = vpop.f32.mrb[53].mxu0  ;;  %884 = vst.msk [vmem:[%s2326_s2 + $0x1d0] sm:$0xff] %vm825_vm1, %v2078_v41  ;;  %v804_v46 = vpop.f32.mrb[53].mxu1 }
 0x162   :  { %v942_v48 = vadd.f32 %v941_v42, %v940_v35  ;;  %v677_v51 = vpop.f32.mrb[54].mxu0  ;;  %v2090_v53 = vpop.f32.mrb[54].mxu1 }
 0x163   :  { %v1138_v54 = vsel %vm825_vm1, %v1049_v43, 0.0  ;;  %853 = vst.msk [vmem:[%s2326_s2 + $0xd8] sm:$0xff] %vm825_vm1, %v677_v51  ;;  %v943_v55 = vsel %vm825_vm1, %v677_v51, 0.0  ;;  %v1050_v56 = vmul.f32 %v677_v51, %v677_v51  ;;  %v679_v57 = vpop.f32.mrb[55].mxu0  ;;  %885 = vst.msk [vmem:[%s2326_s2 + $0x1d8] sm:$0xff] %vm825_vm1, %v2090_v53  ;;  %v807_v60 = vpop.f32.mrb[55].mxu1 }
 0x164   :  { %v1139_v61 = vadd.f32 %v1138_v54, %v1137_v37  ;;  %v944_v0 = vadd.f32 %v943_v55, %v942_v48  ;;  %v1055_v54 = vmul.f32 %v1740_v11, %v1740_v11 }
 0x165   :  { %v1140_v1 = vsel %vm825_vm1, %v1050_v56, 0.0 }
 0x166   :  { %v1141_v2 = vadd.f32 %v1140_v1, %v1139_v61 }
 0x168   :  { %v682_v4 = vpop.f32.mrb[56].mxu0  ;;  %v2104_v5 = vpop.f32.mrb[56].mxu1 }
 0x169   :  { %854 = vst.msk [vmem:[%s2326_s2 + $0xe0] sm:$0xff] %vm825_vm1, %v682_v4  ;;  %v945_v7 = vsel %vm825_vm1, %v682_v4, 0.0  ;;  %v1051_v9 = vmul.f32 %v682_v4, %v682_v4  ;;  %v684_v10 = vpop.f32.mrb[57].mxu0  ;;  %886 = vst.msk [vmem:[%s2326_s2 + $0x1e0] sm:$0xff] %vm825_vm1, %v2104_v5  ;;  %v812_v13 = vpop.f32.mrb[57].mxu1  ;;  %v1056_v4 = vmul.f32 %v1751_v16, %v1751_v16 }
 0x16a   :  { %v946_v14 = vadd.f32 %v945_v7, %v944_v0  ;;  %v685_v15 = vpop.f32.mrb[58].mxu0  ;;  %v2116_v18 = vpop.f32.mrb[58].mxu1  ;;  %v1150_v13 = vsel %vm825_vm1, %v1055_v54, 0.0 }
 0x16b   :  { %v1142_v20 = vsel %vm825_vm1, %v1051_v9, 0.0  ;;  %855 = vst.msk [vmem:[%s2326_s2 + $0xe8] sm:$0xff] %vm825_vm1, %v685_v15  ;;  %v947_v21 = vsel %vm825_vm1, %v685_v15, 0.0  ;;  %v1052_v24 = vmul.f32 %v685_v15, %v685_v15  ;;  %v687_v28 = vpop.f32.mrb[59].mxu0  ;;  %887 = vst.msk [vmem:[%s2326_s2 + $0x1e8] sm:$0xff] %vm825_vm1, %v2116_v18  ;;  %v815_v29 = vpop.f32.mrb[59].mxu1  ;;  %v1057_v15 = vmul.f32 %v1766_v27, %v1766_v27 }
 0x16c   :  { %v1143_v30 = vadd.f32 %v1142_v20, %v1141_v2  ;;  %v948_v31 = vadd.f32 %v947_v21, %v946_v14  ;;  %v953_v2 = vsel %vm825_vm1, %v1740_v11, 0.0  ;;  %v955_v14 = vsel %vm825_vm1, %v1751_v16, 0.0 }
 0x16d   :  { %v1144_v32 = vsel %vm825_vm1, %v1052_v24, 0.0  ;;  %v1152_v24 = vsel %vm825_vm1, %v1056_v4, 0.0  ;;  %v957_v11 = vsel %vm825_vm1, %v1766_v27, 0.0  ;;  %v1058_v28 = vmul.f32 %v1778_v34, %v1778_v34 }
 0x16e   :  { %v1145_v35 = vadd.f32 %v1144_v32, %v1143_v30  ;;  %v959_v16 = vsel %vm825_vm1, %v1778_v34, 0.0  ;;  %v1059_v32 = vmul.f32 %v1792_v45, %v1792_v45  ;;  %v961_v27 = vsel %vm825_vm1, %v1792_v45, 0.0 }
 0x16f   :  { %v963_v34 = vsel %vm825_vm1, %v1804_v52, 0.0  ;;  %v965_v45 = vsel %vm825_vm1, %v1818_v63, 0.0 }
 0x170   :  { %v690_v36 = vpop.f32.mrb[60].mxu0  ;;  %v2130_v37 = vpop.f32.mrb[60].mxu1 }
 0x171   :  { %856 = vst.msk [vmem:[%s2326_s2 + $0xf0] sm:$0xff] %vm825_vm1, %v690_v36  ;;  %v949_v38 = vsel %vm825_vm1, %v690_v36, 0.0  ;;  %v1053_v42 = vmul.f32 %v690_v36, %v690_v36  ;;  %v692_v43 = vpop.f32.mrb[61].mxu0  ;;  %888 = vst.msk [vmem:[%s2326_s2 + $0x1f0] sm:$0xff] %vm825_vm1, %v2130_v37  ;;  %v820_v44 = vpop.f32.mrb[61].mxu1 }
 0x172   :  { %v950_v46 = vadd.f32 %v949_v38, %v948_v31  ;;  %v693_v48 = vpop.f32.mrb[62].mxu0  ;;  %v2142_v51 = vpop.f32.mrb[62].mxu1  ;;  %v1154_v31 = vsel %vm825_vm1, %v1057_v15, 0.0  ;;  %v1156_v38 = vsel %vm825_vm1, %v1058_v28, 0.0  ;;  %v1065_v15 = vmul.f32 %v1870_v39, %v1870_v39 }
 0x173   :  { %v1146_v55 = vsel %vm825_vm1, %v1053_v42, 0.0  ;;  %857 = vst.msk [vmem:[%s2326_s2 + $0xf8] sm:$0xff] %vm825_vm1, %v693_v48  ;;  %v951_v56 = vsel %vm825_vm1, %v693_v48, 0.0  ;;  %v1054_v57 = vmul.f32 %v693_v48, %v693_v48  ;;  %v695_v60 = vpop.f32.mrb[63].mxu0  ;;  %889 = vst.msk [vmem:[%s2326_s2 + $0x1f8] sm:$0xff] %vm825_vm1, %v2142_v51  ;;  %v823_v61 = vpop.f32.mrb[63].mxu1  ;;  %v1060_v42 = vmul.f32 %v1804_v52, %v1804_v52 }
 0x174   :  { %v1147_v0 = vadd.f32 %v1146_v55, %v1145_v35  ;;  %v952_v1 = vadd.f32 %v951_v56, %v950_v46  ;;  %v1158_v46 = vsel %vm825_vm1, %v1059_v32, 0.0  ;;  %v1061_v48 = vmul.f32 %v1818_v63, %v1818_v63 }
 0x175   :  { %v1148_v7 = vsel %vm825_vm1, %v1054_v57, 0.0  ;;  %v1160_v56 = vsel %vm825_vm1, %v1060_v42, 0.0  ;;  %v1062_v57 = vmul.f32 %v1830_v6, %v1830_v6  ;;  %v967_v52 = vsel %vm825_vm1, %v1830_v6, 0.0 }
 0x176   :  { %v954_v9 = vadd.f32 %v953_v2, %v952_v1  ;;  %v1149_v10 = vadd.f32 %v1148_v7, %v1147_v0  ;;  %v1162_v0 = vsel %vm825_vm1, %v1061_v48, 0.0  ;;  %v1063_v1 = vmul.f32 %v1844_v19, %v1844_v19 }
 0x177   :  { %v1164_v7 = vsel %vm825_vm1, %v1062_v57, 0.0  ;;  %v969_v63 = vsel %vm825_vm1, %v1844_v19, 0.0  ;;  %v971_v6 = vsel %vm825_vm1, %v1856_v26, 0.0  ;;  %v973_v19 = vsel %vm825_vm1, %v1870_v39, 0.0 }
 0x178   :  { %v956_v20 = vadd.f32 %v955_v14, %v954_v9  ;;  %v1151_v21 = vadd.f32 %v1150_v13, %v1149_v10  ;;  %v1064_v9 = vmul.f32 %v1856_v26, %v1856_v26  ;;  %v1166_v14 = vsel %vm825_vm1, %v1063_v1, 0.0 }
 0x179   :  { %v975_v26 = vsel %vm825_vm1, %v1882_v47, 0.0  ;;  %v977_v39 = vsel %vm825_vm1, %v1896_v59, 0.0  ;;  %v1070_v48 = vmul.f32 %v1934_v25, %v1934_v25 }
 0x17a   :  { %v958_v29 = vadd.f32 %v957_v11, %v956_v20  ;;  %v1153_v30 = vadd.f32 %v1152_v24, %v1151_v21  ;;  %v1168_v24 = vsel %vm825_vm1, %v1064_v9, 0.0  ;;  %v1066_v11 = vmul.f32 %v1882_v47, %v1882_v47 }
 0x17b   :  { %v979_v47 = vsel %vm825_vm1, %v1908_v3, 0.0 }
 0x17c   :  { %v960_v35 = vadd.f32 %v959_v16, %v958_v29  ;;  %v1155_v36 = vadd.f32 %v1154_v31, %v1153_v30  ;;  %v1170_v30 = vsel %vm825_vm1, %v1065_v15, 0.0  ;;  %v1067_v31 = vmul.f32 %v1896_v59, %v1896_v59 }
 0x17d   :  { %v981_v59 = vsel %vm825_vm1, %v1922_v17, 0.0  ;;  %v1075_v15 = vmul.f32 %v2000_v23, %v2000_v23 }
 0x17e   :  { %v962_v43 = vadd.f32 %v961_v27, %v960_v35  ;;  %v1157_v44 = vadd.f32 %v1156_v38, %v1155_v36  ;;  %v1172_v35 = vsel %vm825_vm1, %v1066_v11, 0.0  ;;  %v1068_v36 = vmul.f32 %v1908_v3, %v1908_v3 }
 0x17f   :  { %v1174_v42 = vsel %vm825_vm1, %v1067_v31, 0.0  ;;  %v983_v3 = vsel %vm825_vm1, %v1934_v25, 0.0  ;;  %v987_v25 = vsel %vm825_vm1, %v1960_v49, 0.0 }
 0x180   :  { %v964_v54 = vadd.f32 %v963_v34, %v962_v43  ;;  %v1159_v55 = vadd.f32 %v1158_v46, %v1157_v44  ;;  %v1069_v43 = vmul.f32 %v1922_v17, %v1922_v17  ;;  %v1176_v34 = vsel %vm825_vm1, %v1068_v36, 0.0 }
 0x181   :  { %v985_v17 = vsel %vm825_vm1, %v1948_v40, 0.0 }
 0x182   :  { %v966_v60 = vadd.f32 %v965_v45, %v964_v54  ;;  %v1161_v61 = vadd.f32 %v1160_v56, %v1159_v55  ;;  %v1178_v56 = vsel %vm825_vm1, %v1069_v43, 0.0  ;;  %v1071_v45 = vmul.f32 %v1948_v40, %v1948_v40 }
 0x183   :  { %v989_v40 = vsel %vm825_vm1, %v1974_v62, 0.0  ;;  %v1080_v43 = vmul.f32 %v2064_v22, %v2064_v22 }
 0x184   :  { %v968_v2 = vadd.f32 %v967_v52, %v966_v60  ;;  %v1163_v4 = vadd.f32 %v1162_v0, %v1161_v61  ;;  %v1180_v61 = vsel %vm825_vm1, %v1070_v48, 0.0  ;;  %v1072_v0 = vmul.f32 %v1960_v49, %v1960_v49 }
 0x185   :  { %v991_v49 = vsel %vm825_vm1, %v1986_v8, 0.0 }
 0x186   :  { %v1165_v10 = vadd.f32 %v1164_v7, %v1163_v4  ;;  %v970_v13 = vadd.f32 %v969_v63, %v968_v2  ;;  %v1182_v2 = vsel %vm825_vm1, %v1071_v45, 0.0  ;;  %v1073_v4 = vmul.f32 %v1974_v62, %v1974_v62 }
 0x187   :  { %v1184_v9 = vsel %vm825_vm1, %v1072_v0, 0.0  ;;  %v993_v62 = vsel %vm825_vm1, %v2000_v23, 0.0  ;;  %v997_v23 = vsel %vm825_vm1, %v2026_v50, 0.0 }
 0x188   :  { %v972_v20 = vadd.f32 %v971_v6, %v970_v13  ;;  %v1167_v21 = vadd.f32 %v1166_v14, %v1165_v10  ;;  %v1074_v10 = vmul.f32 %v1986_v8, %v1986_v8  ;;  %v1186_v6 = vsel %vm825_vm1, %v1073_v4, 0.0 }
 0x189   :  { %v995_v8 = vsel %vm825_vm1, %v2012_v33, 0.0  ;;  %v1011_v4 = vsel %vm825_vm1, %v2116_v18, 0.0 }
 0x18a   :  { %v974_v28 = vadd.f32 %v973_v19, %v972_v20  ;;  %v1169_v29 = vadd.f32 %v1168_v24, %v1167_v21  ;;  %v1188_v24 = vsel %vm825_vm1, %v1074_v10, 0.0  ;;  %v1076_v19 = vmul.f32 %v2012_v33, %v2012_v33 }
 0x18b   :  { %v999_v33 = vsel %vm825_vm1, %v2038_v58, 0.0  ;;  %v1086_v10 = vmul.f32 %v2142_v51, %v2142_v51 }
 0x18c   :  { %v976_v16 = vadd.f32 %v975_v26, %v974_v28  ;;  %v1171_v32 = vadd.f32 %v1170_v30, %v1169_v29  ;;  %v1190_v29 = vsel %vm825_vm1, %v1075_v15, 0.0  ;;  %v1077_v30 = vmul.f32 %v2026_v50, %v2026_v50 }
 0x18d   :  { %v1001_v50 = vsel %vm825_vm1, %v2052_v12, 0.0 }
 0x18e   :  { %v978_v38 = vadd.f32 %v977_v39, %v976_v16  ;;  %v1173_v27 = vadd.f32 %v1172_v35, %v1171_v32  ;;  %v1192_v16 = vsel %vm825_vm1, %v1076_v19, 0.0  ;;  %v1078_v32 = vmul.f32 %v2038_v58, %v2038_v58 }
 0x18f   :  { %v1194_v36 = vsel %vm825_vm1, %v1077_v30, 0.0  ;;  %v1003_v58 = vsel %vm825_vm1, %v2064_v22, 0.0  ;;  %v1007_v22 = vsel %vm825_vm1, %v2090_v53, 0.0 }
 0x190   :  { %v980_v44 = vadd.f32 %v979_v47, %v978_v38  ;;  %v1175_v46 = vadd.f32 %v1174_v42, %v1173_v27  ;;  %v1079_v38 = vmul.f32 %v2052_v12, %v2052_v12  ;;  %v1196_v47 = vsel %vm825_vm1, %v1078_v32, 0.0 }
 0x191   :  { %v1005_v12 = vsel %vm825_vm1, %v2078_v41, 0.0 }
 0x192   :  { %v982_v54 = vadd.f32 %v981_v59, %v980_v44  ;;  %v1177_v55 = vadd.f32 %v1176_v34, %v1175_v46  ;;  %v1198_v34 = vsel %vm825_vm1, %v1079_v38, 0.0  ;;  %v1081_v59 = vmul.f32 %v2078_v41, %v2078_v41 }
 0x193   :  { %v1009_v41 = vsel %vm825_vm1, %v2104_v5, 0.0 }
 0x194   :  { %v984_v57 = vadd.f32 %v983_v3, %v982_v54  ;;  %v1179_v60 = vadd.f32 %v1178_v56, %v1177_v55  ;;  %v1200_v55 = vsel %vm825_vm1, %v1080_v43, 0.0  ;;  %v1082_v56 = vmul.f32 %v2090_v53, %v2090_v53 }
 0x196   :  { %v986_v52 = vadd.f32 %v985_v17, %v984_v57  ;;  %v1181_v1 = vadd.f32 %v1180_v61, %v1179_v60  ;;  %v1202_v57 = vsel %vm825_vm1, %v1081_v59, 0.0  ;;  %v1083_v60 = vmul.f32 %v2104_v5, %v2104_v5 }
 0x197   :  { %v1204_v0 = vsel %vm825_vm1, %v1082_v56, 0.0 }
 0x198   :  { %v1183_v7 = vadd.f32 %v1182_v2, %v1181_v1  ;;  %v988_v63 = vadd.f32 %v987_v25, %v986_v52  ;;  %v1084_v52 = vmul.f32 %v2116_v18, %v2116_v18  ;;  %v1085_v1 = vmul.f32 %v2130_v37, %v2130_v37 }
 0x199   :  { %v1206_v53 = vsel %vm825_vm1, %v1083_v60, 0.0  ;;  %v1212_v18 = vsel %vm825_vm1, %v1086_v10, 0.0 }
 0x19a   :  { %v1185_v13 = vadd.f32 %v1184_v9, %v1183_v7  ;;  %v990_v14 = vadd.f32 %v989_v40, %v988_v63  ;;  %v1013_v7 = vsel %vm825_vm1, %v2130_v37, 0.0  ;;  %v1208_v5 = vsel %vm825_vm1, %v1084_v52, 0.0 }
 0x19b   :  { %v1210_v40 = vsel %vm825_vm1, %v1085_v1, 0.0 }
 0x19c   :  { %v1187_v20 = vadd.f32 %v1186_v6, %v1185_v13  ;;  %v992_v21 = vadd.f32 %v991_v49, %v990_v14  ;;  %v1015_v6 = vsel %vm825_vm1, %v2142_v51, 0.0 }
 0x19e   :  { %v1189_v11 = vadd.f32 %v1188_v24, %v1187_v20  ;;  %v994_v28 = vadd.f32 %v993_v62, %v992_v21 }
 0x1a0   :  { %v1191_v26 = vadd.f32 %v1190_v29, %v1189_v11  ;;  %v996_v31 = vadd.f32 %v995_v8, %v994_v28 }
 0x1a2   :  { %v1193_v35 = vadd.f32 %v1192_v16, %v1191_v26  ;;  %v998_v39 = vadd.f32 %v997_v23, %v996_v31 }
 0x1a4   :  { %v1195_v27 = vadd.f32 %v1194_v36, %v1193_v35  ;;  %v1000_v42 = vadd.f32 %v999_v33, %v998_v39 }
 0x1a6   :  { %v1197_v44 = vadd.f32 %v1196_v47, %v1195_v27  ;;  %v1002_v46 = vadd.f32 %v1001_v50, %v1000_v42 }
 0x1a8   :  { %v1199_v48 = vadd.f32 %v1198_v34, %v1197_v44  ;;  %v1004_v54 = vadd.f32 %v1003_v58, %v1002_v46 }
 0x1aa   :  { %v1201_v3 = vadd.f32 %v1200_v55, %v1199_v48  ;;  %v1006_v45 = vadd.f32 %v1005_v12, %v1004_v54 }
 0x1ac   :  { %v1203_v61 = vadd.f32 %v1202_v57, %v1201_v3  ;;  %v1008_v17 = vadd.f32 %v1007_v22, %v1006_v45 }
 0x1ae   :  { %v1205_v2 = vadd.f32 %v1204_v0, %v1203_v61  ;;  %v1010_v25 = vadd.f32 %v1009_v41, %v1008_v17 }
 0x1b0   :  { %v1207_v63 = vadd.f32 %v1206_v53, %v1205_v2  ;;  %v1012_v9 = vadd.f32 %v1011_v4, %v1010_v25 }
 0x1b2   :  { %v1209_v13 = vadd.f32 %v1208_v5, %v1207_v63  ;;  %v1014_v14 = vadd.f32 %v1013_v7, %v1012_v9 }
 0x1b4   :  { %v1211_v49 = vadd.f32 %v1210_v40, %v1209_v13  ;;  %v1016_v15 = vadd.f32 %v1015_v6, %v1014_v14 }
 0x1b6   :  { %v1017_v20 = vrot.slane %v1016_v15, 4  ;;  %v1213_v37 = vadd.f32 %v1212_v18, %v1211_v49 }
 0x1b8   :  { %v1018_v21 = vadd.f32 %v1017_v20, %v1016_v15  ;;  %v1214_v24 = vrot.slane %v1213_v37, 4 }
 0x1ba   :  { %v1019_v62 = vrot.slane %v1018_v21, 2  ;;  %v1215_v19 = vadd.f32 %v1214_v24, %v1213_v37 }
 0x1bc   :  { %v1020_v11 = vadd.f32 %v1019_v62, %v1018_v21  ;;  %v1216_v28 = vrot.slane %v1215_v19, 2 }
 0x1be   :  { %v1021_v29 = vrot.slane %v1020_v11, 1  ;;  %v1217_v8 = vadd.f32 %v1216_v28, %v1215_v19 }
 0x1c0   :  { %v1022_v30 = vadd.f32 %v1021_v29, %v1020_v11  ;;  %v1218_v26 = vrot.slane %v1217_v8, 1 }
 0x1c2   :  { %v1219_v31 = vadd.f32 %v1218_v26, %v1217_v8  ;;  %1220 = vst.msk [vmem:[%s2327_s3] sm:$0xff] %vm825_vm1, %v1022_v30 }
 0x1c4   :  { %1221 = vst.msk [vmem:[%s2328_s4] sm:$0xff] %vm825_vm1, %v1219_v31 }

// kernel: generator_forward.16
= control target key start
LH: loop header
LB: loop body
LE: loop exit
PB: predicated region body
PF: predicated region fallthrough
CT: control target
= control target key end

     0   :  { %s423_s0 = inlined_call_operand.vmem [shape: f32[128,128], index: 0, kind: input, shape index: {}]   ;;  %s424_s1 = inlined_call_operand.vmem [shape: f32[1,128], index: 1, kind: input, shape index: {}]   ;;  %s425_s2 = inlined_call_operand.vmem [shape: f32[1,128], index: 2, kind: input, shape index: {}]   ;;  %s426_s3 = inlined_call_operand.vmem [shape: bf16[128,128], index: 3, kind: output, shape index: {}]  }
   0x1   :  { %v14_v0 = vld [vmem:[%s423_s0] sm:$0xff]  ;;  %v15_v1 = vld [vmem:[%s423_s0 + $0x8] sm:$0xff]  ;;  %v16_v6 = vld [vmem:[%s423_s0 + $0x10] sm:$0xff] }
   0x2   :  { %v318_v2 = vld [vmem:[%s424_s1] ss:$0 sm:$0xff]  ;;  %v17_v7 = vld [vmem:[%s423_s0 + $0x18] sm:$0xff]  ;;  %v19_v11 = vld [vmem:[%s423_s0 + $0x28] sm:$0xff] }
   0x3   :  { %v37_v3 = vmul.f32 %v318_v2, %v14_v0  ;;  %v38_v4 = vmul.f32 %v318_v2, %v15_v1  ;;  %v325_v5 = vld [vmem:[%s425_s2] ss:$0 sm:$0xff]  ;;  %v39_v8 = vmul.f32 %v318_v2, %v16_v6  ;;  %v40_v9 = vmul.f32 %v318_v2, %v17_v7  ;;  %v20_v12 = vld [vmem:[%s423_s0 + $0x30] sm:$0xff]  ;;  %v21_v17 = vld [vmem:[%s423_s0 + $0x38] sm:$0xff] }
   0x4   :  { %v18_v10 = vld [vmem:[%s423_s0 + $0x20] sm:$0xff]  ;;  %v42_v16 = vmul.f32 %v318_v2, %v19_v11  ;;  %v43_v20 = vmul.f32 %v318_v2, %v20_v12  ;;  %v44_v21 = vmul.f32 %v318_v2, %v21_v17  ;;  %v23_v35 = vld [vmem:[%s423_s0 + $0x48] sm:$0xff]  ;;  %v24_v36 = vld [vmem:[%s423_s0 + $0x50] sm:$0xff] }
   0x5   :  { %v60_v13 = vadd.f32 %v325_v5, %v37_v3  ;;  %v61_v14 = vadd.f32 %v325_v5, %v38_v4  ;;  %v41_v15 = vmul.f32 %v318_v2, %v18_v10  ;;  %v62_v18 = vadd.f32 %v325_v5, %v39_v8  ;;  %v22_v34 = vld [vmem:[%s423_s0 + $0x40] sm:$0xff]  ;;  %v25_v42 = vld [vmem:[%s423_s0 + $0x58] sm:$0xff]  ;;  %v27_v48 = vld [vmem:[%s423_s0 + $0x68] sm:$0xff] }
   0x6   :  { %v63_v19 = vadd.f32 %v325_v5, %v40_v9  ;;  %v65_v29 = vadd.f32 %v325_v5, %v42_v16  ;;  %v66_v33 = vadd.f32 %v325_v5, %v43_v20  ;;  %v67_v40 = vadd.f32 %v325_v5, %v44_v21  ;;  %v26_v47 = vld [vmem:[%s423_s0 + $0x60] sm:$0xff]  ;;  %v28_v60 = vld [vmem:[%s423_s0 + $0x70] sm:$0xff]  ;;  %v29_v7 = vld [vmem:[%s423_s0 + $0x78] sm:$0xff] }
   0x7   :  { %vm76_vm0 = vcmp.ge.f32.partialorder %v60_v13, 0.0  ;;  %vm77_vm1 = vcmp.ge.f32.partialorder %v61_v14, 0.0  ;;  %v92_v22 = vmul.f32 0.2, %v60_v13  ;;  %v93_v23 = vmul.f32 0.2, %v61_v14 }
   0x8   :  { %vm78_vm2 = vcmp.ge.f32.partialorder %v62_v18, 0.0  ;;  %vm79_vm3 = vcmp.ge.f32.partialorder %v63_v19, 0.0  ;;  %v94_v24 = vmul.f32 0.2, %v62_v18  ;;  %v95_v25 = vmul.f32 0.2, %v63_v19 }
   0x9   :  { %v108_v26 = vsel %vm76_vm0, %v60_v13, %v92_v22  ;;  %v109_v27 = vsel %vm77_vm1, %v61_v14, %v93_v23  ;;  %v64_v28 = vadd.f32 %v325_v5, %v41_v15  ;;  %vm81_vm5 = vcmp.ge.f32.partialorder %v65_v29, 0.0 }
   0xa   :  { %v245_v30 = vpack.c.bf16 %v109_v27, %v108_v26  ;;  %v110_v31 = vsel %vm78_vm2, %v62_v18, %v94_v24  ;;  %v111_v32 = vsel %vm79_vm3, %v63_v19, %v95_v25  ;;  %v97_v39 = vmul.f32 0.2, %v65_v29 }
   0xb   :  { %v250_v37 = vpack.c.bf16 %v111_v32, %v110_v31  ;;  %vm80_vm4 = vcmp.ge.f32.partialorder %v64_v28, 0.0  ;;  %v96_v38 = vmul.f32 0.2, %v64_v28  ;;  %vm82_vm6 = vcmp.ge.f32.partialorder %v66_v33, 0.0 }
   0xc   :  { %246 = vst [vmem:[%s426_s3] sm:$0xff] %v245_v30   ;;  %v98_v41 = vmul.f32 0.2, %v66_v33  ;;  %v45_v44 = vmul.f32 %v318_v2, %v22_v34  ;;  %v46_v45 = vmul.f32 %v318_v2, %v23_v35  ;;  %v47_v46 = vmul.f32 %v318_v2, %v24_v36 }
   0xd   :  { %282 = vst [vmem:[%s426_s3 + $0x8] sm:$0xff] %v250_v37   ;;  %v112_v43 = vsel %vm80_vm4, %v64_v28, %v96_v38  ;;  %v113_v49 = vsel %vm81_vm5, %v65_v29, %v97_v39  ;;  %vm83_vm7 = vcmp.ge.f32.partialorder %v67_v40, 0.0  ;;  %v99_v50 = vmul.f32 0.2, %v67_v40 }
   0xe   :  { %v114_v51 = vsel %vm82_vm6, %v66_v33, %v98_v41  ;;  %v255_v52 = vpack.c.bf16 %v113_v49, %v112_v43  ;;  %v68_v53 = vadd.f32 %v325_v5, %v45_v44  ;;  %v69_v54 = vadd.f32 %v325_v5, %v46_v45 }
   0xf   :  { %v48_v55 = vmul.f32 %v318_v2, %v25_v42  ;;  %v115_v56 = vsel %vm83_vm7, %v67_v40, %v99_v50  ;;  %v70_v57 = vadd.f32 %v325_v5, %v47_v46  ;;  %v49_v58 = vmul.f32 %v318_v2, %v26_v47 }
  0x10   :  { %v50_v59 = vmul.f32 %v318_v2, %v27_v48  ;;  %283 = vst [vmem:[%s426_s3 + $0x10] sm:$0xff] %v255_v52   ;;  %v260_v61 = vpack.c.bf16 %v115_v56, %v114_v51  ;;  %vm84_vm8 = vcmp.ge.f32.partialorder %v68_v53, 0.0  ;;  %vm85_vm9 = vcmp.ge.f32.partialorder %v69_v54, 0.0 }
  0x11   :  { %v100_v62 = vmul.f32 0.2, %v68_v53  ;;  %v101_v63 = vmul.f32 0.2, %v69_v54  ;;  %v71_v0 = vadd.f32 %v325_v5, %v48_v55  ;;  %vm86_vm10 = vcmp.ge.f32.partialorder %v70_v57, 0.0 }
  0x12   :  { %v102_v1 = vmul.f32 0.2, %v70_v57  ;;  %284 = vst [vmem:[%s426_s3 + $0x18] sm:$0xff] %v260_v61   ;;  %v72_v4 = vadd.f32 %v325_v5, %v49_v58  ;;  %v73_v6 = vadd.f32 %v325_v5, %v50_v59  ;;  %v51_v8 = vmul.f32 %v318_v2, %v28_v60 }
  0x13   :  { %v116_v3 = vsel %vm84_vm8, %v68_v53, %v100_v62  ;;  %v117_v9 = vsel %vm85_vm9, %v69_v54, %v101_v63  ;;  %vm87_vm11 = vcmp.ge.f32.partialorder %v71_v0, 0.0  ;;  %v103_v10 = vmul.f32 0.2, %v71_v0 }
  0x14   :  { %v118_v11 = vsel %vm86_vm10, %v70_v57, %v102_v1  ;;  %v265_v12 = vpack.c.bf16 %v117_v9, %v116_v3  ;;  %vm88_vm12 = vcmp.ge.f32.partialorder %v72_v4, 0.0  ;;  %vm89_vm13 = vcmp.ge.f32.partialorder %v73_v6, 0.0 }
  0x15   :  { %v104_v13 = vmul.f32 0.2, %v72_v4  ;;  %v119_v14 = vsel %vm87_vm11, %v71_v0, %v103_v10  ;;  %v105_v15 = vmul.f32 0.2, %v73_v6  ;;  %v52_v16 = vmul.f32 %v318_v2, %v29_v7 }
  0x16   :  { %v74_v17 = vadd.f32 %v325_v5, %v51_v8  ;;  %285 = vst [vmem:[%s426_s3 + $0x20] sm:$0xff] %v265_v12   ;;  %v270_v18 = vpack.c.bf16 %v119_v14, %v118_v11 }
  0x17   :  { %v120_v19 = vsel %vm88_vm12, %v72_v4, %v104_v13  ;;  %v121_v20 = vsel %vm89_vm13, %v73_v6, %v105_v15  ;;  %v75_v21 = vadd.f32 %v325_v5, %v52_v16 }
  0x18   :  { %vm90_vm14 = vcmp.ge.f32.partialorder %v74_v17, 0.0  ;;  %v106_v22 = vmul.f32 0.2, %v74_v17  ;;  %286 = vst [vmem:[%s426_s3 + $0x28] sm:$0xff] %v270_v18   ;;  %v275_v23 = vpack.c.bf16 %v121_v20, %v120_v19 }
  0x19   :  { %vm91_vm15 = vcmp.ge.f32.partialorder %v75_v21, 0.0  ;;  %v107_v2 = vmul.f32 0.2, %v75_v21 }
  0x1a   :  { %v122_v24 = vsel %vm90_vm14, %v74_v17, %v106_v22  ;;  %287 = vst [vmem:[%s426_s3 + $0x30] sm:$0xff] %v275_v23  }
  0x1b   :  { %v123_v25 = vsel %vm91_vm15, %v75_v21, %v107_v2 }
  0x1c   :  { %v280_v26 = vpack.c.bf16 %v123_v25, %v122_v24 }
  0x1e   :  { %288 = vst [vmem:[%s426_s3 + $0x38] sm:$0xff] %v280_v26  }

// kernel: generator_forward.17
= control target key start
LH: loop header
LB: loop body
LE: loop exit
PB: predicated region body
PF: predicated region fallthrough
CT: control target
= control target key end

     0   :  { %s1382_s9 = smov 0   ;;  %s1614_s0 = inlined_call_operand.vmem [shape: bf16[2048,72], index: 0, kind: input, shape index: {}]   ;;  %s1615_s1 = inlined_call_operand.vmem [shape: bf16[72,12], index: 1, kind: input, shape index: {}]   ;;  %s1616_s2 = inlined_call_operand.vmem [shape: f32[2048,12], index: 2, kind: output, shape index: {}]  }
   0x1 LB: > { %s983_s10 = sadd.s32 4294967295, %s1365_s9   ;;  %p987_p0 = scmp.ge.s32.totalorder %s1365_s9, 1  ;;  %s1365_s9 = sphi %s1382_s9, %s12_s9  }
   0x2   : > { %p113_p1 = scmp.lt.s32.totalorder %s1365_s9, 5 }
   0x4   : > { %p114_p2 = pnand %p987_p0, %p113_p1 }
   0x5   : > { %v1194_v0 = vld [vmem:[%s1615_s1] sm:$0xff] (!%p114_p2)   ;;  %v1195_v1 = vld [vmem:[%s1615_s1 + $0x8] sm:$0xff] (!%p114_p2)   ;;  %s988_s15 = sshll.u32 (!%p114_p2), %s983_s10, 6  ;;  %v1196_v2 = vld [vmem:[%s1615_s1 + $0x10] sm:$0xff] (!%p114_p2)   ;;  %vm408_vm0 = vcmask (!%p114_p2), 588800   ;;  %vm505_vm1 = vcmask (!%p114_p2), 1043456  }
   0x6   : > { %117 = sbr.rel (%p114_p2) target bundleno = 316 (0x13c), region = 28  ;;  %1100 = vmatprep.subr.bf16.mxu0 (!%p114_p2), %v1194_v0  ;;  %1174 = vmatprep.subr.bf16.mxu1 (!%p114_p2), %v1194_v0  ;;  %p136_p3 = scmp.lt.s32.totalorder (!%p114_p2), %s988_s15, 255  ;;  %v1197_v3 = vld [vmem:[%s1615_s1 + $0x18] sm:$0xff] (!%p114_p2)   ;;  %v1198_v6 = vld [vmem:[%s1615_s1 + $0x20] ss:$0 sps:$4 sm:$0xff] (!%p114_p2)   ;;  %vm862_vm2 = vcmask (!%p114_p2), 97280  }
   0x7   : > { %1101 = vmatpush3.bf16.msra.mxu0 (!%p114_p2), %v1194_v0  ;;  %1179 = vmatpush3.bf16.msra.mxu1 (!%p114_p2), %v1194_v0  ;;  %v507_v7 = vsel (!%p114_p2), %vm505_vm1, %v1198_v6, 0 }
   0x8   : > { %1102 = vmatprep.subr.bf16.mxu0 (!%p114_p2), %v1195_v1  ;;  %1175 = vmatprep.subr.bf16.mxu1 (!%p114_p2), %v1195_v1 }
   0xb   : > { %1103 = vmatpush3.bf16.msra.mxu0 (!%p114_p2), %v1195_v1  ;;  %1180 = vmatpush3.bf16.msra.mxu1 (!%p114_p2), %v1195_v1 }
   0xc   : > { %1104 = vmatprep.subr.bf16.mxu0 (!%p114_p2), %v1196_v2  ;;  %1176 = vmatprep.subr.bf16.mxu1 (!%p114_p2), %v1196_v2 }
   0xd   : > { %s1618_s15 = smov (!%p136_p3, %s988_s15), 255 }
   0xe   : > { %s989_s18 = sshll.u32 %s1618_s15, 2  ;;  %s991_s26 = sshll.u32 %s1618_s15, 3 }
   0xf   : > { %s1408_s23 = scalar_lea.vmem %s1614_s0, %s989_s18  ;;  %1105 = vmatpush3.bf16.msra.mxu0 %v1196_v2  ;;  %1181 = vmatpush3.bf16.msra.mxu1 %v1196_v2  ;;  %s1481_s29 = scalar_lea.vmem %s1616_s2, %s991_s26 }
  0x10   : > { %v1199_v4 = vld [vmem:[%s1408_s23] sm:$0xff]   ;;  %1106 = vmatprep.subr.bf16.mxu0 %v1197_v3  ;;  %1177 = vmatprep.subr.bf16.mxu1 %v1197_v3  ;;  %v1201_v8 = vld [vmem:[%s1408_s23 + $0x8] sm:$0xff]   ;;  %v1203_v10 = vld [vmem:[%s1408_s23 + $0x10] sm:$0xff]  }
  0x11   : > { %v1200_v5 = vld [vmem:[%s1408_s23 + $0x80] sm:$0xff]   ;;  %1110 = vmatprep.mubr.msk.bf16.mxu0 %vm408_vm0, %v1199_v4  ;;  %v1202_v9 = vld [vmem:[%s1408_s23 + $0x88] sm:$0xff]   ;;  %v1204_v11 = vld [vmem:[%s1408_s23 + $0x90] sm:$0xff]  }
  0x12   : > { %1142 = vmatprep.mubr.msk.bf16.mxu1 %vm408_vm0, %v1200_v5  ;;  %v1205_v12 = vld [vmem:[%s1408_s23 + $0x18] sm:$0xff]   ;;  %v1207_v14 = vld [vmem:[%s1408_s23 + $0x20] sm:$0xff]   ;;  %v1209_v16 = vld [vmem:[%s1408_s23 + $0x28] sm:$0xff]  }
  0x13   : > { %1107 = vmatpush3.bf16.msra.mxu0 %v1197_v3  ;;  %1182 = vmatpush3.bf16.msra.mxu1 %v1197_v3  ;;  %v1206_v13 = vld [vmem:[%s1408_s23 + $0x98] sm:$0xff]   ;;  %v1208_v15 = vld [vmem:[%s1408_s23 + $0xa0] sm:$0xff]   ;;  %v1210_v17 = vld [vmem:[%s1408_s23 + $0xa8] sm:$0xff]  }
  0x14   : > { %1184 = vmatprep.subr.msk.bf16.mxu0 %vm505_vm1, %v1198_v6  ;;  %1185 = vmatprep.subr.msk.bf16.mxu1 %vm505_vm1, %v1198_v6  ;;  %v1211_v18 = vld [vmem:[%s1408_s23 + $0x30] sm:$0xff]   ;;  %v1213_v20 = vld [vmem:[%s1408_s23 + $0x38] sm:$0xff]   ;;  %v1215_v22 = vld [vmem:[%s1408_s23 + $0x40] sm:$0xff]  }
  0x15   : > { %v1212_v19 = vld [vmem:[%s1408_s23 + $0xb0] sm:$0xff]   ;;  %v1214_v21 = vld [vmem:[%s1408_s23 + $0xb8] sm:$0xff]   ;;  %v1216_v23 = vld [vmem:[%s1408_s23 + $0xc0] sm:$0xff]  }
  0x16   : > { %v1217_v24 = vld [vmem:[%s1408_s23 + $0x48] sm:$0xff]   ;;  %v1219_v26 = vld [vmem:[%s1408_s23 + $0x50] sm:$0xff]   ;;  %v1221_v28 = vld [vmem:[%s1408_s23 + $0x58] sm:$0xff]  }
  0x17   : > { %1109 = vmatpush3.bf16.msra.mxu0 %v507_v7  ;;  %1183 = vmatpush3.bf16.msra.mxu1 %v507_v7  ;;  %v1218_v25 = vld [vmem:[%s1408_s23 + $0xc8] sm:$0xff]   ;;  %v1220_v27 = vld [vmem:[%s1408_s23 + $0xd0] sm:$0xff]   ;;  %v1222_v29 = vld [vmem:[%s1408_s23 + $0xd8] sm:$0xff]  }
  0x18   : > { %v1223_v30 = vld [vmem:[%s1408_s23 + $0x60] sm:$0xff]   ;;  %v1225_v32 = vld [vmem:[%s1408_s23 + $0x68] sm:$0xff]   ;;  %v1227_v34 = vld [vmem:[%s1408_s23 + $0x70] sm:$0xff]  }
  0x19   : > { %v1224_v31 = vld [vmem:[%s1408_s23 + $0xe0] sm:$0xff]   ;;  %v1226_v33 = vld [vmem:[%s1408_s23 + $0xe8] sm:$0xff]   ;;  %v1228_v35 = vld [vmem:[%s1408_s23 + $0xf0] sm:$0xff]  }
  0x1a   : > { %1111 = vmatmul.mubr.msk.bf16.vlgmr.msra.gmra.mrb[0].mxu0 %vm408_vm0, %v1201_v8  ;;  %1143 = vmatmul.mubr.msk.bf16.vlgmr.msra.gmra.mrb[0].mxu1 %vm408_vm0, %v1202_v9  ;;  %v1229_v36 = vld [vmem:[%s1408_s23 + $0x78] sm:$0xff]  }
  0x1b   : > { %1114 = vmatprep.mubr.msk.bf16.mxu0 %vm408_vm0, %v1203_v10  ;;  %1146 = vmatprep.mubr.msk.bf16.mxu1 %vm408_vm0, %v1204_v11  ;;  %v1230_v37 = vld [vmem:[%s1408_s23 + $0xf8] sm:$0xff]  }
  0x22   : > { %1115 = vmatmul.mubr.msk.bf16.gmra.mrb[4].mxu0 %vm408_vm0, %v1205_v12  ;;  %1147 = vmatmul.mubr.msk.bf16.gmra.mrb[4].mxu1 %vm408_vm0, %v1206_v13 }
  0x23   : > { %1118 = vmatprep.mubr.msk.bf16.mxu0 %vm408_vm0, %v1207_v14  ;;  %1150 = vmatprep.mubr.msk.bf16.mxu1 %vm408_vm0, %v1208_v15 }
  0x2a   : > { %1119 = vmatmul.mubr.msk.bf16.gmra.mrb[8].mxu0 %vm408_vm0, %v1209_v16  ;;  %1151 = vmatmul.mubr.msk.bf16.gmra.mrb[8].mxu1 %vm408_vm0, %v1210_v17 }
  0x2b   : > { %1122 = vmatprep.mubr.msk.bf16.mxu0 %vm408_vm0, %v1211_v18  ;;  %1154 = vmatprep.mubr.msk.bf16.mxu1 %vm408_vm0, %v1212_v19 }
  0x32   : > { %1123 = vmatmul.mubr.msk.bf16.gmra.mrb[12].mxu0 %vm408_vm0, %v1213_v20  ;;  %1155 = vmatmul.mubr.msk.bf16.gmra.mrb[12].mxu1 %vm408_vm0, %v1214_v21 }
  0x33   : > { %1126 = vmatprep.mubr.msk.bf16.mxu0 %vm408_vm0, %v1215_v22  ;;  %1158 = vmatprep.mubr.msk.bf16.mxu1 %vm408_vm0, %v1216_v23 }
  0x3a   : > { %1127 = vmatmul.mubr.msk.bf16.gmra.mrb[16].mxu0 %vm408_vm0, %v1217_v24  ;;  %1159 = vmatmul.mubr.msk.bf16.gmra.mrb[16].mxu1 %vm408_vm0, %v1218_v25 }
  0x3b   : > { %1130 = vmatprep.mubr.msk.bf16.mxu0 %vm408_vm0, %v1219_v26  ;;  %1162 = vmatprep.mubr.msk.bf16.mxu1 %vm408_vm0, %v1220_v27 }
  0x42   : > { %1131 = vmatmul.mubr.msk.bf16.gmra.mrb[20].mxu0 %vm408_vm0, %v1221_v28  ;;  %1163 = vmatmul.mubr.msk.bf16.gmra.mrb[20].mxu1 %vm408_vm0, %v1222_v29 }
  0x43   : > { %1134 = vmatprep.mubr.msk.bf16.mxu0 %vm408_vm0, %v1223_v30  ;;  %1166 = vmatprep.mubr.msk.bf16.mxu1 %vm408_vm0, %v1224_v31 }
  0x4a   : > { %1135 = vmatmul.mubr.msk.bf16.gmra.mrb[24].mxu0 %vm408_vm0, %v1225_v32  ;;  %1167 = vmatmul.mubr.msk.bf16.gmra.mrb[24].mxu1 %vm408_vm0, %v1226_v33 }
  0x4b   : > { %1138 = vmatprep.mubr.msk.bf16.mxu0 %vm408_vm0, %v1227_v34  ;;  %1170 = vmatprep.mubr.msk.bf16.mxu1 %vm408_vm0, %v1228_v35 }
  0x52   : > { %1139 = vmatmul.mubr.msk.bf16.gmra.mrb[28].mxu0 %vm408_vm0, %v1229_v36  ;;  %1171 = vmatmul.mubr.msk.bf16.gmra.mrb[28].mxu1 %vm408_vm0, %v1230_v37 }
  0xed   : > { %v1112_v38 = vpop.f32.mrb[0].mxu0  ;;  %v1144_v39 = vpop.f32.mrb[0].mxu1 }
  0xee   : > { %1231 = vtanh.f32 %v1112_v38  ;;  %v543_v40 = vpop.f32.mrb[1].mxu0  ;;  %v671_v41 = vpop.f32.mrb[1].mxu1 }
  0xef   : > { %1233 = vtanh.f32 %v1144_v39  ;;  %v1113_v42 = vpop.f32.mrb[2].mxu0  ;;  %v1145_v43 = vpop.f32.mrb[2].mxu1 }
  0xf0   : > { %1235 = vtanh.f32 %v543_v40  ;;  %v546_v44 = vpop.f32.mrb[3].mxu0  ;;  %v674_v45 = vpop.f32.mrb[3].mxu1 }
  0xf1   : > { %1237 = vtanh.f32 %v671_v41 }
  0xf2   : > { %1239 = vtanh.f32 %v1113_v42 }
  0xf3   : > { %1241 = vtanh.f32 %v1145_v43 }
  0xf4   : > { %1243 = vtanh.f32 %v546_v44 }
  0xf5   : > { %1245 = vtanh.f32 %v674_v45  ;;  %v1116_v46 = vpop.f32.mrb[4].mxu0  ;;  %v1148_v47 = vpop.f32.mrb[4].mxu1 }
  0xf6   : > { %1247 = vtanh.f32 %v1116_v46  ;;  %v559_v48 = vpop.f32.mrb[5].mxu0  ;;  %v687_v49 = vpop.f32.mrb[5].mxu1 }
  0xf7   : > { %1249 = vtanh.f32 %v1148_v47  ;;  %v1117_v50 = vpop.f32.mrb[6].mxu0  ;;  %v1149_v51 = vpop.f32.mrb[6].mxu1 }
  0xf8   : > { %v1232_v52 = vpop.eup %1231  ;;  %1251 = vtanh.f32 %v559_v48  ;;  %v562_v53 = vpop.f32.mrb[7].mxu0 }
  0xf9   : > { %v690_v54 = vpop.f32.mrb[7].mxu1  ;;  %v1234_v55 = vpop.eup %1233  ;;  %865 = vst.msk [vmem:[%s1481_s29 + $0x10] sm:$0xff] %vm862_vm2, %v1232_v52  ;;  %1253 = vtanh.f32 %v687_v49 }
  0xfa   : > { %v1236_v56 = vpop.eup %1235  ;;  %897 = vst.msk [vmem:[%s1481_s29 + $0x110] sm:$0xff] %vm862_vm2, %v1234_v55  ;;  %1255 = vtanh.f32 %v1117_v50 }
  0xfb   : > { %v1238_v57 = vpop.eup %1237  ;;  %863 = vst.msk [vmem:[%s1481_s29] sm:$0xff] %vm862_vm2, %v1236_v56  ;;  %1257 = vtanh.f32 %v1149_v51 }
  0xfc   : > { %v1240_v58 = vpop.eup %1239  ;;  %895 = vst.msk [vmem:[%s1481_s29 + $0x100] sm:$0xff] %vm862_vm2, %v1238_v57  ;;  %1259 = vtanh.f32 %v562_v53 }
  0xfd   : > { %v1242_v59 = vpop.eup %1241  ;;  %866 = vst.msk [vmem:[%s1481_s29 + $0x18] sm:$0xff] %vm862_vm2, %v1240_v58  ;;  %1261 = vtanh.f32 %v690_v54  ;;  %v1120_v60 = vpop.f32.mrb[8].mxu0 }
  0xfe   : > { %v1152_v61 = vpop.f32.mrb[8].mxu1  ;;  %v1244_v62 = vpop.eup %1243  ;;  %898 = vst.msk [vmem:[%s1481_s29 + $0x118] sm:$0xff] %vm862_vm2, %v1242_v59  ;;  %1263 = vtanh.f32 %v1120_v60 }
  0xff   : > { %v575_v63 = vpop.f32.mrb[9].mxu0  ;;  %v703_v0 = vpop.f32.mrb[9].mxu1  ;;  %864 = vst.msk [vmem:[%s1481_s29 + $0x8] sm:$0xff] %vm862_vm2, %v1244_v62  ;;  %1265 = vtanh.f32 %v1152_v61 }
 0x100   : > { %v1246_v1 = vpop.eup %1245  ;;  %v1121_v2 = vpop.f32.mrb[10].mxu0  ;;  %1267 = vtanh.f32 %v575_v63 }
 0x101   : > { %v1153_v3 = vpop.f32.mrb[10].mxu1  ;;  %v1248_v4 = vpop.eup %1247  ;;  %896 = vst.msk [vmem:[%s1481_s29 + $0x108] sm:$0xff] %vm862_vm2, %v1246_v1  ;;  %1269 = vtanh.f32 %v703_v0 }
 0x102   : > { %v578_v5 = vpop.f32.mrb[11].mxu0  ;;  %v706_v6 = vpop.f32.mrb[11].mxu1  ;;  %869 = vst.msk [vmem:[%s1481_s29 + $0x30] sm:$0xff] %vm862_vm2, %v1248_v4  ;;  %1271 = vtanh.f32 %v1121_v2 }
 0x103   : > { %v1250_v7 = vpop.eup %1249  ;;  %1273 = vtanh.f32 %v1153_v3 }
 0x104   : > { %v1252_v8 = vpop.eup %1251  ;;  %901 = vst.msk [vmem:[%s1481_s29 + $0x130] sm:$0xff] %vm862_vm2, %v1250_v7  ;;  %1275 = vtanh.f32 %v578_v5 }
 0x105   : > { %v1254_v9 = vpop.eup %1253  ;;  %867 = vst.msk [vmem:[%s1481_s29 + $0x20] sm:$0xff] %vm862_vm2, %v1252_v8  ;;  %1277 = vtanh.f32 %v706_v6  ;;  %v1124_v12 = vpop.f32.mrb[12].mxu0 }
 0x106   : > { %v1256_v10 = vpop.eup %1255  ;;  %899 = vst.msk [vmem:[%s1481_s29 + $0x120] sm:$0xff] %vm862_vm2, %v1254_v9  ;;  %v1156_v13 = vpop.f32.mrb[12].mxu1  ;;  %1279 = vtanh.f32 %v1124_v12 }
 0x107   : > { %v1258_v11 = vpop.eup %1257  ;;  %870 = vst.msk [vmem:[%s1481_s29 + $0x38] sm:$0xff] %vm862_vm2, %v1256_v10  ;;  %v591_v15 = vpop.f32.mrb[13].mxu0  ;;  %1281 = vtanh.f32 %v1156_v13 }
 0x108   : > { %v1260_v14 = vpop.eup %1259  ;;  %902 = vst.msk [vmem:[%s1481_s29 + $0x138] sm:$0xff] %vm862_vm2, %v1258_v11  ;;  %v719_v16 = vpop.f32.mrb[13].mxu1  ;;  %1283 = vtanh.f32 %v591_v15 }
 0x109   : > { %v1262_v17 = vpop.eup %1261  ;;  %868 = vst.msk [vmem:[%s1481_s29 + $0x28] sm:$0xff] %vm862_vm2, %v1260_v14  ;;  %v1125_v18 = vpop.f32.mrb[14].mxu0  ;;  %1285 = vtanh.f32 %v719_v16 }
 0x10a   : > { %v1157_v19 = vpop.f32.mrb[14].mxu1  ;;  %v1264_v20 = vpop.eup %1263  ;;  %900 = vst.msk [vmem:[%s1481_s29 + $0x128] sm:$0xff] %vm862_vm2, %v1262_v17  ;;  %1287 = vtanh.f32 %v1125_v18 }
 0x10b   : > { %v594_v21 = vpop.f32.mrb[15].mxu0  ;;  %v722_v22 = vpop.f32.mrb[15].mxu1  ;;  %873 = vst.msk [vmem:[%s1481_s29 + $0x50] sm:$0xff] %vm862_vm2, %v1264_v20  ;;  %1289 = vtanh.f32 %v1157_v19 }
 0x10c   : > { %v1266_v23 = vpop.eup %1265  ;;  %1291 = vtanh.f32 %v594_v21 }
 0x10d   : > { %v1268_v24 = vpop.eup %1267  ;;  %905 = vst.msk [vmem:[%s1481_s29 + $0x150] sm:$0xff] %vm862_vm2, %v1266_v23  ;;  %1293 = vtanh.f32 %v722_v22  ;;  %v1128_v28 = vpop.f32.mrb[16].mxu0 }
 0x10e   : > { %v1270_v25 = vpop.eup %1269  ;;  %871 = vst.msk [vmem:[%s1481_s29 + $0x40] sm:$0xff] %vm862_vm2, %v1268_v24  ;;  %v1160_v29 = vpop.f32.mrb[16].mxu1  ;;  %1295 = vtanh.f32 %v1128_v28 }
 0x10f   : > { %v1272_v26 = vpop.eup %1271  ;;  %903 = vst.msk [vmem:[%s1481_s29 + $0x140] sm:$0xff] %vm862_vm2, %v1270_v25  ;;  %v607_v31 = vpop.f32.mrb[17].mxu0  ;;  %1297 = vtanh.f32 %v1160_v29 }
 0x110   : > { %v1274_v27 = vpop.eup %1273  ;;  %874 = vst.msk [vmem:[%s1481_s29 + $0x58] sm:$0xff] %vm862_vm2, %v1272_v26  ;;  %v735_v32 = vpop.f32.mrb[17].mxu1  ;;  %1299 = vtanh.f32 %v607_v31 }
 0x111   : > { %v1276_v30 = vpop.eup %1275  ;;  %906 = vst.msk [vmem:[%s1481_s29 + $0x158] sm:$0xff] %vm862_vm2, %v1274_v27  ;;  %v1129_v34 = vpop.f32.mrb[18].mxu0  ;;  %1301 = vtanh.f32 %v735_v32 }
 0x112   : > { %v1278_v33 = vpop.eup %1277  ;;  %872 = vst.msk [vmem:[%s1481_s29 + $0x48] sm:$0xff] %vm862_vm2, %v1276_v30  ;;  %v1161_v35 = vpop.f32.mrb[18].mxu1  ;;  %1303 = vtanh.f32 %v1129_v34 }
 0x113   : > { %v1280_v36 = vpop.eup %1279  ;;  %904 = vst.msk [vmem:[%s1481_s29 + $0x148] sm:$0xff] %vm862_vm2, %v1278_v33  ;;  %v610_v37 = vpop.f32.mrb[19].mxu0  ;;  %1305 = vtanh.f32 %v1161_v35 }
 0x114   : > { %v738_v38 = vpop.f32.mrb[19].mxu1  ;;  %v1282_v39 = vpop.eup %1281  ;;  %877 = vst.msk [vmem:[%s1481_s29 + $0x70] sm:$0xff] %vm862_vm2, %v1280_v36  ;;  %1307 = vtanh.f32 %v610_v37 }
 0x115   : > { %v1284_v40 = vpop.eup %1283  ;;  %909 = vst.msk [vmem:[%s1481_s29 + $0x170] sm:$0xff] %vm862_vm2, %v1282_v39  ;;  %1309 = vtanh.f32 %v738_v38  ;;  %v1132_v44 = vpop.f32.mrb[20].mxu0 }
 0x116   : > { %v1286_v41 = vpop.eup %1285  ;;  %875 = vst.msk [vmem:[%s1481_s29 + $0x60] sm:$0xff] %vm862_vm2, %v1284_v40  ;;  %v1164_v45 = vpop.f32.mrb[20].mxu1  ;;  %1311 = vtanh.f32 %v1132_v44 }
 0x117   : > { %v1288_v42 = vpop.eup %1287  ;;  %907 = vst.msk [vmem:[%s1481_s29 + $0x160] sm:$0xff] %vm862_vm2, %v1286_v41  ;;  %v623_v47 = vpop.f32.mrb[21].mxu0  ;;  %1313 = vtanh.f32 %v1164_v45 }
 0x118   : > { %v1290_v43 = vpop.eup %1289  ;;  %878 = vst.msk [vmem:[%s1481_s29 + $0x78] sm:$0xff] %vm862_vm2, %v1288_v42  ;;  %v751_v48 = vpop.f32.mrb[21].mxu1  ;;  %1315 = vtanh.f32 %v623_v47 }
 0x119   : > { %v1292_v46 = vpop.eup %1291  ;;  %910 = vst.msk [vmem:[%s1481_s29 + $0x178] sm:$0xff] %vm862_vm2, %v1290_v43  ;;  %v1133_v50 = vpop.f32.mrb[22].mxu0  ;;  %1317 = vtanh.f32 %v751_v48 }
 0x11a   : > { %v1294_v49 = vpop.eup %1293  ;;  %876 = vst.msk [vmem:[%s1481_s29 + $0x68] sm:$0xff] %vm862_vm2, %v1292_v46  ;;  %v1165_v51 = vpop.f32.mrb[22].mxu1  ;;  %1319 = vtanh.f32 %v1133_v50 }
 0x11b   : > { %v1296_v52 = vpop.eup %1295  ;;  %908 = vst.msk [vmem:[%s1481_s29 + $0x168] sm:$0xff] %vm862_vm2, %v1294_v49  ;;  %v626_v53 = vpop.f32.mrb[23].mxu0  ;;  %1321 = vtanh.f32 %v1165_v51 }
 0x11c   : > { %v754_v54 = vpop.f32.mrb[23].mxu1  ;;  %v1298_v55 = vpop.eup %1297  ;;  %881 = vst.msk [vmem:[%s1481_s29 + $0x90] sm:$0xff] %vm862_vm2, %v1296_v52  ;;  %1323 = vtanh.f32 %v626_v53 }
 0x11d   : > { %v1300_v56 = vpop.eup %1299  ;;  %913 = vst.msk [vmem:[%s1481_s29 + $0x190] sm:$0xff] %vm862_vm2, %v1298_v55  ;;  %1325 = vtanh.f32 %v754_v54  ;;  %v1136_v60 = vpop.f32.mrb[24].mxu0 }
 0x11e   : > { %v1302_v57 = vpop.eup %1301  ;;  %879 = vst.msk [vmem:[%s1481_s29 + $0x80] sm:$0xff] %vm862_vm2, %v1300_v56  ;;  %v1168_v61 = vpop.f32.mrb[24].mxu1  ;;  %1327 = vtanh.f32 %v1136_v60 }
 0x11f   : > { %v1304_v58 = vpop.eup %1303  ;;  %911 = vst.msk [vmem:[%s1481_s29 + $0x180] sm:$0xff] %vm862_vm2, %v1302_v57  ;;  %v639_v63 = vpop.f32.mrb[25].mxu0  ;;  %1329 = vtanh.f32 %v1168_v61 }
 0x120   : > { %v1306_v59 = vpop.eup %1305  ;;  %882 = vst.msk [vmem:[%s1481_s29 + $0x98] sm:$0xff] %vm862_vm2, %v1304_v58  ;;  %v767_v0 = vpop.f32.mrb[25].mxu1  ;;  %1331 = vtanh.f32 %v639_v63 }
 0x121   : > { %v1308_v62 = vpop.eup %1307  ;;  %914 = vst.msk [vmem:[%s1481_s29 + $0x198] sm:$0xff] %vm862_vm2, %v1306_v59  ;;  %v1137_v2 = vpop.f32.mrb[26].mxu0  ;;  %1333 = vtanh.f32 %v767_v0 }
 0x122   : > { %v1310_v1 = vpop.eup %1309  ;;  %880 = vst.msk [vmem:[%s1481_s29 + $0x88] sm:$0xff] %vm862_vm2, %v1308_v62  ;;  %v1169_v3 = vpop.f32.mrb[26].mxu1  ;;  %1335 = vtanh.f32 %v1137_v2 }
 0x123   : > { %v1312_v4 = vpop.eup %1311  ;;  %912 = vst.msk [vmem:[%s1481_s29 + $0x188] sm:$0xff] %vm862_vm2, %v1310_v1  ;;  %v642_v5 = vpop.f32.mrb[27].mxu0  ;;  %1337 = vtanh.f32 %v1169_v3 }
 0x124   : > { %v770_v6 = vpop.f32.mrb[27].mxu1  ;;  %v1314_v7 = vpop.eup %1313  ;;  %885 = vst.msk [vmem:[%s1481_s29 + $0xb0] sm:$0xff] %vm862_vm2, %v1312_v4  ;;  %1339 = vtanh.f32 %v642_v5 }
 0x125   : > { %v1316_v8 = vpop.eup %1315  ;;  %917 = vst.msk [vmem:[%s1481_s29 + $0x1b0] sm:$0xff] %vm862_vm2, %v1314_v7  ;;  %1341 = vtanh.f32 %v770_v6  ;;  %v1140_v12 = vpop.f32.mrb[28].mxu0 }
 0x126   : > { %v1318_v9 = vpop.eup %1317  ;;  %883 = vst.msk [vmem:[%s1481_s29 + $0xa0] sm:$0xff] %vm862_vm2, %v1316_v8  ;;  %v1172_v13 = vpop.f32.mrb[28].mxu1  ;;  %1343 = vtanh.f32 %v1140_v12 }
 0x127   : > { %v1320_v10 = vpop.eup %1319  ;;  %915 = vst.msk [vmem:[%s1481_s29 + $0x1a0] sm:$0xff] %vm862_vm2, %v1318_v9  ;;  %v655_v15 = vpop.f32.mrb[29].mxu0  ;;  %1345 = vtanh.f32 %v1172_v13 }
 0x128   : > { %v1322_v11 = vpop.eup %1321  ;;  %886 = vst.msk [vmem:[%s1481_s29 + $0xb8] sm:$0xff] %vm862_vm2, %v1320_v10  ;;  %v783_v16 = vpop.f32.mrb[29].mxu1  ;;  %1347 = vtanh.f32 %v655_v15 }
 0x129   : > { %v1324_v14 = vpop.eup %1323  ;;  %918 = vst.msk [vmem:[%s1481_s29 + $0x1b8] sm:$0xff] %vm862_vm2, %v1322_v11  ;;  %v1141_v18 = vpop.f32.mrb[30].mxu0  ;;  %1349 = vtanh.f32 %v783_v16 }
 0x12a   : > { %v1326_v17 = vpop.eup %1325  ;;  %884 = vst.msk [vmem:[%s1481_s29 + $0xa8] sm:$0xff] %vm862_vm2, %v1324_v14  ;;  %v1173_v19 = vpop.f32.mrb[30].mxu1  ;;  %1351 = vtanh.f32 %v1141_v18 }
 0x12b   : > { %v1328_v20 = vpop.eup %1327  ;;  %916 = vst.msk [vmem:[%s1481_s29 + $0x1a8] sm:$0xff] %vm862_vm2, %v1326_v17  ;;  %v658_v21 = vpop.f32.mrb[31].mxu0  ;;  %1353 = vtanh.f32 %v1173_v19 }
 0x12c   : > { %v786_v22 = vpop.f32.mrb[31].mxu1  ;;  %v1330_v23 = vpop.eup %1329  ;;  %889 = vst.msk [vmem:[%s1481_s29 + $0xd0] sm:$0xff] %vm862_vm2, %v1328_v20  ;;  %1355 = vtanh.f32 %v658_v21 }
 0x12d   : > { %v1332_v24 = vpop.eup %1331  ;;  %921 = vst.msk [vmem:[%s1481_s29 + $0x1d0] sm:$0xff] %vm862_vm2, %v1330_v23  ;;  %1357 = vtanh.f32 %v786_v22 }
 0x12e   : > { %v1334_v25 = vpop.eup %1333  ;;  %887 = vst.msk [vmem:[%s1481_s29 + $0xc0] sm:$0xff] %vm862_vm2, %v1332_v24 }
 0x12f   : > { %v1336_v26 = vpop.eup %1335  ;;  %919 = vst.msk [vmem:[%s1481_s29 + $0x1c0] sm:$0xff] %vm862_vm2, %v1334_v25 }
 0x130   : > { %v1338_v27 = vpop.eup %1337  ;;  %890 = vst.msk [vmem:[%s1481_s29 + $0xd8] sm:$0xff] %vm862_vm2, %v1336_v26 }
 0x131   : > { %v1340_v28 = vpop.eup %1339  ;;  %922 = vst.msk [vmem:[%s1481_s29 + $0x1d8] sm:$0xff] %vm862_vm2, %v1338_v27 }
 0x132   : > { %v1342_v29 = vpop.eup %1341  ;;  %888 = vst.msk [vmem:[%s1481_s29 + $0xc8] sm:$0xff] %vm862_vm2, %v1340_v28 }
 0x133   : > { %v1344_v30 = vpop.eup %1343  ;;  %920 = vst.msk [vmem:[%s1481_s29 + $0x1c8] sm:$0xff] %vm862_vm2, %v1342_v29 }
 0x134   : > { %v1346_v31 = vpop.eup %1345  ;;  %893 = vst.msk [vmem:[%s1481_s29 + $0xf0] sm:$0xff] %vm862_vm2, %v1344_v30 }
 0x135   : > { %v1348_v32 = vpop.eup %1347  ;;  %925 = vst.msk [vmem:[%s1481_s29 + $0x1f0] sm:$0xff] %vm862_vm2, %v1346_v31 }
 0x136   : > { %v1350_v33 = vpop.eup %1349  ;;  %891 = vst.msk [vmem:[%s1481_s29 + $0xe0] sm:$0xff] %vm862_vm2, %v1348_v32 }
 0x137   : > { %v1352_v34 = vpop.eup %1351  ;;  %923 = vst.msk [vmem:[%s1481_s29 + $0x1e0] sm:$0xff] %vm862_vm2, %v1350_v33 }
 0x138   : > { %v1354_v35 = vpop.eup %1353  ;;  %894 = vst.msk [vmem:[%s1481_s29 + $0xf8] sm:$0xff] %vm862_vm2, %v1352_v34 }
 0x139   : > { %v1356_v36 = vpop.eup %1355  ;;  %926 = vst.msk [vmem:[%s1481_s29 + $0x1f8] sm:$0xff] %vm862_vm2, %v1354_v35 }
 0x13a   : > { %v1358_v37 = vpop.eup %1357  ;;  %892 = vst.msk [vmem:[%s1481_s29 + $0xe8] sm:$0xff] %vm862_vm2, %v1356_v36 }
 0x13b   : > { %924 = vst.msk [vmem:[%s1481_s29 + $0x1e8] sm:$0xff] %vm862_vm2, %v1358_v37 }
 0x13c PF: > { %s12_s9 = sadd.s32 1, %s1365_s9  }
 0x13d   : > { %p9_p4 = scmp.ge.s32.totalorder %s12_s9, 6  }
 0x13f   :  { %11 = sbr.rel (!%p9_p4) target bundleno = 1 (0x1), region = 58 }

</bundles_post_ra>
